<compile_context>
chip_gen: v7x
topology: tpu7x:2x2x1
jax: 0.10.0
libtpu: 0.0.40
codegen_flags: <defaults>
</compile_context>

<pallas_src>
import functools

import jax
import jax.numpy as jnp
from jax.experimental import pallas as pl
from jax.experimental.pallas import tpu as pltpu

T_STEPS = 3
LEAKY_SLOPE = 0.01   # nn.LeakyReLU default
LANE = 128

_GEN_CFG = {
    # vmem_cap: physical VMEM; tile_budget: per-buffer budget for the h tile; n_tc: TCs/chip
    "v5e": dict(vmem_cap=128 << 20, tile_budget=12 << 20, tb_cap=128, n_tc=1),
    "v6e": dict(vmem_cap=128 << 20, tile_budget=16 << 20, tb_cap=256, n_tc=1),
    "v7x": dict(vmem_cap=64 << 20, tile_budget=8 << 20, tb_cap=256, n_tc=2),
}


def _round_up(x, m):
    return ((x + m - 1) // m) * m


def _tpu_generation():
    try:
        kind = jax.devices()[0].device_kind.lower()
    except Exception:
        return "v7x"
    if "v6" in kind:
        return "v6e"
    if "v5" in kind:
        return "v5e"
    # Unknown / v7x: assume the most VMEM-constrained, multi-TC configuration.
    return "v7x"


def _set2vec_kernel(h_ref, wq_ref, wr_ref, b_ref,
                    w1q_ref, w1r_ref, b1_ref, w2_ref, b2_ref, out_ref,
                    *, fuse_gates, attn_chunk):
    tb, n, d = h_ref.shape

    def lstm_preacts(q_bf, r_bf):
        # gate_k = q @ (W_ih_k[:, :D] + W_hh_k).T + r @ W_ih_k[:, D:].T + b_k
        # (W_hh folded into the q half because the LSTM hidden state == q)
        if fuse_gates:
            pre = (jnp.dot(q_bf, wq_ref[...], preferred_element_type=jnp.float32)
                   + jnp.dot(r_bf, wr_ref[...], preferred_element_type=jnp.float32)
                   + b_ref[...])                                     # (TB, 4D)
            # D % 128 == 0 -> lane-aligned static slices (free)
            return (pre[:, 0 * d:1 * d], pre[:, 1 * d:2 * d],
                    pre[:, 2 * d:3 * d], pre[:, 3 * d:4 * d])
        def gate(k):
            return (jnp.dot(q_bf, wq_ref[k], preferred_element_type=jnp.float32)
                    + jnp.dot(r_bf, wr_ref[k], preferred_element_type=jnp.float32)
                    + b_ref[k])
        return gate(0), gate(1), gate(2), gate(3)

    def step(_, carry):
        q, r, c = carry
        q_bf = q.astype(jnp.bfloat16)
        r_bf = r.astype(jnp.bfloat16)
        pre_i, pre_f, pre_g, pre_o = lstm_preacts(q_bf, r_bf)
        # Consume gate activations immediately (short vreg live ranges).
        c_new = jax.nn.sigmoid(pre_f) * c + jax.nn.sigmoid(pre_i) * jnp.tanh(pre_g)
        q_new = jax.nn.sigmoid(pre_o) * jnp.tanh(c_new)              # new hidden == new q

        # One-pass online-softmax attention over the set. The contraction is a per-row
        # matvec (free dim 1), so it stays on the VPU; h stays in its native dtype and
        # the products accumulate in f32 via promotion (q_new is f32).
        m = jnp.full((tb, 1), -jnp.inf, jnp.float32)
        l = jnp.zeros((tb, 1), jnp.float32)
        acc = jnp.zeros((tb, d), jnp.float32)
        for s0 in range(0, n, attn_chunk):
            sl = min(attn_chunk, n - s0)
            hc = h_ref[:, s0:s0 + sl, :]                             # (TB, sl, D)
            e = jnp.sum(hc * q_new[:, None, :], axis=-1)             # (TB, sl) f32
            m_new = jnp.maximum(m, jnp.max(e, axis=-1, keepdims=True))
            p = jnp.exp(e - m_new)
            scale = jnp.exp(m - m_new)
            l = scale * l + jnp.sum(p, axis=-1, keepdims=True)
            acc = scale * acc + jnp.sum(p[:, :, None] * hc, axis=1)  # (TB, D) f32
            m = m_new
        r_new = acc * pl.reciprocal(l, approx=True)                  # EUP, free slot
        return (q_new, r_new, c_new)

    init = (jnp.zeros((tb, d), jnp.float32),
            jnp.zeros((tb, d), jnp.float32),
            jnp.zeros((tb, d), jnp.float32))
    q, r, c = jax.lax.fori_loop(0, T_STEPS, step, init, unroll=True)

    # Output MLP on q_star = [q, r]: Linear(2D->Hr) -> LeakyReLU -> Linear(Hr->T_pad).
    z = (jnp.dot(q.astype(jnp.bfloat16), w1q_ref[...], preferred_element_type=jnp.float32)
         + jnp.dot(r.astype(jnp.bfloat16), w1r_ref[...], preferred_element_type=jnp.float32)
         + b1_ref[...])
    z = jnp.where(z > 0, z, LEAKY_SLOPE * z)
    out = (jnp.dot(z.astype(jnp.bfloat16), w2_ref[...], preferred_element_type=jnp.float32)
           + b2_ref[...])
    out_ref[...] = out.astype(out_ref.dtype)                         # lane-dense (TB, T_pad)


def _prepare_params(p, t_pad, fuse_gates):
    """PyTorch-layout Set2Vec params -> kernel layout (pre-transposed, W_hh folded into the
    q-half, per-gate split or gate-fused depending on lane alignment, lane-padded head)."""
    w_ih, b_ih = p["w_ih"], p["b_ih"]       # (4D, 2D), (4D,)
    w_hh, b_hh = p["w_hh"], p["b_hh"]       # (4D, D),  (4D,)
    w1, b1 = p["w1"], p["b1"]               # (Hr, 2D), (Hr,)
    w2, b2 = p["w2"], p["b2"]               # (T, Hr),  (T,)

    d = w_hh.shape[1]
    hr = w1.shape[0]
    t = w2.shape[0]

    wi = w_ih.reshape(4, d, 2 * d)          # gate-major: i, f, g, o
    wh = w_hh.reshape(4, d, d)
    wq_g = jnp.transpose(wi[:, :, :d] + wh, (0, 2, 1))               # (4, D, D)
    wr_g = jnp.transpose(wi[:, :, d:], (0, 2, 1))                    # (4, D, D)
    b_g = (b_ih + b_hh).astype(jnp.float32).reshape(4, d)

    if fuse_gates:
        # Concatenate gates along the output (lane) dim: gate k occupies cols [kD, (k+1)D).
        wq = jnp.concatenate([wq_g[k] for k in range(4)], axis=1).astype(jnp.bfloat16)  # (D, 4D)
        wr = jnp.concatenate([wr_g[k] for k in range(4)], axis=1).astype(jnp.bfloat16)  # (D, 4D)
        b = b_g.reshape(1, 4 * d)                                                        # (1, 4D)
    else:
        wq = wq_g.astype(jnp.bfloat16)                                                   # (4, D, D)
        wr = wr_g.astype(jnp.bfloat16)
        b = b_g.reshape(4, 1, d)                                                         # (4, 1, D)

    w1q = jnp.transpose(w1[:, :d]).astype(jnp.bfloat16)              # (D, Hr)
    w1r = jnp.transpose(w1[:, d:]).astype(jnp.bfloat16)              # (D, Hr)
    b1v = b1.astype(jnp.float32).reshape(1, hr)                      # (1, Hr)
    w2p = jnp.pad(jnp.transpose(w2), ((0, 0), (0, t_pad - t))).astype(jnp.bfloat16)  # (Hr, T_pad)
    b2p = jnp.pad(b2.astype(jnp.float32), (0, t_pad - t)).reshape(1, t_pad)          # (1, T_pad)
    return wq, wr, b, w1q, w1r, b1v, w2p, b2p


def set_readout(h, params, target_dim):
    """h: (B, N, D) node states (consumed in its own dtype). Returns (B, target_dim) f32."""
    B, N, D = h.shape
    t_pad = max(LANE, _round_up(target_dim, LANE))
    fuse_gates = (D % LANE == 0)
    wq, wr, b, w1q, w1r, b1, w2p, b2p = _prepare_params(params, t_pad, fuse_gates)
    hr = w1q.shape[1]

    cfg = _GEN_CFG[_tpu_generation()]
    vmem_limit = min((cfg["vmem_cap"] * 3) // 4, 100 << 20)

    # Padded (sublane, lane) tile bytes per batch row of the h tile, in h's own dtype.
    itemsize = h.dtype.itemsize
    sub = max(8, 32 // itemsize)
    row_bytes = _round_up(N, sub) * _round_up(D, LANE) * itemsize

    weight_bytes = sum(int(a.size) * a.dtype.itemsize
                       for a in (wq, wr, b, w1q, w1r, b1, w2p, b2p))
    reserved = 2 * weight_bytes + (4 << 20)                      # weights (worst case x2) + slack
    per_buf_budget = min(cfg["tile_budget"],
                         max(1 << 20, (vmem_limit - reserved) // 2))

    tb = max(1, per_buf_budget // row_bytes)
    tb = min(tb, B, cfg["tb_cap"])
    if cfg["n_tc"] > 1 and B > 8:
        tb = min(tb, pl.cdiv(B, 2))                              # >=2 grid steps -> both TCs busy
    if tb < B:
        tb = max(8, (tb // 8) * 8)                               # sublane-aligned output block
    grid = (pl.cdiv(B, tb),)
    # Make sure the scoped-VMEM request covers what will actually be allocated.
    needed = 2 * tb * row_bytes + 2 * weight_bytes + 2 * _round_up(tb, 8) * t_pad * 4 + (2 << 20)
    vmem_limit = max(vmem_limit, needed)

    attn_chunk = min(N, 256)

    flops = T_STEPS * B * (16 * D * D + 4 * N * D) + B * hr * (4 * D + 2 * t_pad)
    transcendentals = T_STEPS * B * (5 * D + N)
    bytes_accessed = B * N * D * itemsize + B * t_pad * 4 + weight_bytes

    kernel = functools.partial(_set2vec_kernel, fuse_gates=fuse_gates, attn_chunk=attn_chunk)

    def build(single_buffer_weights):
        def wspec(shape):
            kw = {}
            if single_buffer_weights:
                kw["pipeline_mode"] = pl.Buffered(1)             # block index never changes
            return pl.BlockSpec(shape, lambda i: (0,) * len(shape), **kw)

        return pl.pallas_call(
            kernel,
            out_shape=jax.ShapeDtypeStruct((B, t_pad), jnp.float32),
            grid=grid,
            in_specs=[
                pl.BlockSpec((tb, N, D), lambda i: (i, 0, 0)),   # h: tiled over batch
                wspec(wq.shape), wspec(wr.shape), wspec(b.shape),
                wspec(w1q.shape), wspec(w1r.shape), wspec(b1.shape),
                wspec(w2p.shape), wspec(b2p.shape),
            ],
            out_specs=pl.BlockSpec((tb, t_pad), lambda i: (i, 0)),
            compiler_params=pltpu.CompilerParams(
                dimension_semantics=("parallel",),
                vmem_limit_bytes=int(vmem_limit),
            ),
            cost_estimate=pl.CostEstimate(
                flops=int(flops),
                transcendentals=int(transcendentals),
                bytes_accessed=int(bytes_accessed),
            ),
        )

    args = (h, wq, wr, b, w1q, w1r, b1, w2p, b2p)
    try:
        out = build(True)(*args)
    except Exception:
        out = build(False)(*args)                                # fallback: default buffering
    return out[:, :target_dim]


def init_params(key, hidden_dim, readout_hidden_dim, target_dim):
    """Parameters in the original PyTorch layout (LSTMCell + 2-layer MLP)."""
    D, Hr, T = hidden_dim, readout_hidden_dim, target_dim
    ks = jax.random.split(key, 8)
    s = 0.1
    return {
        # LSTMCell(input=2D, hidden=D); gate order i, f, g, o
        "w_ih": s * jax.random.normal(ks[0], (4 * D, 2 * D), jnp.float32),
        "b_ih": s * jax.random.normal(ks[1], (4 * D,), jnp.float32),
        "w_hh": s * jax.random.normal(ks[2], (4 * D, D), jnp.float32),
        "b_hh": s * jax.random.normal(ks[3], (4 * D,), jnp.float32),
        # MLP: 2D -> Hr -> T
        "w1": s * jax.random.normal(ks[4], (Hr, 2 * D), jnp.float32),
        "b1": s * jax.random.normal(ks[5], (Hr,), jnp.float32),
        "w2": s * jax.random.normal(ks[6], (T, Hr), jnp.float32),
        "b2": s * jax.random.normal(ks[7], (T,), jnp.float32),
    }


def _set_readout_reference(h, p, target_dim):
    """Pure-JAX f32 reference with the PyTorch Set2Vec semantics."""
    B, N, D = h.shape
    q = jnp.zeros((B, D), jnp.float32)
    r = jnp.zeros((B, D), jnp.float32)
    c = jnp.zeros((B, D), jnp.float32)
    hl = jnp.zeros((B, D), jnp.float32)
    for _ in range(T_STEPS):
        q_star = jnp.concatenate([q, r], axis=1)
        g = q_star @ p["w_ih"].T + p["b_ih"] + hl @ p["w_hh"].T + p["b_hh"]
        gi, gf, gg, go = jnp.split(g, 4, axis=1)
        c = jax.nn.sigmoid(gf) * c + jax.nn.sigmoid(gi) * jnp.tanh(gg)
        hl = jax.nn.sigmoid(go) * jnp.tanh(c)
        q = hl
        e = jnp.einsum("bnd,bd->bn", h, q)
        a = jax.nn.softmax(e, axis=-1)
        r = jnp.einsum("bn,bnd->bd", a, h)
    z = jnp.concatenate([q, r], axis=1) @ p["w1"].T + p["b1"]
    z = jnp.where(z > 0, z, LEAKY_SLOPE * z)
    return z @ p["w2"].T + p["b2"]


if __name__ == "__main__":
    B, N = 2, 8                  # batch, set size (nodes per graph)
    hidden_dim = 32
    readout_hidden_dim = 64
    target_dim = 16

    key = jax.random.PRNGKey(0)
    k_h, k_p = jax.random.split(key)
    h = jax.random.normal(k_h, (B, N, hidden_dim), jnp.float32)
    params = init_params(k_p, hidden_dim, readout_hidden_dim, target_dim)

    out = jax.block_until_ready(set_readout(h, params, target_dim))
    assert out.shape == (B, target_dim), out.shape
    assert bool(jnp.all(jnp.isfinite(out)))

    ref = _set_readout_reference(h, params, target_dim)
    max_err = float(jnp.max(jnp.abs(out - ref)))
    assert max_err < 5e-2, f"max abs error vs reference: {max_err}"
    print("KERNEL_OK")
</pallas_src>

<mosaic_0001>
module attributes {stable_mosaic.version = 11 : i64} {
  func.func @_set2vec_kernel(%arg0: i32, %arg1: memref<2x8x32xf32, #tpu.memory_space<vmem>>, %arg2: memref<4x32x32xbf16, #tpu.memory_space<vmem>>, %arg3: memref<4x32x32xbf16, #tpu.memory_space<vmem>>, %arg4: memref<4x1x32xf32, #tpu.memory_space<vmem>>, %arg5: memref<32x64xbf16, #tpu.memory_space<vmem>>, %arg6: memref<32x64xbf16, #tpu.memory_space<vmem>>, %arg7: memref<1x64xf32, #tpu.memory_space<vmem>>, %arg8: memref<64x128xbf16, #tpu.memory_space<vmem>>, %arg9: memref<1x128xf32, #tpu.memory_space<vmem>>, %arg10: memref<2x128xf32, #tpu.memory_space<vmem>>) attributes {dimension_semantics = [#tpu.dimension_semantics<parallel>], iteration_bounds = array<i64: 1>, scalar_prefetch = 0 : i64, scratch_operands = 0 : i64, tpu.core_type = #tpu.core_type<tc>, window_params = [{transform_indices = @transform_0, window_bounds = array<i64: 2, 8, 32>}, {pipeline_mode = #tpu.pipeline_mode<synchronous>, transform_indices = @transform_1, window_bounds = array<i64: 4, 32, 32>}, {pipeline_mode = #tpu.pipeline_mode<synchronous>, transform_indices = @transform_2, window_bounds = array<i64: 4, 32, 32>}, {pipeline_mode = #tpu.pipeline_mode<synchronous>, transform_indices = @transform_3, window_bounds = array<i64: 4, 1, 32>}, {pipeline_mode = #tpu.pipeline_mode<synchronous>, transform_indices = @transform_4, window_bounds = array<i64: 32, 64>}, {pipeline_mode = #tpu.pipeline_mode<synchronous>, transform_indices = @transform_5, window_bounds = array<i64: 32, 64>}, {pipeline_mode = #tpu.pipeline_mode<synchronous>, transform_indices = @transform_6, window_bounds = array<i64: 1, 64>}, {pipeline_mode = #tpu.pipeline_mode<synchronous>, transform_indices = @transform_7, window_bounds = array<i64: 64, 128>}, {pipeline_mode = #tpu.pipeline_mode<synchronous>, transform_indices = @transform_8, window_bounds = array<i64: 1, 128>}, {transform_indices = @transform_9, window_bounds = array<i64: 2, 128>}]} {
    %cst = arith.constant 0.000000e+00 : f32
    %0 = vector.broadcast %cst : f32 to vector<2x32xf32>
    %cst_0 = arith.constant 0.000000e+00 : f32
    %1 = vector.broadcast %cst_0 : f32 to vector<2x32xf32>
    %cst_1 = arith.constant 0.000000e+00 : f32
    %2 = vector.broadcast %cst_1 : f32 to vector<2x32xf32>
    %c0_i32 = arith.constant 0 : i32
    %3 = arith.truncf %0 : vector<2x32xf32> to vector<2x32xbf16>
    %4 = arith.truncf %1 : vector<2x32xf32> to vector<2x32xbf16>
    %c0 = arith.constant 0 : index
    %c0_2 = arith.constant 0 : index
    %c0_3 = arith.constant 0 : index
    %5 = vector.load %arg2[%c0, %c0_2, %c0_3] : memref<4x32x32xbf16, #tpu.memory_space<vmem>>, vector<1x32x32xbf16>
    %6 = vector.shape_cast %5 : vector<1x32x32xbf16> to vector<32x32xbf16>
    %cst_4 = arith.constant dense<0.000000e+00> : vector<2x32xf32>
    %7 = tpu.matmul %3, %6, %cst_4 {dimension_numbers = #tpu.dot_dimension_numbers<[1], [0], [0], [1], [0, 0, 1, 1], [], []>} : vector<2x32xbf16>, vector<32x32xbf16>, vector<2x32xf32> -> vector<2x32xf32>
    %c0_5 = arith.constant 0 : index
    %c0_6 = arith.constant 0 : index
    %c0_7 = arith.constant 0 : index
    %8 = vector.load %arg3[%c0_5, %c0_6, %c0_7] : memref<4x32x32xbf16, #tpu.memory_space<vmem>>, vector<1x32x32xbf16>
    %9 = vector.shape_cast %8 : vector<1x32x32xbf16> to vector<32x32xbf16>
    %cst_8 = arith.constant dense<0.000000e+00> : vector<2x32xf32>
    %10 = tpu.matmul %4, %9, %cst_8 {dimension_numbers = #tpu.dot_dimension_numbers<[1], [0], [0], [1], [0, 0, 1, 1], [], []>} : vector<2x32xbf16>, vector<32x32xbf16>, vector<2x32xf32> -> vector<2x32xf32>
    %11 = arith.addf %7, %10 : vector<2x32xf32>
    %c0_9 = arith.constant 0 : index
    %c0_10 = arith.constant 0 : index
    %c0_11 = arith.constant 0 : index
    %12 = vector.load %arg4[%c0_9, %c0_10, %c0_11] : memref<4x1x32xf32, #tpu.memory_space<vmem>>, vector<1x1x32xf32>
    %13 = vector.shape_cast %12 : vector<1x1x32xf32> to vector<1x32xf32>
    %14 = vector.broadcast %13 : vector<1x32xf32> to vector<2x32xf32>
    %15 = arith.addf %11, %14 : vector<2x32xf32>
    %c1 = arith.constant 1 : index
    %c0_12 = arith.constant 0 : index
    %c0_13 = arith.constant 0 : index
    %16 = vector.load %arg2[%c1, %c0_12, %c0_13] : memref<4x32x32xbf16, #tpu.memory_space<vmem>>, vector<1x32x32xbf16>
    %17 = vector.shape_cast %16 : vector<1x32x32xbf16> to vector<32x32xbf16>
    %cst_14 = arith.constant dense<0.000000e+00> : vector<2x32xf32>
    %18 = tpu.matmul %3, %17, %cst_14 {dimension_numbers = #tpu.dot_dimension_numbers<[1], [0], [0], [1], [0, 0, 1, 1], [], []>} : vector<2x32xbf16>, vector<32x32xbf16>, vector<2x32xf32> -> vector<2x32xf32>
    %c1_15 = arith.constant 1 : index
    %c0_16 = arith.constant 0 : index
    %c0_17 = arith.constant 0 : index
    %19 = vector.load %arg3[%c1_15, %c0_16, %c0_17] : memref<4x32x32xbf16, #tpu.memory_space<vmem>>, vector<1x32x32xbf16>
    %20 = vector.shape_cast %19 : vector<1x32x32xbf16> to vector<32x32xbf16>
    %cst_18 = arith.constant dense<0.000000e+00> : vector<2x32xf32>
    %21 = tpu.matmul %4, %20, %cst_18 {dimension_numbers = #tpu.dot_dimension_numbers<[1], [0], [0], [1], [0, 0, 1, 1], [], []>} : vector<2x32xbf16>, vector<32x32xbf16>, vector<2x32xf32> -> vector<2x32xf32>
    %22 = arith.addf %18, %21 : vector<2x32xf32>
    %c1_19 = arith.constant 1 : index
    %c0_20 = arith.constant 0 : index
    %c0_21 = arith.constant 0 : index
    %23 = vector.load %arg4[%c1_19, %c0_20, %c0_21] : memref<4x1x32xf32, #tpu.memory_space<vmem>>, vector<1x1x32xf32>
    %24 = vector.shape_cast %23 : vector<1x1x32xf32> to vector<1x32xf32>
    %25 = vector.broadcast %24 : vector<1x32xf32> to vector<2x32xf32>
    %26 = arith.addf %22, %25 : vector<2x32xf32>
    %c2 = arith.constant 2 : index
    %c0_22 = arith.constant 0 : index
    %c0_23 = arith.constant 0 : index
    %27 = vector.load %arg2[%c2, %c0_22, %c0_23] : memref<4x32x32xbf16, #tpu.memory_space<vmem>>, vector<1x32x32xbf16>
    %28 = vector.shape_cast %27 : vector<1x32x32xbf16> to vector<32x32xbf16>
    %cst_24 = arith.constant dense<0.000000e+00> : vector<2x32xf32>
    %29 = tpu.matmul %3, %28, %cst_24 {dimension_numbers = #tpu.dot_dimension_numbers<[1], [0], [0], [1], [0, 0, 1, 1], [], []>} : vector<2x32xbf16>, vector<32x32xbf16>, vector<2x32xf32> -> vector<2x32xf32>
    %c2_25 = arith.constant 2 : index
    %c0_26 = arith.constant 0 : index
    %c0_27 = arith.constant 0 : index
    %30 = vector.load %arg3[%c2_25, %c0_26, %c0_27] : memref<4x32x32xbf16, #tpu.memory_space<vmem>>, vector<1x32x32xbf16>
    %31 = vector.shape_cast %30 : vector<1x32x32xbf16> to vector<32x32xbf16>
    %cst_28 = arith.constant dense<0.000000e+00> : vector<2x32xf32>
    %32 = tpu.matmul %4, %31, %cst_28 {dimension_numbers = #tpu.dot_dimension_numbers<[1], [0], [0], [1], [0, 0, 1, 1], [], []>} : vector<2x32xbf16>, vector<32x32xbf16>, vector<2x32xf32> -> vector<2x32xf32>
    %33 = arith.addf %29, %32 : vector<2x32xf32>
    %c2_29 = arith.constant 2 : index
    %c0_30 = arith.constant 0 : index
    %c0_31 = arith.constant 0 : index
    %34 = vector.load %arg4[%c2_29, %c0_30, %c0_31] : memref<4x1x32xf32, #tpu.memory_space<vmem>>, vector<1x1x32xf32>
    %35 = vector.shape_cast %34 : vector<1x1x32xf32> to vector<1x32xf32>
    %36 = vector.broadcast %35 : vector<1x32xf32> to vector<2x32xf32>
    %37 = arith.addf %33, %36 : vector<2x32xf32>
    %c3 = arith.constant 3 : index
    %c0_32 = arith.constant 0 : index
    %c0_33 = arith.constant 0 : index
    %38 = vector.load %arg2[%c3, %c0_32, %c0_33] : memref<4x32x32xbf16, #tpu.memory_space<vmem>>, vector<1x32x32xbf16>
    %39 = vector.shape_cast %38 : vector<1x32x32xbf16> to vector<32x32xbf16>
    %cst_34 = arith.constant dense<0.000000e+00> : vector<2x32xf32>
    %40 = tpu.matmul %3, %39, %cst_34 {dimension_numbers = #tpu.dot_dimension_numbers<[1], [0], [0], [1], [0, 0, 1, 1], [], []>} : vector<2x32xbf16>, vector<32x32xbf16>, vector<2x32xf32> -> vector<2x32xf32>
    %c3_35 = arith.constant 3 : index
    %c0_36 = arith.constant 0 : index
    %c0_37 = arith.constant 0 : index
    %41 = vector.load %arg3[%c3_35, %c0_36, %c0_37] : memref<4x32x32xbf16, #tpu.memory_space<vmem>>, vector<1x32x32xbf16>
    %42 = vector.shape_cast %41 : vector<1x32x32xbf16> to vector<32x32xbf16>
    %cst_38 = arith.constant dense<0.000000e+00> : vector<2x32xf32>
    %43 = tpu.matmul %4, %42, %cst_38 {dimension_numbers = #tpu.dot_dimension_numbers<[1], [0], [0], [1], [0, 0, 1, 1], [], []>} : vector<2x32xbf16>, vector<32x32xbf16>, vector<2x32xf32> -> vector<2x32xf32>
    %44 = arith.addf %40, %43 : vector<2x32xf32>
    %c3_39 = arith.constant 3 : index
    %c0_40 = arith.constant 0 : index
    %c0_41 = arith.constant 0 : index
    %45 = vector.load %arg4[%c3_39, %c0_40, %c0_41] : memref<4x1x32xf32, #tpu.memory_space<vmem>>, vector<1x1x32xf32>
    %46 = vector.shape_cast %45 : vector<1x1x32xf32> to vector<1x32xf32>
    %47 = vector.broadcast %46 : vector<1x32xf32> to vector<2x32xf32>
    %48 = arith.addf %44, %47 : vector<2x32xf32>
    %49 = arith.negf %26 : vector<2x32xf32>
    %50 = math.exp %49 : vector<2x32xf32>
    %cst_42 = arith.constant 1.000000e+00 : f32
    %51 = vector.broadcast %cst_42 : f32 to vector<2x32xf32>
    %52 = arith.addf %51, %50 : vector<2x32xf32>
    %53 = arith.divf %51, %52 : vector<2x32xf32>
    %54 = arith.mulf %53, %2 : vector<2x32xf32>
    %55 = arith.negf %15 : vector<2x32xf32>
    %56 = math.exp %55 : vector<2x32xf32>
    %cst_43 = arith.constant 1.000000e+00 : f32
    %57 = vector.broadcast %cst_43 : f32 to vector<2x32xf32>
    %58 = arith.addf %57, %56 : vector<2x32xf32>
    %59 = arith.divf %57, %58 : vector<2x32xf32>
    %60 = math.tanh %37 : vector<2x32xf32>
    %61 = arith.mulf %59, %60 : vector<2x32xf32>
    %62 = arith.addf %54, %61 : vector<2x32xf32>
    %63 = arith.negf %48 : vector<2x32xf32>
    %64 = math.exp %63 : vector<2x32xf32>
    %cst_44 = arith.constant 1.000000e+00 : f32
    %65 = vector.broadcast %cst_44 : f32 to vector<2x32xf32>
    %66 = arith.addf %65, %64 : vector<2x32xf32>
    %67 = arith.divf %65, %66 : vector<2x32xf32>
    %68 = math.tanh %62 : vector<2x32xf32>
    %69 = arith.mulf %67, %68 : vector<2x32xf32>
    %cst_45 = arith.constant 0xFF800000 : f32
    %70 = vector.broadcast %cst_45 : f32 to vector<2x1xf32>
    %cst_46 = arith.constant 0.000000e+00 : f32
    %71 = vector.broadcast %cst_46 : f32 to vector<2x1xf32>
    %cst_47 = arith.constant 0.000000e+00 : f32
    %72 = vector.broadcast %cst_47 : f32 to vector<2x32xf32>
    %c0_48 = arith.constant 0 : index
    %c0_49 = arith.constant 0 : index
    %c0_50 = arith.constant 0 : index
    %73 = vector.load %arg1[%c0_48, %c0_49, %c0_50] : memref<2x8x32xf32, #tpu.memory_space<vmem>>, vector<2x8x32xf32>
    %74 = vector.shape_cast %69 : vector<2x32xf32> to vector<2x1x32xf32>
    %75 = vector.broadcast %74 : vector<2x1x32xf32> to vector<2x8x32xf32>
    %76 = arith.mulf %73, %75 : vector<2x8x32xf32>
    %cst_51 = arith.constant dense<0.000000e+00> : vector<2x8xf32>
    %77 = vector.multi_reduction <add>, %76, %cst_51 [2] : vector<2x8x32xf32> to vector<2x8xf32>
    %cst_52 = arith.constant dense<0xFF800000> : vector<2xf32>
    %78 = vector.multi_reduction <maximumf>, %77, %cst_52 [1] : vector<2x8xf32> to vector<2xf32>
    %79 = vector.shape_cast %78 : vector<2xf32> to vector<2x1xf32>
    %80 = arith.maximumf %70, %79 : vector<2x1xf32>
    %81 = vector.broadcast %80 : vector<2x1xf32> to vector<2x8xf32>
    %82 = arith.subf %77, %81 : vector<2x8xf32>
    %83 = math.exp %82 : vector<2x8xf32>
    %84 = arith.subf %70, %80 : vector<2x1xf32>
    %85 = math.exp %84 : vector<2x1xf32>
    %86 = arith.mulf %85, %71 : vector<2x1xf32>
    %cst_53 = arith.constant dense<0.000000e+00> : vector<2xf32>
    %87 = vector.multi_reduction <add>, %83, %cst_53 [1] : vector<2x8xf32> to vector<2xf32>
    %88 = vector.shape_cast %87 : vector<2xf32> to vector<2x1xf32>
    %89 = arith.addf %86, %88 : vector<2x1xf32>
    %90 = vector.broadcast %85 : vector<2x1xf32> to vector<2x32xf32>
    %91 = arith.mulf %90, %72 : vector<2x32xf32>
    %92 = vector.shape_cast %83 : vector<2x8xf32> to vector<2x8x1xf32>
    %93 = vector.broadcast %92 : vector<2x8x1xf32> to vector<2x8x32xf32>
    %94 = arith.mulf %93, %73 : vector<2x8x32xf32>
    %cst_54 = arith.constant dense<0.000000e+00> : vector<2x32xf32>
    %95 = vector.multi_reduction <add>, %94, %cst_54 [1] : vector<2x8x32xf32> to vector<2x32xf32>
    %96 = arith.addf %91, %95 : vector<2x32xf32>
    %97 = tpu.reciprocal %89 {approx = true} : vector<2x1xf32> -> vector<2x1xf32>
    %98 = vector.broadcast %97 : vector<2x1xf32> to vector<2x32xf32>
    %99 = arith.mulf %96, %98 : vector<2x32xf32>
    %c1_i32 = arith.constant 1 : i32
    %100 = arith.truncf %69 : vector<2x32xf32> to vector<2x32xbf16>
    %101 = arith.truncf %99 : vector<2x32xf32> to vector<2x32xbf16>
    %c0_55 = arith.constant 0 : index
    %c0_56 = arith.constant 0 : index
    %c0_57 = arith.constant 0 : index
    %102 = vector.load %arg2[%c0_55, %c0_56, %c0_57] : memref<4x32x32xbf16, #tpu.memory_space<vmem>>, vector<1x32x32xbf16>
    %103 = vector.shape_cast %102 : vector<1x32x32xbf16> to vector<32x32xbf16>
    %cst_58 = arith.constant dense<0.000000e+00> : vector<2x32xf32>
    %104 = tpu.matmul %100, %103, %cst_58 {dimension_numbers = #tpu.dot_dimension_numbers<[1], [0], [0], [1], [0, 0, 1, 1], [], []>} : vector<2x32xbf16>, vector<32x32xbf16>, vector<2x32xf32> -> vector<2x32xf32>
    %c0_59 = arith.constant 0 : index
    %c0_60 = arith.constant 0 : index
    %c0_61 = arith.constant 0 : index
    %105 = vector.load %arg3[%c0_59, %c0_60, %c0_61] : memref<4x32x32xbf16, #tpu.memory_space<vmem>>, vector<1x32x32xbf16>
    %106 = vector.shape_cast %105 : vector<1x32x32xbf16> to vector<32x32xbf16>
    %cst_62 = arith.constant dense<0.000000e+00> : vector<2x32xf32>
    %107 = tpu.matmul %101, %106, %cst_62 {dimension_numbers = #tpu.dot_dimension_numbers<[1], [0], [0], [1], [0, 0, 1, 1], [], []>} : vector<2x32xbf16>, vector<32x32xbf16>, vector<2x32xf32> -> vector<2x32xf32>
    %108 = arith.addf %104, %107 : vector<2x32xf32>
    %c0_63 = arith.constant 0 : index
    %c0_64 = arith.constant 0 : index
    %c0_65 = arith.constant 0 : index
    %109 = vector.load %arg4[%c0_63, %c0_64, %c0_65] : memref<4x1x32xf32, #tpu.memory_space<vmem>>, vector<1x1x32xf32>
    %110 = vector.shape_cast %109 : vector<1x1x32xf32> to vector<1x32xf32>
    %111 = vector.broadcast %110 : vector<1x32xf32> to vector<2x32xf32>
    %112 = arith.addf %108, %111 : vector<2x32xf32>
    %c1_66 = arith.constant 1 : index
    %c0_67 = arith.constant 0 : index
    %c0_68 = arith.constant 0 : index
    %113 = vector.load %arg2[%c1_66, %c0_67, %c0_68] : memref<4x32x32xbf16, #tpu.memory_space<vmem>>, vector<1x32x32xbf16>
    %114 = vector.shape_cast %113 : vector<1x32x32xbf16> to vector<32x32xbf16>
    %cst_69 = arith.constant dense<0.000000e+00> : vector<2x32xf32>
    %115 = tpu.matmul %100, %114, %cst_69 {dimension_numbers = #tpu.dot_dimension_numbers<[1], [0], [0], [1], [0, 0, 1, 1], [], []>} : vector<2x32xbf16>, vector<32x32xbf16>, vector<2x32xf32> -> vector<2x32xf32>
    %c1_70 = arith.constant 1 : index
    %c0_71 = arith.constant 0 : index
    %c0_72 = arith.constant 0 : index
    %116 = vector.load %arg3[%c1_70, %c0_71, %c0_72] : memref<4x32x32xbf16, #tpu.memory_space<vmem>>, vector<1x32x32xbf16>
    %117 = vector.shape_cast %116 : vector<1x32x32xbf16> to vector<32x32xbf16>
    %cst_73 = arith.constant dense<0.000000e+00> : vector<2x32xf32>
    %118 = tpu.matmul %101, %117, %cst_73 {dimension_numbers = #tpu.dot_dimension_numbers<[1], [0], [0], [1], [0, 0, 1, 1], [], []>} : vector<2x32xbf16>, vector<32x32xbf16>, vector<2x32xf32> -> vector<2x32xf32>
    %119 = arith.addf %115, %118 : vector<2x32xf32>
    %c1_74 = arith.constant 1 : index
    %c0_75 = arith.constant 0 : index
    %c0_76 = arith.constant 0 : index
    %120 = vector.load %arg4[%c1_74, %c0_75, %c0_76] : memref<4x1x32xf32, #tpu.memory_space<vmem>>, vector<1x1x32xf32>
    %121 = vector.shape_cast %120 : vector<1x1x32xf32> to vector<1x32xf32>
    %122 = vector.broadcast %121 : vector<1x32xf32> to vector<2x32xf32>
    %123 = arith.addf %119, %122 : vector<2x32xf32>
    %c2_77 = arith.constant 2 : index
    %c0_78 = arith.constant 0 : index
    %c0_79 = arith.constant 0 : index
    %124 = vector.load %arg2[%c2_77, %c0_78, %c0_79] : memref<4x32x32xbf16, #tpu.memory_space<vmem>>, vector<1x32x32xbf16>
    %125 = vector.shape_cast %124 : vector<1x32x32xbf16> to vector<32x32xbf16>
    %cst_80 = arith.constant dense<0.000000e+00> : vector<2x32xf32>
    %126 = tpu.matmul %100, %125, %cst_80 {dimension_numbers = #tpu.dot_dimension_numbers<[1], [0], [0], [1], [0, 0, 1, 1], [], []>} : vector<2x32xbf16>, vector<32x32xbf16>, vector<2x32xf32> -> vector<2x32xf32>
    %c2_81 = arith.constant 2 : index
    %c0_82 = arith.constant 0 : index
    %c0_83 = arith.constant 0 : index
    %127 = vector.load %arg3[%c2_81, %c0_82, %c0_83] : memref<4x32x32xbf16, #tpu.memory_space<vmem>>, vector<1x32x32xbf16>
    %128 = vector.shape_cast %127 : vector<1x32x32xbf16> to vector<32x32xbf16>
    %cst_84 = arith.constant dense<0.000000e+00> : vector<2x32xf32>
    %129 = tpu.matmul %101, %128, %cst_84 {dimension_numbers = #tpu.dot_dimension_numbers<[1], [0], [0], [1], [0, 0, 1, 1], [], []>} : vector<2x32xbf16>, vector<32x32xbf16>, vector<2x32xf32> -> vector<2x32xf32>
    %130 = arith.addf %126, %129 : vector<2x32xf32>
    %c2_85 = arith.constant 2 : index
    %c0_86 = arith.constant 0 : index
    %c0_87 = arith.constant 0 : index
    %131 = vector.load %arg4[%c2_85, %c0_86, %c0_87] : memref<4x1x32xf32, #tpu.memory_space<vmem>>, vector<1x1x32xf32>
    %132 = vector.shape_cast %131 : vector<1x1x32xf32> to vector<1x32xf32>
    %133 = vector.broadcast %132 : vector<1x32xf32> to vector<2x32xf32>
    %134 = arith.addf %130, %133 : vector<2x32xf32>
    %c3_88 = arith.constant 3 : index
    %c0_89 = arith.constant 0 : index
    %c0_90 = arith.constant 0 : index
    %135 = vector.load %arg2[%c3_88, %c0_89, %c0_90] : memref<4x32x32xbf16, #tpu.memory_space<vmem>>, vector<1x32x32xbf16>
    %136 = vector.shape_cast %135 : vector<1x32x32xbf16> to vector<32x32xbf16>
    %cst_91 = arith.constant dense<0.000000e+00> : vector<2x32xf32>
    %137 = tpu.matmul %100, %136, %cst_91 {dimension_numbers = #tpu.dot_dimension_numbers<[1], [0], [0], [1], [0, 0, 1, 1], [], []>} : vector<2x32xbf16>, vector<32x32xbf16>, vector<2x32xf32> -> vector<2x32xf32>
    %c3_92 = arith.constant 3 : index
    %c0_93 = arith.constant 0 : index
    %c0_94 = arith.constant 0 : index
    %138 = vector.load %arg3[%c3_92, %c0_93, %c0_94] : memref<4x32x32xbf16, #tpu.memory_space<vmem>>, vector<1x32x32xbf16>
    %139 = vector.shape_cast %138 : vector<1x32x32xbf16> to vector<32x32xbf16>
    %cst_95 = arith.constant dense<0.000000e+00> : vector<2x32xf32>
    %140 = tpu.matmul %101, %139, %cst_95 {dimension_numbers = #tpu.dot_dimension_numbers<[1], [0], [0], [1], [0, 0, 1, 1], [], []>} : vector<2x32xbf16>, vector<32x32xbf16>, vector<2x32xf32> -> vector<2x32xf32>
    %141 = arith.addf %137, %140 : vector<2x32xf32>
    %c3_96 = arith.constant 3 : index
    %c0_97 = arith.constant 0 : index
    %c0_98 = arith.constant 0 : index
    %142 = vector.load %arg4[%c3_96, %c0_97, %c0_98] : memref<4x1x32xf32, #tpu.memory_space<vmem>>, vector<1x1x32xf32>
    %143 = vector.shape_cast %142 : vector<1x1x32xf32> to vector<1x32xf32>
    %144 = vector.broadcast %143 : vector<1x32xf32> to vector<2x32xf32>
    %145 = arith.addf %141, %144 : vector<2x32xf32>
    %146 = arith.negf %123 : vector<2x32xf32>
    %147 = math.exp %146 : vector<2x32xf32>
    %cst_99 = arith.constant 1.000000e+00 : f32
    %148 = vector.broadcast %cst_99 : f32 to vector<2x32xf32>
    %149 = arith.addf %148, %147 : vector<2x32xf32>
    %150 = arith.divf %148, %149 : vector<2x32xf32>
    %151 = arith.mulf %150, %62 : vector<2x32xf32>
    %152 = arith.negf %112 : vector<2x32xf32>
    %153 = math.exp %152 : vector<2x32xf32>
    %cst_100 = arith.constant 1.000000e+00 : f32
    %154 = vector.broadcast %cst_100 : f32 to vector<2x32xf32>
    %155 = arith.addf %154, %153 : vector<2x32xf32>
    %156 = arith.divf %154, %155 : vector<2x32xf32>
    %157 = math.tanh %134 : vector<2x32xf32>
    %158 = arith.mulf %156, %157 : vector<2x32xf32>
    %159 = arith.addf %151, %158 : vector<2x32xf32>
    %160 = arith.negf %145 : vector<2x32xf32>
    %161 = math.exp %160 : vector<2x32xf32>
    %cst_101 = arith.constant 1.000000e+00 : f32
    %162 = vector.broadcast %cst_101 : f32 to vector<2x32xf32>
    %163 = arith.addf %162, %161 : vector<2x32xf32>
    %164 = arith.divf %162, %163 : vector<2x32xf32>
    %165 = math.tanh %159 : vector<2x32xf32>
    %166 = arith.mulf %164, %165 : vector<2x32xf32>
    %cst_102 = arith.constant 0xFF800000 : f32
    %167 = vector.broadcast %cst_102 : f32 to vector<2x1xf32>
    %cst_103 = arith.constant 0.000000e+00 : f32
    %168 = vector.broadcast %cst_103 : f32 to vector<2x1xf32>
    %cst_104 = arith.constant 0.000000e+00 : f32
    %169 = vector.broadcast %cst_104 : f32 to vector<2x32xf32>
    %c0_105 = arith.constant 0 : index
    %c0_106 = arith.constant 0 : index
    %c0_107 = arith.constant 0 : index
    %170 = vector.load %arg1[%c0_105, %c0_106, %c0_107] : memref<2x8x32xf32, #tpu.memory_space<vmem>>, vector<2x8x32xf32>
    %171 = vector.shape_cast %166 : vector<2x32xf32> to vector<2x1x32xf32>
    %172 = vector.broadcast %171 : vector<2x1x32xf32> to vector<2x8x32xf32>
    %173 = arith.mulf %170, %172 : vector<2x8x32xf32>
    %cst_108 = arith.constant dense<0.000000e+00> : vector<2x8xf32>
    %174 = vector.multi_reduction <add>, %173, %cst_108 [2] : vector<2x8x32xf32> to vector<2x8xf32>
    %cst_109 = arith.constant dense<0xFF800000> : vector<2xf32>
    %175 = vector.multi_reduction <maximumf>, %174, %cst_109 [1] : vector<2x8xf32> to vector<2xf32>
    %176 = vector.shape_cast %175 : vector<2xf32> to vector<2x1xf32>
    %177 = arith.maximumf %167, %176 : vector<2x1xf32>
    %178 = vector.broadcast %177 : vector<2x1xf32> to vector<2x8xf32>
    %179 = arith.subf %174, %178 : vector<2x8xf32>
    %180 = math.exp %179 : vector<2x8xf32>
    %181 = arith.subf %167, %177 : vector<2x1xf32>
    %182 = math.exp %181 : vector<2x1xf32>
    %183 = arith.mulf %182, %168 : vector<2x1xf32>
    %cst_110 = arith.constant dense<0.000000e+00> : vector<2xf32>
    %184 = vector.multi_reduction <add>, %180, %cst_110 [1] : vector<2x8xf32> to vector<2xf32>
    %185 = vector.shape_cast %184 : vector<2xf32> to vector<2x1xf32>
    %186 = arith.addf %183, %185 : vector<2x1xf32>
    %187 = vector.broadcast %182 : vector<2x1xf32> to vector<2x32xf32>
    %188 = arith.mulf %187, %169 : vector<2x32xf32>
    %189 = vector.shape_cast %180 : vector<2x8xf32> to vector<2x8x1xf32>
    %190 = vector.broadcast %189 : vector<2x8x1xf32> to vector<2x8x32xf32>
    %191 = arith.mulf %190, %170 : vector<2x8x32xf32>
    %cst_111 = arith.constant dense<0.000000e+00> : vector<2x32xf32>
    %192 = vector.multi_reduction <add>, %191, %cst_111 [1] : vector<2x8x32xf32> to vector<2x32xf32>
    %193 = arith.addf %188, %192 : vector<2x32xf32>
    %194 = tpu.reciprocal %186 {approx = true} : vector<2x1xf32> -> vector<2x1xf32>
    %195 = vector.broadcast %194 : vector<2x1xf32> to vector<2x32xf32>
    %196 = arith.mulf %193, %195 : vector<2x32xf32>
    %c2_i32 = arith.constant 2 : i32
    %197 = arith.truncf %166 : vector<2x32xf32> to vector<2x32xbf16>
    %198 = arith.truncf %196 : vector<2x32xf32> to vector<2x32xbf16>
    %c0_112 = arith.constant 0 : index
    %c0_113 = arith.constant 0 : index
    %c0_114 = arith.constant 0 : index
    %199 = vector.load %arg2[%c0_112, %c0_113, %c0_114] : memref<4x32x32xbf16, #tpu.memory_space<vmem>>, vector<1x32x32xbf16>
    %200 = vector.shape_cast %199 : vector<1x32x32xbf16> to vector<32x32xbf16>
    %cst_115 = arith.constant dense<0.000000e+00> : vector<2x32xf32>
    %201 = tpu.matmul %197, %200, %cst_115 {dimension_numbers = #tpu.dot_dimension_numbers<[1], [0], [0], [1], [0, 0, 1, 1], [], []>} : vector<2x32xbf16>, vector<32x32xbf16>, vector<2x32xf32> -> vector<2x32xf32>
    %c0_116 = arith.constant 0 : index
    %c0_117 = arith.constant 0 : index
    %c0_118 = arith.constant 0 : index
    %202 = vector.load %arg3[%c0_116, %c0_117, %c0_118] : memref<4x32x32xbf16, #tpu.memory_space<vmem>>, vector<1x32x32xbf16>
    %203 = vector.shape_cast %202 : vector<1x32x32xbf16> to vector<32x32xbf16>
    %cst_119 = arith.constant dense<0.000000e+00> : vector<2x32xf32>
    %204 = tpu.matmul %198, %203, %cst_119 {dimension_numbers = #tpu.dot_dimension_numbers<[1], [0], [0], [1], [0, 0, 1, 1], [], []>} : vector<2x32xbf16>, vector<32x32xbf16>, vector<2x32xf32> -> vector<2x32xf32>
    %205 = arith.addf %201, %204 : vector<2x32xf32>
    %c0_120 = arith.constant 0 : index
    %c0_121 = arith.constant 0 : index
    %c0_122 = arith.constant 0 : index
    %206 = vector.load %arg4[%c0_120, %c0_121, %c0_122] : memref<4x1x32xf32, #tpu.memory_space<vmem>>, vector<1x1x32xf32>
    %207 = vector.shape_cast %206 : vector<1x1x32xf32> to vector<1x32xf32>
    %208 = vector.broadcast %207 : vector<1x32xf32> to vector<2x32xf32>
    %209 = arith.addf %205, %208 : vector<2x32xf32>
    %c1_123 = arith.constant 1 : index
    %c0_124 = arith.constant 0 : index
    %c0_125 = arith.constant 0 : index
    %210 = vector.load %arg2[%c1_123, %c0_124, %c0_125] : memref<4x32x32xbf16, #tpu.memory_space<vmem>>, vector<1x32x32xbf16>
    %211 = vector.shape_cast %210 : vector<1x32x32xbf16> to vector<32x32xbf16>
    %cst_126 = arith.constant dense<0.000000e+00> : vector<2x32xf32>
    %212 = tpu.matmul %197, %211, %cst_126 {dimension_numbers = #tpu.dot_dimension_numbers<[1], [0], [0], [1], [0, 0, 1, 1], [], []>} : vector<2x32xbf16>, vector<32x32xbf16>, vector<2x32xf32> -> vector<2x32xf32>
    %c1_127 = arith.constant 1 : index
    %c0_128 = arith.constant 0 : index
    %c0_129 = arith.constant 0 : index
    %213 = vector.load %arg3[%c1_127, %c0_128, %c0_129] : memref<4x32x32xbf16, #tpu.memory_space<vmem>>, vector<1x32x32xbf16>
    %214 = vector.shape_cast %213 : vector<1x32x32xbf16> to vector<32x32xbf16>
    %cst_130 = arith.constant dense<0.000000e+00> : vector<2x32xf32>
    %215 = tpu.matmul %198, %214, %cst_130 {dimension_numbers = #tpu.dot_dimension_numbers<[1], [0], [0], [1], [0, 0, 1, 1], [], []>} : vector<2x32xbf16>, vector<32x32xbf16>, vector<2x32xf32> -> vector<2x32xf32>
    %216 = arith.addf %212, %215 : vector<2x32xf32>
    %c1_131 = arith.constant 1 : index
    %c0_132 = arith.constant 0 : index
    %c0_133 = arith.constant 0 : index
    %217 = vector.load %arg4[%c1_131, %c0_132, %c0_133] : memref<4x1x32xf32, #tpu.memory_space<vmem>>, vector<1x1x32xf32>
    %218 = vector.shape_cast %217 : vector<1x1x32xf32> to vector<1x32xf32>
    %219 = vector.broadcast %218 : vector<1x32xf32> to vector<2x32xf32>
    %220 = arith.addf %216, %219 : vector<2x32xf32>
    %c2_134 = arith.constant 2 : index
    %c0_135 = arith.constant 0 : index
    %c0_136 = arith.constant 0 : index
    %221 = vector.load %arg2[%c2_134, %c0_135, %c0_136] : memref<4x32x32xbf16, #tpu.memory_space<vmem>>, vector<1x32x32xbf16>
    %222 = vector.shape_cast %221 : vector<1x32x32xbf16> to vector<32x32xbf16>
    %cst_137 = arith.constant dense<0.000000e+00> : vector<2x32xf32>
    %223 = tpu.matmul %197, %222, %cst_137 {dimension_numbers = #tpu.dot_dimension_numbers<[1], [0], [0], [1], [0, 0, 1, 1], [], []>} : vector<2x32xbf16>, vector<32x32xbf16>, vector<2x32xf32> -> vector<2x32xf32>
    %c2_138 = arith.constant 2 : index
    %c0_139 = arith.constant 0 : index
    %c0_140 = arith.constant 0 : index
    %224 = vector.load %arg3[%c2_138, %c0_139, %c0_140] : memref<4x32x32xbf16, #tpu.memory_space<vmem>>, vector<1x32x32xbf16>
    %225 = vector.shape_cast %224 : vector<1x32x32xbf16> to vector<32x32xbf16>
    %cst_141 = arith.constant dense<0.000000e+00> : vector<2x32xf32>
    %226 = tpu.matmul %198, %225, %cst_141 {dimension_numbers = #tpu.dot_dimension_numbers<[1], [0], [0], [1], [0, 0, 1, 1], [], []>} : vector<2x32xbf16>, vector<32x32xbf16>, vector<2x32xf32> -> vector<2x32xf32>
    %227 = arith.addf %223, %226 : vector<2x32xf32>
    %c2_142 = arith.constant 2 : index
    %c0_143 = arith.constant 0 : index
    %c0_144 = arith.constant 0 : index
    %228 = vector.load %arg4[%c2_142, %c0_143, %c0_144] : memref<4x1x32xf32, #tpu.memory_space<vmem>>, vector<1x1x32xf32>
    %229 = vector.shape_cast %228 : vector<1x1x32xf32> to vector<1x32xf32>
    %230 = vector.broadcast %229 : vector<1x32xf32> to vector<2x32xf32>
    %231 = arith.addf %227, %230 : vector<2x32xf32>
    %c3_145 = arith.constant 3 : index
    %c0_146 = arith.constant 0 : index
    %c0_147 = arith.constant 0 : index
    %232 = vector.load %arg2[%c3_145, %c0_146, %c0_147] : memref<4x32x32xbf16, #tpu.memory_space<vmem>>, vector<1x32x32xbf16>
    %233 = vector.shape_cast %232 : vector<1x32x32xbf16> to vector<32x32xbf16>
    %cst_148 = arith.constant dense<0.000000e+00> : vector<2x32xf32>
    %234 = tpu.matmul %197, %233, %cst_148 {dimension_numbers = #tpu.dot_dimension_numbers<[1], [0], [0], [1], [0, 0, 1, 1], [], []>} : vector<2x32xbf16>, vector<32x32xbf16>, vector<2x32xf32> -> vector<2x32xf32>
    %c3_149 = arith.constant 3 : index
    %c0_150 = arith.constant 0 : index
    %c0_151 = arith.constant 0 : index
    %235 = vector.load %arg3[%c3_149, %c0_150, %c0_151] : memref<4x32x32xbf16, #tpu.memory_space<vmem>>, vector<1x32x32xbf16>
    %236 = vector.shape_cast %235 : vector<1x32x32xbf16> to vector<32x32xbf16>
    %cst_152 = arith.constant dense<0.000000e+00> : vector<2x32xf32>
    %237 = tpu.matmul %198, %236, %cst_152 {dimension_numbers = #tpu.dot_dimension_numbers<[1], [0], [0], [1], [0, 0, 1, 1], [], []>} : vector<2x32xbf16>, vector<32x32xbf16>, vector<2x32xf32> -> vector<2x32xf32>
    %238 = arith.addf %234, %237 : vector<2x32xf32>
    %c3_153 = arith.constant 3 : index
    %c0_154 = arith.constant 0 : index
    %c0_155 = arith.constant 0 : index
    %239 = vector.load %arg4[%c3_153, %c0_154, %c0_155] : memref<4x1x32xf32, #tpu.memory_space<vmem>>, vector<1x1x32xf32>
    %240 = vector.shape_cast %239 : vector<1x1x32xf32> to vector<1x32xf32>
    %241 = vector.broadcast %240 : vector<1x32xf32> to vector<2x32xf32>
    %242 = arith.addf %238, %241 : vector<2x32xf32>
    %243 = arith.negf %220 : vector<2x32xf32>
    %244 = math.exp %243 : vector<2x32xf32>
    %cst_156 = arith.constant 1.000000e+00 : f32
    %245 = vector.broadcast %cst_156 : f32 to vector<2x32xf32>
    %246 = arith.addf %245, %244 : vector<2x32xf32>
    %247 = arith.divf %245, %246 : vector<2x32xf32>
    %248 = arith.mulf %247, %159 : vector<2x32xf32>
    %249 = arith.negf %209 : vector<2x32xf32>
    %250 = math.exp %249 : vector<2x32xf32>
    %cst_157 = arith.constant 1.000000e+00 : f32
    %251 = vector.broadcast %cst_157 : f32 to vector<2x32xf32>
    %252 = arith.addf %251, %250 : vector<2x32xf32>
    %253 = arith.divf %251, %252 : vector<2x32xf32>
    %254 = math.tanh %231 : vector<2x32xf32>
    %255 = arith.mulf %253, %254 : vector<2x32xf32>
    %256 = arith.addf %248, %255 : vector<2x32xf32>
    %257 = arith.negf %242 : vector<2x32xf32>
    %258 = math.exp %257 : vector<2x32xf32>
    %cst_158 = arith.constant 1.000000e+00 : f32
    %259 = vector.broadcast %cst_158 : f32 to vector<2x32xf32>
    %260 = arith.addf %259, %258 : vector<2x32xf32>
    %261 = arith.divf %259, %260 : vector<2x32xf32>
    %262 = math.tanh %256 : vector<2x32xf32>
    %263 = arith.mulf %261, %262 : vector<2x32xf32>
    %cst_159 = arith.constant 0xFF800000 : f32
    %264 = vector.broadcast %cst_159 : f32 to vector<2x1xf32>
    %cst_160 = arith.constant 0.000000e+00 : f32
    %265 = vector.broadcast %cst_160 : f32 to vector<2x1xf32>
    %cst_161 = arith.constant 0.000000e+00 : f32
    %266 = vector.broadcast %cst_161 : f32 to vector<2x32xf32>
    %c0_162 = arith.constant 0 : index
    %c0_163 = arith.constant 0 : index
    %c0_164 = arith.constant 0 : index
    %267 = vector.load %arg1[%c0_162, %c0_163, %c0_164] : memref<2x8x32xf32, #tpu.memory_space<vmem>>, vector<2x8x32xf32>
    %268 = vector.shape_cast %263 : vector<2x32xf32> to vector<2x1x32xf32>
    %269 = vector.broadcast %268 : vector<2x1x32xf32> to vector<2x8x32xf32>
    %270 = arith.mulf %267, %269 : vector<2x8x32xf32>
    %cst_165 = arith.constant dense<0.000000e+00> : vector<2x8xf32>
    %271 = vector.multi_reduction <add>, %270, %cst_165 [2] : vector<2x8x32xf32> to vector<2x8xf32>
    %cst_166 = arith.constant dense<0xFF800000> : vector<2xf32>
    %272 = vector.multi_reduction <maximumf>, %271, %cst_166 [1] : vector<2x8xf32> to vector<2xf32>
    %273 = vector.shape_cast %272 : vector<2xf32> to vector<2x1xf32>
    %274 = arith.maximumf %264, %273 : vector<2x1xf32>
    %275 = vector.broadcast %274 : vector<2x1xf32> to vector<2x8xf32>
    %276 = arith.subf %271, %275 : vector<2x8xf32>
    %277 = math.exp %276 : vector<2x8xf32>
    %278 = arith.subf %264, %274 : vector<2x1xf32>
    %279 = math.exp %278 : vector<2x1xf32>
    %280 = arith.mulf %279, %265 : vector<2x1xf32>
    %cst_167 = arith.constant dense<0.000000e+00> : vector<2xf32>
    %281 = vector.multi_reduction <add>, %277, %cst_167 [1] : vector<2x8xf32> to vector<2xf32>
    %282 = vector.shape_cast %281 : vector<2xf32> to vector<2x1xf32>
    %283 = arith.addf %280, %282 : vector<2x1xf32>
    %284 = vector.broadcast %279 : vector<2x1xf32> to vector<2x32xf32>
    %285 = arith.mulf %284, %266 : vector<2x32xf32>
    %286 = vector.shape_cast %277 : vector<2x8xf32> to vector<2x8x1xf32>
    %287 = vector.broadcast %286 : vector<2x8x1xf32> to vector<2x8x32xf32>
    %288 = arith.mulf %287, %267 : vector<2x8x32xf32>
    %cst_168 = arith.constant dense<0.000000e+00> : vector<2x32xf32>
    %289 = vector.multi_reduction <add>, %288, %cst_168 [1] : vector<2x8x32xf32> to vector<2x32xf32>
    %290 = arith.addf %285, %289 : vector<2x32xf32>
    %291 = tpu.reciprocal %283 {approx = true} : vector<2x1xf32> -> vector<2x1xf32>
    %292 = vector.broadcast %291 : vector<2x1xf32> to vector<2x32xf32>
    %293 = arith.mulf %290, %292 : vector<2x32xf32>
    %294 = arith.truncf %263 : vector<2x32xf32> to vector<2x32xbf16>
    %c0_169 = arith.constant 0 : index
    %c0_170 = arith.constant 0 : index
    %295 = vector.load %arg5[%c0_169, %c0_170] : memref<32x64xbf16, #tpu.memory_space<vmem>>, vector<32x64xbf16>
    %cst_171 = arith.constant dense<0.000000e+00> : vector<2x64xf32>
    %296 = tpu.matmul %294, %295, %cst_171 {dimension_numbers = #tpu.dot_dimension_numbers<[1], [0], [0], [1], [0, 0, 1, 1], [], []>} : vector<2x32xbf16>, vector<32x64xbf16>, vector<2x64xf32> -> vector<2x64xf32>
    %297 = arith.truncf %293 : vector<2x32xf32> to vector<2x32xbf16>
    %c0_172 = arith.constant 0 : index
    %c0_173 = arith.constant 0 : index
    %298 = vector.load %arg6[%c0_172, %c0_173] : memref<32x64xbf16, #tpu.memory_space<vmem>>, vector<32x64xbf16>
    %cst_174 = arith.constant dense<0.000000e+00> : vector<2x64xf32>
    %299 = tpu.matmul %297, %298, %cst_174 {dimension_numbers = #tpu.dot_dimension_numbers<[1], [0], [0], [1], [0, 0, 1, 1], [], []>} : vector<2x32xbf16>, vector<32x64xbf16>, vector<2x64xf32> -> vector<2x64xf32>
    %300 = arith.addf %296, %299 : vector<2x64xf32>
    %c0_175 = arith.constant 0 : index
    %c0_176 = arith.constant 0 : index
    %301 = vector.load %arg7[%c0_175, %c0_176] : memref<1x64xf32, #tpu.memory_space<vmem>>, vector<1x64xf32>
    %302 = vector.broadcast %301 : vector<1x64xf32> to vector<2x64xf32>
    %303 = arith.addf %300, %302 : vector<2x64xf32>
    %cst_177 = arith.constant 0.000000e+00 : f32
    %304 = vector.broadcast %cst_177 : f32 to vector<2x64xf32>
    %305 = arith.cmpf ogt, %303, %304 : vector<2x64xf32>
    %cst_178 = arith.constant 0.00999999977 : f32
    %306 = vector.broadcast %cst_178 : f32 to vector<2x64xf32>
    %307 = arith.mulf %306, %303 : vector<2x64xf32>
    %308 = arith.select %305, %303, %307 : vector<2x64xi1>, vector<2x64xf32>
    %309 = arith.truncf %308 : vector<2x64xf32> to vector<2x64xbf16>
    %c0_179 = arith.constant 0 : index
    %c0_180 = arith.constant 0 : index
    %310 = vector.load %arg8[%c0_179, %c0_180] : memref<64x128xbf16, #tpu.memory_space<vmem>>, vector<64x128xbf16>
    %cst_181 = arith.constant dense<0.000000e+00> : vector<2x128xf32>
    %311 = tpu.matmul %309, %310, %cst_181 {dimension_numbers = #tpu.dot_dimension_numbers<[1], [0], [0], [1], [0, 0, 1, 1], [], []>} : vector<2x64xbf16>, vector<64x128xbf16>, vector<2x128xf32> -> vector<2x128xf32>
    %c0_182 = arith.constant 0 : index
    %c0_183 = arith.constant 0 : index
    %312 = vector.load %arg9[%c0_182, %c0_183] : memref<1x128xf32, #tpu.memory_space<vmem>>, vector<1x128xf32>
    %313 = vector.broadcast %312 : vector<1x128xf32> to vector<2x128xf32>
    %314 = arith.addf %311, %313 : vector<2x128xf32>
    %c0_184 = arith.constant 0 : index
    %c0_185 = arith.constant 0 : index
    %315 = vector.load %arg10[%c0_184, %c0_185] : memref<2x128xf32, #tpu.memory_space<vmem>>, vector<2x128xf32>
    tpu.vector_store %arg10[%c0_184, %c0_185], %314 {strides = array<i32>} : memref<2x128xf32, #tpu.memory_space<vmem>>, vector<2x128xf32>,
    return
  }
  func.func @transform_0(%arg0: i32) -> (i32, i32, i32) {
    %c0_i32 = arith.constant 0 : i32
    %c0_i32_0 = arith.constant 0 : i32
    %c0_i32_1 = arith.constant 0 : i32
    return %arg0, %c0_i32, %c0_i32_0 : i32, i32, i32
  }
  func.func @transform_1(%arg0: i32) -> (i32, i32, i32) {
    %c0_i32 = arith.constant 0 : i32
    %c0_i32_0 = arith.constant 0 : i32
    %c0_i32_1 = arith.constant 0 : i32
    %c0_i32_2 = arith.constant 0 : i32
    return %c0_i32, %c0_i32_0, %c0_i32_1 : i32, i32, i32
  }
  func.func @transform_2(%arg0: i32) -> (i32, i32, i32) {
    %c0_i32 = arith.constant 0 : i32
    %c0_i32_0 = arith.constant 0 : i32
    %c0_i32_1 = arith.constant 0 : i32
    %c0_i32_2 = arith.constant 0 : i32
    return %c0_i32, %c0_i32_0, %c0_i32_1 : i32, i32, i32
  }
  func.func @transform_3(%arg0: i32) -> (i32, i32, i32) {
    %c0_i32 = arith.constant 0 : i32
    %c0_i32_0 = arith.constant 0 : i32
    %c0_i32_1 = arith.constant 0 : i32
    %c0_i32_2 = arith.constant 0 : i32
    return %c0_i32, %c0_i32_0, %c0_i32_1 : i32, i32, i32
  }
  func.func @transform_4(%arg0: i32) -> (i32, i32) {
    %c0_i32 = arith.constant 0 : i32
    %c0_i32_0 = arith.constant 0 : i32
    %c0_i32_1 = arith.constant 0 : i32
    return %c0_i32, %c0_i32_0 : i32, i32
  }
  func.func @transform_5(%arg0: i32) -> (i32, i32) {
    %c0_i32 = arith.constant 0 : i32
    %c0_i32_0 = arith.constant 0 : i32
    %c0_i32_1 = arith.constant 0 : i32
    return %c0_i32, %c0_i32_0 : i32, i32
  }
  func.func @transform_6(%arg0: i32) -> (i32, i32) {
    %c0_i32 = arith.constant 0 : i32
    %c0_i32_0 = arith.constant 0 : i32
    %c0_i32_1 = arith.constant 0 : i32
    return %c0_i32, %c0_i32_0 : i32, i32
  }
  func.func @transform_7(%arg0: i32) -> (i32, i32) {
    %c0_i32 = arith.constant 0 : i32
    %c0_i32_0 = arith.constant 0 : i32
    %c0_i32_1 = arith.constant 0 : i32
    return %c0_i32, %c0_i32_0 : i32, i32
  }
  func.func @transform_8(%arg0: i32) -> (i32, i32) {
    %c0_i32 = arith.constant 0 : i32
    %c0_i32_0 = arith.constant 0 : i32
    %c0_i32_1 = arith.constant 0 : i32
    return %c0_i32, %c0_i32_0 : i32, i32
  }
  func.func @transform_9(%arg0: i32) -> (i32, i32) {
    %c0_i32 = arith.constant 0 : i32
    %c0_i32_0 = arith.constant 0 : i32
    return %arg0, %c0_i32 : i32, i32
  }
}

module attributes {stable_mosaic.version = 11 : i64} {
  func.func @_set2vec_kernel(%arg0: i32, %arg1: memref<2x8x32xf32, #tpu.memory_space<vmem>>, %arg2: memref<4x32x32xbf16, #tpu.memory_space<vmem>>, %arg3: memref<4x32x32xbf16, #tpu.memory_space<vmem>>, %arg4: memref<4x1x32xf32, #tpu.memory_space<vmem>>, %arg5: memref<32x64xbf16, #tpu.memory_space<vmem>>, %arg6: memref<32x64xbf16, #tpu.memory_space<vmem>>, %arg7: memref<1x64xf32, #tpu.memory_space<vmem>>, %arg8: memref<64x128xbf16, #tpu.memory_space<vmem>>, %arg9: memref<1x128xf32, #tpu.memory_space<vmem>>, %arg10: memref<2x128xf32, #tpu.memory_space<vmem>>) attributes {dimension_semantics = [#tpu.dimension_semantics<parallel>], iteration_bounds = array<i64: 1>, scalar_prefetch = 0 : i64, scratch_operands = 0 : i64, tpu.core_type = #tpu.core_type<tc>, window_params = [{transform_indices = @transform_0, window_bounds = array<i64: 2, 8, 32>}, {pipeline_mode = #tpu.pipeline_mode<synchronous>, transform_indices = @transform_1, window_bounds = array<i64: 4, 32, 32>}, {pipeline_mode = #tpu.pipeline_mode<synchronous>, transform_indices = @transform_2, window_bounds = array<i64: 4, 32, 32>}, {pipeline_mode = #tpu.pipeline_mode<synchronous>, transform_indices = @transform_3, window_bounds = array<i64: 4, 1, 32>}, {pipeline_mode = #tpu.pipeline_mode<synchronous>, transform_indices = @transform_4, window_bounds = array<i64: 32, 64>}, {pipeline_mode = #tpu.pipeline_mode<synchronous>, transform_indices = @transform_5, window_bounds = array<i64: 32, 64>}, {pipeline_mode = #tpu.pipeline_mode<synchronous>, transform_indices = @transform_6, window_bounds = array<i64: 1, 64>}, {pipeline_mode = #tpu.pipeline_mode<synchronous>, transform_indices = @transform_7, window_bounds = array<i64: 64, 128>}, {pipeline_mode = #tpu.pipeline_mode<synchronous>, transform_indices = @transform_8, window_bounds = array<i64: 1, 128>}, {transform_indices = @transform_9, window_bounds = array<i64: 2, 128>}]} {
    %cst = arith.constant 0.000000e+00 : f32
    %0 = vector.broadcast %cst : f32 to vector<2x32xf32>
    %cst_0 = arith.constant 0.000000e+00 : f32
    %1 = vector.broadcast %cst_0 : f32 to vector<2x32xf32>
    %cst_1 = arith.constant 0.000000e+00 : f32
    %2 = vector.broadcast %cst_1 : f32 to vector<2x32xf32>
    %c0_i32 = arith.constant 0 : i32
    %3 = arith.truncf %0 : vector<2x32xf32> to vector<2x32xbf16>
    %4 = arith.truncf %1 : vector<2x32xf32> to vector<2x32xbf16>
    %c0 = arith.constant 0 : index
    %c0_2 = arith.constant 0 : index
    %c0_3 = arith.constant 0 : index
    %5 = vector.load %arg2[%c0, %c0_2, %c0_3] : memref<4x32x32xbf16, #tpu.memory_space<vmem>>, vector<1x32x32xbf16>
    %6 = vector.shape_cast %5 : vector<1x32x32xbf16> to vector<32x32xbf16>
    %cst_4 = arith.constant dense<0.000000e+00> : vector<2x32xf32>
    %7 = tpu.matmul %3, %6, %cst_4 {dimension_numbers = #tpu.dot_dimension_numbers<[1], [0], [0], [1], [0, 0, 1, 1], [], []>} : vector<2x32xbf16>, vector<32x32xbf16>, vector<2x32xf32> -> vector<2x32xf32>
    %c0_5 = arith.constant 0 : index
    %c0_6 = arith.constant 0 : index
    %c0_7 = arith.constant 0 : index
    %8 = vector.load %arg3[%c0_5, %c0_6, %c0_7] : memref<4x32x32xbf16, #tpu.memory_space<vmem>>, vector<1x32x32xbf16>
    %9 = vector.shape_cast %8 : vector<1x32x32xbf16> to vector<32x32xbf16>
    %cst_8 = arith.constant dense<0.000000e+00> : vector<2x32xf32>
    %10 = tpu.matmul %4, %9, %cst_8 {dimension_numbers = #tpu.dot_dimension_numbers<[1], [0], [0], [1], [0, 0, 1, 1], [], []>} : vector<2x32xbf16>, vector<32x32xbf16>, vector<2x32xf32> -> vector<2x32xf32>
    %11 = arith.addf %7, %10 : vector<2x32xf32>
    %c0_9 = arith.constant 0 : index
    %c0_10 = arith.constant 0 : index
    %c0_11 = arith.constant 0 : index
    %12 = vector.load %arg4[%c0_9, %c0_10, %c0_11] : memref<4x1x32xf32, #tpu.memory_space<vmem>>, vector<1x1x32xf32>
    %13 = vector.shape_cast %12 : vector<1x1x32xf32> to vector<1x32xf32>
    %14 = vector.broadcast %13 : vector<1x32xf32> to vector<2x32xf32>
    %15 = arith.addf %11, %14 : vector<2x32xf32>
    %c1 = arith.constant 1 : index
    %c0_12 = arith.constant 0 : index
    %c0_13 = arith.constant 0 : index
    %16 = vector.load %arg2[%c1, %c0_12, %c0_13] : memref<4x32x32xbf16, #tpu.memory_space<vmem>>, vector<1x32x32xbf16>
    %17 = vector.shape_cast %16 : vector<1x32x32xbf16> to vector<32x32xbf16>
    %cst_14 = arith.constant dense<0.000000e+00> : vector<2x32xf32>
    %18 = tpu.matmul %3, %17, %cst_14 {dimension_numbers = #tpu.dot_dimension_numbers<[1], [0], [0], [1], [0, 0, 1, 1], [], []>} : vector<2x32xbf16>, vector<32x32xbf16>, vector<2x32xf32> -> vector<2x32xf32>
    %c1_15 = arith.constant 1 : index
    %c0_16 = arith.constant 0 : index
    %c0_17 = arith.constant 0 : index
    %19 = vector.load %arg3[%c1_15, %c0_16, %c0_17] : memref<4x32x32xbf16, #tpu.memory_space<vmem>>, vector<1x32x32xbf16>
    %20 = vector.shape_cast %19 : vector<1x32x32xbf16> to vector<32x32xbf16>
    %cst_18 = arith.constant dense<0.000000e+00> : vector<2x32xf32>
    %21 = tpu.matmul %4, %20, %cst_18 {dimension_numbers = #tpu.dot_dimension_numbers<[1], [0], [0], [1], [0, 0, 1, 1], [], []>} : vector<2x32xbf16>, vector<32x32xbf16>, vector<2x32xf32> -> vector<2x32xf32>
    %22 = arith.addf %18, %21 : vector<2x32xf32>
    %c1_19 = arith.constant 1 : index
    %c0_20 = arith.constant 0 : index
    %c0_21 = arith.constant 0 : index
    %23 = vector.load %arg4[%c1_19, %c0_20, %c0_21] : memref<4x1x32xf32, #tpu.memory_space<vmem>>, vector<1x1x32xf32>
    %24 = vector.shape_cast %23 : vector<1x1x32xf32> to vector<1x32xf32>
    %25 = vector.broadcast %24 : vector<1x32xf32> to vector<2x32xf32>
    %26 = arith.addf %22, %25 : vector<2x32xf32>
    %c2 = arith.constant 2 : index
    %c0_22 = arith.constant 0 : index
    %c0_23 = arith.constant 0 : index
    %27 = vector.load %arg2[%c2, %c0_22, %c0_23] : memref<4x32x32xbf16, #tpu.memory_space<vmem>>, vector<1x32x32xbf16>
    %28 = vector.shape_cast %27 : vector<1x32x32xbf16> to vector<32x32xbf16>
    %cst_24 = arith.constant dense<0.000000e+00> : vector<2x32xf32>
    %29 = tpu.matmul %3, %28, %cst_24 {dimension_numbers = #tpu.dot_dimension_numbers<[1], [0], [0], [1], [0, 0, 1, 1], [], []>} : vector<2x32xbf16>, vector<32x32xbf16>, vector<2x32xf32> -> vector<2x32xf32>
    %c2_25 = arith.constant 2 : index
    %c0_26 = arith.constant 0 : index
    %c0_27 = arith.constant 0 : index
    %30 = vector.load %arg3[%c2_25, %c0_26, %c0_27] : memref<4x32x32xbf16, #tpu.memory_space<vmem>>, vector<1x32x32xbf16>
    %31 = vector.shape_cast %30 : vector<1x32x32xbf16> to vector<32x32xbf16>
    %cst_28 = arith.constant dense<0.000000e+00> : vector<2x32xf32>
    %32 = tpu.matmul %4, %31, %cst_28 {dimension_numbers = #tpu.dot_dimension_numbers<[1], [0], [0], [1], [0, 0, 1, 1], [], []>} : vector<2x32xbf16>, vector<32x32xbf16>, vector<2x32xf32> -> vector<2x32xf32>
    %33 = arith.addf %29, %32 : vector<2x32xf32>
    %c2_29 = arith.constant 2 : index
    %c0_30 = arith.constant 0 : index
    %c0_31 = arith.constant 0 : index
    %34 = vector.load %arg4[%c2_29, %c0_30, %c0_31] : memref<4x1x32xf32, #tpu.memory_space<vmem>>, vector<1x1x32xf32>
    %35 = vector.shape_cast %34 : vector<1x1x32xf32> to vector<1x32xf32>
    %36 = vector.broadcast %35 : vector<1x32xf32> to vector<2x32xf32>
    %37 = arith.addf %33, %36 : vector<2x32xf32>
    %c3 = arith.constant 3 : index
    %c0_32 = arith.constant 0 : index
    %c0_33 = arith.constant 0 : index
    %38 = vector.load %arg2[%c3, %c0_32, %c0_33] : memref<4x32x32xbf16, #tpu.memory_space<vmem>>, vector<1x32x32xbf16>
    %39 = vector.shape_cast %38 : vector<1x32x32xbf16> to vector<32x32xbf16>
    %cst_34 = arith.constant dense<0.000000e+00> : vector<2x32xf32>
    %40 = tpu.matmul %3, %39, %cst_34 {dimension_numbers = #tpu.dot_dimension_numbers<[1], [0], [0], [1], [0, 0, 1, 1], [], []>} : vector<2x32xbf16>, vector<32x32xbf16>, vector<2x32xf32> -> vector<2x32xf32>
    %c3_35 = arith.constant 3 : index
    %c0_36 = arith.constant 0 : index
    %c0_37 = arith.constant 0 : index
    %41 = vector.load %arg3[%c3_35, %c0_36, %c0_37] : memref<4x32x32xbf16, #tpu.memory_space<vmem>>, vector<1x32x32xbf16>
    %42 = vector.shape_cast %41 : vector<1x32x32xbf16> to vector<32x32xbf16>
    %cst_38 = arith.constant dense<0.000000e+00> : vector<2x32xf32>
    %43 = tpu.matmul %4, %42, %cst_38 {dimension_numbers = #tpu.dot_dimension_numbers<[1], [0], [0], [1], [0, 0, 1, 1], [], []>} : vector<2x32xbf16>, vector<32x32xbf16>, vector<2x32xf32> -> vector<2x32xf32>
    %44 = arith.addf %40, %43 : vector<2x32xf32>
    %c3_39 = arith.constant 3 : index
    %c0_40 = arith.constant 0 : index
    %c0_41 = arith.constant 0 : index
    %45 = vector.load %arg4[%c3_39, %c0_40, %c0_41] : memref<4x1x32xf32, #tpu.memory_space<vmem>>, vector<1x1x32xf32>
    %46 = vector.shape_cast %45 : vector<1x1x32xf32> to vector<1x32xf32>
    %47 = vector.broadcast %46 : vector<1x32xf32> to vector<2x32xf32>
    %48 = arith.addf %44, %47 : vector<2x32xf32>
    %49 = arith.negf %26 : vector<2x32xf32>
    %50 = math.exp %49 : vector<2x32xf32>
    %cst_42 = arith.constant 1.000000e+00 : f32
    %51 = vector.broadcast %cst_42 : f32 to vector<2x32xf32>
    %52 = arith.addf %51, %50 : vector<2x32xf32>
    %53 = arith.divf %51, %52 : vector<2x32xf32>
    %54 = arith.mulf %53, %2 : vector<2x32xf32>
    %55 = arith.negf %15 : vector<2x32xf32>
    %56 = math.exp %55 : vector<2x32xf32>
    %cst_43 = arith.constant 1.000000e+00 : f32
    %57 = vector.broadcast %cst_43 : f32 to vector<2x32xf32>
    %58 = arith.addf %57, %56 : vector<2x32xf32>
    %59 = arith.divf %57, %58 : vector<2x32xf32>
    %60 = math.tanh %37 : vector<2x32xf32>
    %61 = arith.mulf %59, %60 : vector<2x32xf32>
    %62 = arith.addf %54, %61 : vector<2x32xf32>
    %63 = arith.negf %48 : vector<2x32xf32>
    %64 = math.exp %63 : vector<2x32xf32>
    %cst_44 = arith.constant 1.000000e+00 : f32
    %65 = vector.broadcast %cst_44 : f32 to vector<2x32xf32>
    %66 = arith.addf %65, %64 : vector<2x32xf32>
    %67 = arith.divf %65, %66 : vector<2x32xf32>
    %68 = math.tanh %62 : vector<2x32xf32>
    %69 = arith.mulf %67, %68 : vector<2x32xf32>
    %cst_45 = arith.constant 0xFF800000 : f32
    %70 = vector.broadcast %cst_45 : f32 to vector<2x1xf32>
    %cst_46 = arith.constant 0.000000e+00 : f32
    %71 = vector.broadcast %cst_46 : f32 to vector<2x1xf32>
    %cst_47 = arith.constant 0.000000e+00 : f32
    %72 = vector.broadcast %cst_47 : f32 to vector<2x32xf32>
    %c0_48 = arith.constant 0 : index
    %c0_49 = arith.constant 0 : index
    %c0_50 = arith.constant 0 : index
    %73 = vector.load %arg1[%c0_48, %c0_49, %c0_50] : memref<2x8x32xf32, #tpu.memory_space<vmem>>, vector<2x8x32xf32>
    %74 = vector.shape_cast %69 : vector<2x32xf32> to vector<2x1x32xf32>
    %75 = vector.broadcast %74 : vector<2x1x32xf32> to vector<2x8x32xf32>
    %76 = arith.mulf %73, %75 : vector<2x8x32xf32>
    %cst_51 = arith.constant dense<0.000000e+00> : vector<2x8xf32>
    %77 = vector.multi_reduction <add>, %76, %cst_51 [2] : vector<2x8x32xf32> to vector<2x8xf32>
    %cst_52 = arith.constant dense<0xFF800000> : vector<2xf32>
    %78 = vector.multi_reduction <maximumf>, %77, %cst_52 [1] : vector<2x8xf32> to vector<2xf32>
    %79 = vector.shape_cast %78 : vector<2xf32> to vector<2x1xf32>
    %80 = arith.maximumf %70, %79 : vector<2x1xf32>
    %81 = vector.broadcast %80 : vector<2x1xf32> to vector<2x8xf32>
    %82 = arith.subf %77, %81 : vector<2x8xf32>
    %83 = math.exp %82 : vector<2x8xf32>
    %84 = arith.subf %70, %80 : vector<2x1xf32>
    %85 = math.exp %84 : vector<2x1xf32>
    %86 = arith.mulf %85, %71 : vector<2x1xf32>
    %cst_53 = arith.constant dense<0.000000e+00> : vector<2xf32>
    %87 = vector.multi_reduction <add>, %83, %cst_53 [1] : vector<2x8xf32> to vector<2xf32>
    %88 = vector.shape_cast %87 : vector<2xf32> to vector<2x1xf32>
    %89 = arith.addf %86, %88 : vector<2x1xf32>
    %90 = vector.broadcast %85 : vector<2x1xf32> to vector<2x32xf32>
    %91 = arith.mulf %90, %72 : vector<2x32xf32>
    %92 = vector.shape_cast %83 : vector<2x8xf32> to vector<2x8x1xf32>
    %93 = vector.broadcast %92 : vector<2x8x1xf32> to vector<2x8x32xf32>
    %94 = arith.mulf %93, %73 : vector<2x8x32xf32>
    %cst_54 = arith.constant dense<0.000000e+00> : vector<2x32xf32>
    %95 = vector.multi_reduction <add>, %94, %cst_54 [1] : vector<2x8x32xf32> to vector<2x32xf32>
    %96 = arith.addf %91, %95 : vector<2x32xf32>
    %97 = tpu.reciprocal %89 {approx = true} : vector<2x1xf32> -> vector<2x1xf32>
    %98 = vector.broadcast %97 : vector<2x1xf32> to vector<2x32xf32>
    %99 = arith.mulf %96, %98 : vector<2x32xf32>
    %c1_i32 = arith.constant 1 : i32
    %100 = arith.truncf %69 : vector<2x32xf32> to vector<2x32xbf16>
    %101 = arith.truncf %99 : vector<2x32xf32> to vector<2x32xbf16>
    %c0_55 = arith.constant 0 : index
    %c0_56 = arith.constant 0 : index
    %c0_57 = arith.constant 0 : index
    %102 = vector.load %arg2[%c0_55, %c0_56, %c0_57] : memref<4x32x32xbf16, #tpu.memory_space<vmem>>, vector<1x32x32xbf16>
    %103 = vector.shape_cast %102 : vector<1x32x32xbf16> to vector<32x32xbf16>
    %cst_58 = arith.constant dense<0.000000e+00> : vector<2x32xf32>
    %104 = tpu.matmul %100, %103, %cst_58 {dimension_numbers = #tpu.dot_dimension_numbers<[1], [0], [0], [1], [0, 0, 1, 1], [], []>} : vector<2x32xbf16>, vector<32x32xbf16>, vector<2x32xf32> -> vector<2x32xf32>
    %c0_59 = arith.constant 0 : index
    %c0_60 = arith.constant 0 : index
    %c0_61 = arith.constant 0 : index
    %105 = vector.load %arg3[%c0_59, %c0_60, %c0_61] : memref<4x32x32xbf16, #tpu.memory_space<vmem>>, vector<1x32x32xbf16>
    %106 = vector.shape_cast %105 : vector<1x32x32xbf16> to vector<32x32xbf16>
    %cst_62 = arith.constant dense<0.000000e+00> : vector<2x32xf32>
    %107 = tpu.matmul %101, %106, %cst_62 {dimension_numbers = #tpu.dot_dimension_numbers<[1], [0], [0], [1], [0, 0, 1, 1], [], []>} : vector<2x32xbf16>, vector<32x32xbf16>, vector<2x32xf32> -> vector<2x32xf32>
    %108 = arith.addf %104, %107 : vector<2x32xf32>
    %c0_63 = arith.constant 0 : index
    %c0_64 = arith.constant 0 : index
    %c0_65 = arith.constant 0 : index
    %109 = vector.load %arg4[%c0_63, %c0_64, %c0_65] : memref<4x1x32xf32, #tpu.memory_space<vmem>>, vector<1x1x32xf32>
    %110 = vector.shape_cast %109 : vector<1x1x32xf32> to vector<1x32xf32>
    %111 = vector.broadcast %110 : vector<1x32xf32> to vector<2x32xf32>
    %112 = arith.addf %108, %111 : vector<2x32xf32>
    %c1_66 = arith.constant 1 : index
    %c0_67 = arith.constant 0 : index
    %c0_68 = arith.constant 0 : index
    %113 = vector.load %arg2[%c1_66, %c0_67, %c0_68] : memref<4x32x32xbf16, #tpu.memory_space<vmem>>, vector<1x32x32xbf16>
    %114 = vector.shape_cast %113 : vector<1x32x32xbf16> to vector<32x32xbf16>
    %cst_69 = arith.constant dense<0.000000e+00> : vector<2x32xf32>
    %115 = tpu.matmul %100, %114, %cst_69 {dimension_numbers = #tpu.dot_dimension_numbers<[1], [0], [0], [1], [0, 0, 1, 1], [], []>} : vector<2x32xbf16>, vector<32x32xbf16>, vector<2x32xf32> -> vector<2x32xf32>
    %c1_70 = arith.constant 1 : index
    %c0_71 = arith.constant 0 : index
    %c0_72 = arith.constant 0 : index
    %116 = vector.load %arg3[%c1_70, %c0_71, %c0_72] : memref<4x32x32xbf16, #tpu.memory_space<vmem>>, vector<1x32x32xbf16>
    %117 = vector.shape_cast %116 : vector<1x32x32xbf16> to vector<32x32xbf16>
    %cst_73 = arith.constant dense<0.000000e+00> : vector<2x32xf32>
    %118 = tpu.matmul %101, %117, %cst_73 {dimension_numbers = #tpu.dot_dimension_numbers<[1], [0], [0], [1], [0, 0, 1, 1], [], []>} : vector<2x32xbf16>, vector<32x32xbf16>, vector<2x32xf32> -> vector<2x32xf32>
    %119 = arith.addf %115, %118 : vector<2x32xf32>
    %c1_74 = arith.constant 1 : index
    %c0_75 = arith.constant 0 : index
    %c0_76 = arith.constant 0 : index
    %120 = vector.load %arg4[%c1_74, %c0_75, %c0_76] : memref<4x1x32xf32, #tpu.memory_space<vmem>>, vector<1x1x32xf32>
    %121 = vector.shape_cast %120 : vector<1x1x32xf32> to vector<1x32xf32>
    %122 = vector.broadcast %121 : vector<1x32xf32> to vector<2x32xf32>
    %123 = arith.addf %119, %122 : vector<2x32xf32>
    %c2_77 = arith.constant 2 : index
    %c0_78 = arith.constant 0 : index
    %c0_79 = arith.constant 0 : index
    %124 = vector.load %arg2[%c2_77, %c0_78, %c0_79] : memref<4x32x32xbf16, #tpu.memory_space<vmem>>, vector<1x32x32xbf16>
    %125 = vector.shape_cast %124 : vector<1x32x32xbf16> to vector<32x32xbf16>
    %cst_80 = arith.constant dense<0.000000e+00> : vector<2x32xf32>
    %126 = tpu.matmul %100, %125, %cst_80 {dimension_numbers = #tpu.dot_dimension_numbers<[1], [0], [0], [1], [0, 0, 1, 1], [], []>} : vector<2x32xbf16>, vector<32x32xbf16>, vector<2x32xf32> -> vector<2x32xf32>
    %c2_81 = arith.constant 2 : index
    %c0_82 = arith.constant 0 : index
    %c0_83 = arith.constant 0 : index
    %127 = vector.load %arg3[%c2_81, %c0_82, %c0_83] : memref<4x32x32xbf16, #tpu.memory_space<vmem>>, vector<1x32x32xbf16>
    %128 = vector.shape_cast %127 : vector<1x32x32xbf16> to vector<32x32xbf16>
    %cst_84 = arith.constant dense<0.000000e+00> : vector<2x32xf32>
    %129 = tpu.matmul %101, %128, %cst_84 {dimension_numbers = #tpu.dot_dimension_numbers<[1], [0], [0], [1], [0, 0, 1, 1], [], []>} : vector<2x32xbf16>, vector<32x32xbf16>, vector<2x32xf32> -> vector<2x32xf32>
    %130 = arith.addf %126, %129 : vector<2x32xf32>
    %c2_85 = arith.constant 2 : index
    %c0_86 = arith.constant 0 : index
    %c0_87 = arith.constant 0 : index
    %131 = vector.load %arg4[%c2_85, %c0_86, %c0_87] : memref<4x1x32xf32, #tpu.memory_space<vmem>>, vector<1x1x32xf32>
    %132 = vector.shape_cast %131 : vector<1x1x32xf32> to vector<1x32xf32>
    %133 = vector.broadcast %132 : vector<1x32xf32> to vector<2x32xf32>
    %134 = arith.addf %130, %133 : vector<2x32xf32>
    %c3_88 = arith.constant 3 : index
    %c0_89 = arith.constant 0 : index
    %c0_90 = arith.constant 0 : index
    %135 = vector.load %arg2[%c3_88, %c0_89, %c0_90] : memref<4x32x32xbf16, #tpu.memory_space<vmem>>, vector<1x32x32xbf16>
    %136 = vector.shape_cast %135 : vector<1x32x32xbf16> to vector<32x32xbf16>
    %cst_91 = arith.constant dense<0.000000e+00> : vector<2x32xf32>
    %137 = tpu.matmul %100, %136, %cst_91 {dimension_numbers = #tpu.dot_dimension_numbers<[1], [0], [0], [1], [0, 0, 1, 1], [], []>} : vector<2x32xbf16>, vector<32x32xbf16>, vector<2x32xf32> -> vector<2x32xf32>
    %c3_92 = arith.constant 3 : index
    %c0_93 = arith.constant 0 : index
    %c0_94 = arith.constant 0 : index
    %138 = vector.load %arg3[%c3_92, %c0_93, %c0_94] : memref<4x32x32xbf16, #tpu.memory_space<vmem>>, vector<1x32x32xbf16>
    %139 = vector.shape_cast %138 : vector<1x32x32xbf16> to vector<32x32xbf16>
    %cst_95 = arith.constant dense<0.000000e+00> : vector<2x32xf32>
    %140 = tpu.matmul %101, %139, %cst_95 {dimension_numbers = #tpu.dot_dimension_numbers<[1], [0], [0], [1], [0, 0, 1, 1], [], []>} : vector<2x32xbf16>, vector<32x32xbf16>, vector<2x32xf32> -> vector<2x32xf32>
    %141 = arith.addf %137, %140 : vector<2x32xf32>
    %c3_96 = arith.constant 3 : index
    %c0_97 = arith.constant 0 : index
    %c0_98 = arith.constant 0 : index
    %142 = vector.load %arg4[%c3_96, %c0_97, %c0_98] : memref<4x1x32xf32, #tpu.memory_space<vmem>>, vector<1x1x32xf32>
    %143 = vector.shape_cast %142 : vector<1x1x32xf32> to vector<1x32xf32>
    %144 = vector.broadcast %143 : vector<1x32xf32> to vector<2x32xf32>
    %145 = arith.addf %141, %144 : vector<2x32xf32>
    %146 = arith.negf %123 : vector<2x32xf32>
    %147 = math.exp %146 : vector<2x32xf32>
    %cst_99 = arith.constant 1.000000e+00 : f32
    %148 = vector.broadcast %cst_99 : f32 to vector<2x32xf32>
    %149 = arith.addf %148, %147 : vector<2x32xf32>
    %150 = arith.divf %148, %149 : vector<2x32xf32>
    %151 = arith.mulf %150, %62 : vector<2x32xf32>
    %152 = arith.negf %112 : vector<2x32xf32>
    %153 = math.exp %152 : vector<2x32xf32>
    %cst_100 = arith.constant 1.000000e+00 : f32
    %154 = vector.broadcast %cst_100 : f32 to vector<2x32xf32>
    %155 = arith.addf %154, %153 : vector<2x32xf32>
    %156 = arith.divf %154, %155 : vector<2x32xf32>
    %157 = math.tanh %134 : vector<2x32xf32>
    %158 = arith.mulf %156, %157 : vector<2x32xf32>
    %159 = arith.addf %151, %158 : vector<2x32xf32>
    %160 = arith.negf %145 : vector<2x32xf32>
    %161 = math.exp %160 : vector<2x32xf32>
    %cst_101 = arith.constant 1.000000e+00 : f32
    %162 = vector.broadcast %cst_101 : f32 to vector<2x32xf32>
    %163 = arith.addf %162, %161 : vector<2x32xf32>
    %164 = arith.divf %162, %163 : vector<2x32xf32>
    %165 = math.tanh %159 : vector<2x32xf32>
    %166 = arith.mulf %164, %165 : vector<2x32xf32>
    %cst_102 = arith.constant 0xFF800000 : f32
    %167 = vector.broadcast %cst_102 : f32 to vector<2x1xf32>
    %cst_103 = arith.constant 0.000000e+00 : f32
    %168 = vector.broadcast %cst_103 : f32 to vector<2x1xf32>
    %cst_104 = arith.constant 0.000000e+00 : f32
    %169 = vector.broadcast %cst_104 : f32 to vector<2x32xf32>
    %c0_105 = arith.constant 0 : index
    %c0_106 = arith.constant 0 : index
    %c0_107 = arith.constant 0 : index
    %170 = vector.load %arg1[%c0_105, %c0_106, %c0_107] : memref<2x8x32xf32, #tpu.memory_space<vmem>>, vector<2x8x32xf32>
    %171 = vector.shape_cast %166 : vector<2x32xf32> to vector<2x1x32xf32>
    %172 = vector.broadcast %171 : vector<2x1x32xf32> to vector<2x8x32xf32>
    %173 = arith.mulf %170, %172 : vector<2x8x32xf32>
    %cst_108 = arith.constant dense<0.000000e+00> : vector<2x8xf32>
    %174 = vector.multi_reduction <add>, %173, %cst_108 [2] : vector<2x8x32xf32> to vector<2x8xf32>
    %cst_109 = arith.constant dense<0xFF800000> : vector<2xf32>
    %175 = vector.multi_reduction <maximumf>, %174, %cst_109 [1] : vector<2x8xf32> to vector<2xf32>
    %176 = vector.shape_cast %175 : vector<2xf32> to vector<2x1xf32>
    %177 = arith.maximumf %167, %176 : vector<2x1xf32>
    %178 = vector.broadcast %177 : vector<2x1xf32> to vector<2x8xf32>
    %179 = arith.subf %174, %178 : vector<2x8xf32>
    %180 = math.exp %179 : vector<2x8xf32>
    %181 = arith.subf %167, %177 : vector<2x1xf32>
    %182 = math.exp %181 : vector<2x1xf32>
    %183 = arith.mulf %182, %168 : vector<2x1xf32>
    %cst_110 = arith.constant dense<0.000000e+00> : vector<2xf32>
    %184 = vector.multi_reduction <add>, %180, %cst_110 [1] : vector<2x8xf32> to vector<2xf32>
    %185 = vector.shape_cast %184 : vector<2xf32> to vector<2x1xf32>
    %186 = arith.addf %183, %185 : vector<2x1xf32>
    %187 = vector.broadcast %182 : vector<2x1xf32> to vector<2x32xf32>
    %188 = arith.mulf %187, %169 : vector<2x32xf32>
    %189 = vector.shape_cast %180 : vector<2x8xf32> to vector<2x8x1xf32>
    %190 = vector.broadcast %189 : vector<2x8x1xf32> to vector<2x8x32xf32>
    %191 = arith.mulf %190, %170 : vector<2x8x32xf32>
    %cst_111 = arith.constant dense<0.000000e+00> : vector<2x32xf32>
    %192 = vector.multi_reduction <add>, %191, %cst_111 [1] : vector<2x8x32xf32> to vector<2x32xf32>
    %193 = arith.addf %188, %192 : vector<2x32xf32>
    %194 = tpu.reciprocal %186 {approx = true} : vector<2x1xf32> -> vector<2x1xf32>
    %195 = vector.broadcast %194 : vector<2x1xf32> to vector<2x32xf32>
    %196 = arith.mulf %193, %195 : vector<2x32xf32>
    %c2_i32 = arith.constant 2 : i32
    %197 = arith.truncf %166 : vector<2x32xf32> to vector<2x32xbf16>
    %198 = arith.truncf %196 : vector<2x32xf32> to vector<2x32xbf16>
    %c0_112 = arith.constant 0 : index
    %c0_113 = arith.constant 0 : index
    %c0_114 = arith.constant 0 : index
    %199 = vector.load %arg2[%c0_112, %c0_113, %c0_114] : memref<4x32x32xbf16, #tpu.memory_space<vmem>>, vector<1x32x32xbf16>
    %200 = vector.shape_cast %199 : vector<1x32x32xbf16> to vector<32x32xbf16>
    %cst_115 = arith.constant dense<0.000000e+00> : vector<2x32xf32>
    %201 = tpu.matmul %197, %200, %cst_115 {dimension_numbers = #tpu.dot_dimension_numbers<[1], [0], [0], [1], [0, 0, 1, 1], [], []>} : vector<2x32xbf16>, vector<32x32xbf16>, vector<2x32xf32> -> vector<2x32xf32>
    %c0_116 = arith.constant 0 : index
    %c0_117 = arith.constant 0 : index
    %c0_118 = arith.constant 0 : index
    %202 = vector.load %arg3[%c0_116, %c0_117, %c0_118] : memref<4x32x32xbf16, #tpu.memory_space<vmem>>, vector<1x32x32xbf16>
    %203 = vector.shape_cast %202 : vector<1x32x32xbf16> to vector<32x32xbf16>
    %cst_119 = arith.constant dense<0.000000e+00> : vector<2x32xf32>
    %204 = tpu.matmul %198, %203, %cst_119 {dimension_numbers = #tpu.dot_dimension_numbers<[1], [0], [0], [1], [0, 0, 1, 1], [], []>} : vector<2x32xbf16>, vector<32x32xbf16>, vector<2x32xf32> -> vector<2x32xf32>
    %205 = arith.addf %201, %204 : vector<2x32xf32>
    %c0_120 = arith.constant 0 : index
    %c0_121 = arith.constant 0 : index
    %c0_122 = arith.constant 0 : index
    %206 = vector.load %arg4[%c0_120, %c0_121, %c0_122] : memref<4x1x32xf32, #tpu.memory_space<vmem>>, vector<1x1x32xf32>
    %207 = vector.shape_cast %206 : vector<1x1x32xf32> to vector<1x32xf32>
    %208 = vector.broadcast %207 : vector<1x32xf32> to vector<2x32xf32>
    %209 = arith.addf %205, %208 : vector<2x32xf32>
    %c1_123 = arith.constant 1 : index
    %c0_124 = arith.constant 0 : index
    %c0_125 = arith.constant 0 : index
    %210 = vector.load %arg2[%c1_123, %c0_124, %c0_125] : memref<4x32x32xbf16, #tpu.memory_space<vmem>>, vector<1x32x32xbf16>
    %211 = vector.shape_cast %210 : vector<1x32x32xbf16> to vector<32x32xbf16>
    %cst_126 = arith.constant dense<0.000000e+00> : vector<2x32xf32>
    %212 = tpu.matmul %197, %211, %cst_126 {dimension_numbers = #tpu.dot_dimension_numbers<[1], [0], [0], [1], [0, 0, 1, 1], [], []>} : vector<2x32xbf16>, vector<32x32xbf16>, vector<2x32xf32> -> vector<2x32xf32>
    %c1_127 = arith.constant 1 : index
    %c0_128 = arith.constant 0 : index
    %c0_129 = arith.constant 0 : index
    %213 = vector.load %arg3[%c1_127, %c0_128, %c0_129] : memref<4x32x32xbf16, #tpu.memory_space<vmem>>, vector<1x32x32xbf16>
    %214 = vector.shape_cast %213 : vector<1x32x32xbf16> to vector<32x32xbf16>
    %cst_130 = arith.constant dense<0.000000e+00> : vector<2x32xf32>
    %215 = tpu.matmul %198, %214, %cst_130 {dimension_numbers = #tpu.dot_dimension_numbers<[1], [0], [0], [1], [0, 0, 1, 1], [], []>} : vector<2x32xbf16>, vector<32x32xbf16>, vector<2x32xf32> -> vector<2x32xf32>
    %216 = arith.addf %212, %215 : vector<2x32xf32>
    %c1_131 = arith.constant 1 : index
    %c0_132 = arith.constant 0 : index
    %c0_133 = arith.constant 0 : index
    %217 = vector.load %arg4[%c1_131, %c0_132, %c0_133] : memref<4x1x32xf32, #tpu.memory_space<vmem>>, vector<1x1x32xf32>
    %218 = vector.shape_cast %217 : vector<1x1x32xf32> to vector<1x32xf32>
    %219 = vector.broadcast %218 : vector<1x32xf32> to vector<2x32xf32>
    %220 = arith.addf %216, %219 : vector<2x32xf32>
    %c2_134 = arith.constant 2 : index
    %c0_135 = arith.constant 0 : index
    %c0_136 = arith.constant 0 : index
    %221 = vector.load %arg2[%c2_134, %c0_135, %c0_136] : memref<4x32x32xbf16, #tpu.memory_space<vmem>>, vector<1x32x32xbf16>
    %222 = vector.shape_cast %221 : vector<1x32x32xbf16> to vector<32x32xbf16>
    %cst_137 = arith.constant dense<0.000000e+00> : vector<2x32xf32>
    %223 = tpu.matmul %197, %222, %cst_137 {dimension_numbers = #tpu.dot_dimension_numbers<[1], [0], [0], [1], [0, 0, 1, 1], [], []>} : vector<2x32xbf16>, vector<32x32xbf16>, vector<2x32xf32> -> vector<2x32xf32>
    %c2_138 = arith.constant 2 : index
    %c0_139 = arith.constant 0 : index
    %c0_140 = arith.constant 0 : index
    %224 = vector.load %arg3[%c2_138, %c0_139, %c0_140] : memref<4x32x32xbf16, #tpu.memory_space<vmem>>, vector<1x32x32xbf16>
    %225 = vector.shape_cast %224 : vector<1x32x32xbf16> to vector<32x32xbf16>
    %cst_141 = arith.constant dense<0.000000e+00> : vector<2x32xf32>
    %226 = tpu.matmul %198, %225, %cst_141 {dimension_numbers = #tpu.dot_dimension_numbers<[1], [0], [0], [1], [0, 0, 1, 1], [], []>} : vector<2x32xbf16>, vector<32x32xbf16>, vector<2x32xf32> -> vector<2x32xf32>
    %227 = arith.addf %223, %226 : vector<2x32xf32>
    %c2_142 = arith.constant 2 : index
    %c0_143 = arith.constant 0 : index
    %c0_144 = arith.constant 0 : index
    %228 = vector.load %arg4[%c2_142, %c0_143, %c0_144] : memref<4x1x32xf32, #tpu.memory_space<vmem>>, vector<1x1x32xf32>
    %229 = vector.shape_cast %228 : vector<1x1x32xf32> to vector<1x32xf32>
    %230 = vector.broadcast %229 : vector<1x32xf32> to vector<2x32xf32>
    %231 = arith.addf %227, %230 : vector<2x32xf32>
    %c3_145 = arith.constant 3 : index
    %c0_146 = arith.constant 0 : index
    %c0_147 = arith.constant 0 : index
    %232 = vector.load %arg2[%c3_145, %c0_146, %c0_147] : memref<4x32x32xbf16, #tpu.memory_space<vmem>>, vector<1x32x32xbf16>
    %233 = vector.shape_cast %232 : vector<1x32x32xbf16> to vector<32x32xbf16>
    %cst_148 = arith.constant dense<0.000000e+00> : vector<2x32xf32>
    %234 = tpu.matmul %197, %233, %cst_148 {dimension_numbers = #tpu.dot_dimension_numbers<[1], [0], [0], [1], [0, 0, 1, 1], [], []>} : vector<2x32xbf16>, vector<32x32xbf16>, vector<2x32xf32> -> vector<2x32xf32>
    %c3_149 = arith.constant 3 : index
    %c0_150 = arith.constant 0 : index
    %c0_151 = arith.constant 0 : index
    %235 = vector.load %arg3[%c3_149, %c0_150, %c0_151] : memref<4x32x32xbf16, #tpu.memory_space<vmem>>, vector<1x32x32xbf16>
    %236 = vector.shape_cast %235 : vector<1x32x32xbf16> to vector<32x32xbf16>
    %cst_152 = arith.constant dense<0.000000e+00> : vector<2x32xf32>
    %237 = tpu.matmul %198, %236, %cst_152 {dimension_numbers = #tpu.dot_dimension_numbers<[1], [0], [0], [1], [0, 0, 1, 1], [], []>} : vector<2x32xbf16>, vector<32x32xbf16>, vector<2x32xf32> -> vector<2x32xf32>
    %238 = arith.addf %234, %237 : vector<2x32xf32>
    %c3_153 = arith.constant 3 : index
    %c0_154 = arith.constant 0 : index
    %c0_155 = arith.constant 0 : index
    %239 = vector.load %arg4[%c3_153, %c0_154, %c0_155] : memref<4x1x32xf32, #tpu.memory_space<vmem>>, vector<1x1x32xf32>
    %240 = vector.shape_cast %239 : vector<1x1x32xf32> to vector<1x32xf32>
    %241 = vector.broadcast %240 : vector<1x32xf32> to vector<2x32xf32>
    %242 = arith.addf %238, %241 : vector<2x32xf32>
    %243 = arith.negf %220 : vector<2x32xf32>
    %244 = math.exp %243 : vector<2x32xf32>
    %cst_156 = arith.constant 1.000000e+00 : f32
    %245 = vector.broadcast %cst_156 : f32 to vector<2x32xf32>
    %246 = arith.addf %245, %244 : vector<2x32xf32>
    %247 = arith.divf %245, %246 : vector<2x32xf32>
    %248 = arith.mulf %247, %159 : vector<2x32xf32>
    %249 = arith.negf %209 : vector<2x32xf32>
    %250 = math.exp %249 : vector<2x32xf32>
    %cst_157 = arith.constant 1.000000e+00 : f32
    %251 = vector.broadcast %cst_157 : f32 to vector<2x32xf32>
    %252 = arith.addf %251, %250 : vector<2x32xf32>
    %253 = arith.divf %251, %252 : vector<2x32xf32>
    %254 = math.tanh %231 : vector<2x32xf32>
    %255 = arith.mulf %253, %254 : vector<2x32xf32>
    %256 = arith.addf %248, %255 : vector<2x32xf32>
    %257 = arith.negf %242 : vector<2x32xf32>
    %258 = math.exp %257 : vector<2x32xf32>
    %cst_158 = arith.constant 1.000000e+00 : f32
    %259 = vector.broadcast %cst_158 : f32 to vector<2x32xf32>
    %260 = arith.addf %259, %258 : vector<2x32xf32>
    %261 = arith.divf %259, %260 : vector<2x32xf32>
    %262 = math.tanh %256 : vector<2x32xf32>
    %263 = arith.mulf %261, %262 : vector<2x32xf32>
    %cst_159 = arith.constant 0xFF800000 : f32
    %264 = vector.broadcast %cst_159 : f32 to vector<2x1xf32>
    %cst_160 = arith.constant 0.000000e+00 : f32
    %265 = vector.broadcast %cst_160 : f32 to vector<2x1xf32>
    %cst_161 = arith.constant 0.000000e+00 : f32
    %266 = vector.broadcast %cst_161 : f32 to vector<2x32xf32>
    %c0_162 = arith.constant 0 : index
    %c0_163 = arith.constant 0 : index
    %c0_164 = arith.constant 0 : index
    %267 = vector.load %arg1[%c0_162, %c0_163, %c0_164] : memref<2x8x32xf32, #tpu.memory_space<vmem>>, vector<2x8x32xf32>
    %268 = vector.shape_cast %263 : vector<2x32xf32> to vector<2x1x32xf32>
    %269 = vector.broadcast %268 : vector<2x1x32xf32> to vector<2x8x32xf32>
    %270 = arith.mulf %267, %269 : vector<2x8x32xf32>
    %cst_165 = arith.constant dense<0.000000e+00> : vector<2x8xf32>
    %271 = vector.multi_reduction <add>, %270, %cst_165 [2] : vector<2x8x32xf32> to vector<2x8xf32>
    %cst_166 = arith.constant dense<0xFF800000> : vector<2xf32>
    %272 = vector.multi_reduction <maximumf>, %271, %cst_166 [1] : vector<2x8xf32> to vector<2xf32>
    %273 = vector.shape_cast %272 : vector<2xf32> to vector<2x1xf32>
    %274 = arith.maximumf %264, %273 : vector<2x1xf32>
    %275 = vector.broadcast %274 : vector<2x1xf32> to vector<2x8xf32>
    %276 = arith.subf %271, %275 : vector<2x8xf32>
    %277 = math.exp %276 : vector<2x8xf32>
    %278 = arith.subf %264, %274 : vector<2x1xf32>
    %279 = math.exp %278 : vector<2x1xf32>
    %280 = arith.mulf %279, %265 : vector<2x1xf32>
    %cst_167 = arith.constant dense<0.000000e+00> : vector<2xf32>
    %281 = vector.multi_reduction <add>, %277, %cst_167 [1] : vector<2x8xf32> to vector<2xf32>
    %282 = vector.shape_cast %281 : vector<2xf32> to vector<2x1xf32>
    %283 = arith.addf %280, %282 : vector<2x1xf32>
    %284 = vector.broadcast %279 : vector<2x1xf32> to vector<2x32xf32>
    %285 = arith.mulf %284, %266 : vector<2x32xf32>
    %286 = vector.shape_cast %277 : vector<2x8xf32> to vector<2x8x1xf32>
    %287 = vector.broadcast %286 : vector<2x8x1xf32> to vector<2x8x32xf32>
    %288 = arith.mulf %287, %267 : vector<2x8x32xf32>
    %cst_168 = arith.constant dense<0.000000e+00> : vector<2x32xf32>
    %289 = vector.multi_reduction <add>, %288, %cst_168 [1] : vector<2x8x32xf32> to vector<2x32xf32>
    %290 = arith.addf %285, %289 : vector<2x32xf32>
    %291 = tpu.reciprocal %283 {approx = true} : vector<2x1xf32> -> vector<2x1xf32>
    %292 = vector.broadcast %291 : vector<2x1xf32> to vector<2x32xf32>
    %293 = arith.mulf %290, %292 : vector<2x32xf32>
    %294 = arith.truncf %263 : vector<2x32xf32> to vector<2x32xbf16>
    %c0_169 = arith.constant 0 : index
    %c0_170 = arith.constant 0 : index
    %295 = vector.load %arg5[%c0_169, %c0_170] : memref<32x64xbf16, #tpu.memory_space<vmem>>, vector<32x64xbf16>
    %cst_171 = arith.constant dense<0.000000e+00> : vector<2x64xf32>
    %296 = tpu.matmul %294, %295, %cst_171 {dimension_numbers = #tpu.dot_dimension_numbers<[1], [0], [0], [1], [0, 0, 1, 1], [], []>} : vector<2x32xbf16>, vector<32x64xbf16>, vector<2x64xf32> -> vector<2x64xf32>
    %297 = arith.truncf %293 : vector<2x32xf32> to vector<2x32xbf16>
    %c0_172 = arith.constant 0 : index
    %c0_173 = arith.constant 0 : index
    %298 = vector.load %arg6[%c0_172, %c0_173] : memref<32x64xbf16, #tpu.memory_space<vmem>>, vector<32x64xbf16>
    %cst_174 = arith.constant dense<0.000000e+00> : vector<2x64xf32>
    %299 = tpu.matmul %297, %298, %cst_174 {dimension_numbers = #tpu.dot_dimension_numbers<[1], [0], [0], [1], [0, 0, 1, 1], [], []>} : vector<2x32xbf16>, vector<32x64xbf16>, vector<2x64xf32> -> vector<2x64xf32>
    %300 = arith.addf %296, %299 : vector<2x64xf32>
    %c0_175 = arith.constant 0 : index
    %c0_176 = arith.constant 0 : index
    %301 = vector.load %arg7[%c0_175, %c0_176] : memref<1x64xf32, #tpu.memory_space<vmem>>, vector<1x64xf32>
    %302 = vector.broadcast %301 : vector<1x64xf32> to vector<2x64xf32>
    %303 = arith.addf %300, %302 : vector<2x64xf32>
    %cst_177 = arith.constant 0.000000e+00 : f32
    %304 = vector.broadcast %cst_177 : f32 to vector<2x64xf32>
    %305 = arith.cmpf ogt, %303, %304 : vector<2x64xf32>
    %cst_178 = arith.constant 0.00999999977 : f32
    %306 = vector.broadcast %cst_178 : f32 to vector<2x64xf32>
    %307 = arith.mulf %306, %303 : vector<2x64xf32>
    %308 = arith.select %305, %303, %307 : vector<2x64xi1>, vector<2x64xf32>
    %309 = arith.truncf %308 : vector<2x64xf32> to vector<2x64xbf16>
    %c0_179 = arith.constant 0 : index
    %c0_180 = arith.constant 0 : index
    %310 = vector.load %arg8[%c0_179, %c0_180] : memref<64x128xbf16, #tpu.memory_space<vmem>>, vector<64x128xbf16>
    %cst_181 = arith.constant dense<0.000000e+00> : vector<2x128xf32>
    %311 = tpu.matmul %309, %310, %cst_181 {dimension_numbers = #tpu.dot_dimension_numbers<[1], [0], [0], [1], [0, 0, 1, 1], [], []>} : vector<2x64xbf16>, vector<64x128xbf16>, vector<2x128xf32> -> vector<2x128xf32>
    %c0_182 = arith.constant 0 : index
    %c0_183 = arith.constant 0 : index
    %312 = vector.load %arg9[%c0_182, %c0_183] : memref<1x128xf32, #tpu.memory_space<vmem>>, vector<1x128xf32>
    %313 = vector.broadcast %312 : vector<1x128xf32> to vector<2x128xf32>
    %314 = arith.addf %311, %313 : vector<2x128xf32>
    %c0_184 = arith.constant 0 : index
    %c0_185 = arith.constant 0 : index
    %315 = vector.load %arg10[%c0_184, %c0_185] : memref<2x128xf32, #tpu.memory_space<vmem>>, vector<2x128xf32>
    tpu.vector_store %arg10[%c0_184, %c0_185], %314 {strides = array<i32>} : memref<2x128xf32, #tpu.memory_space<vmem>>, vector<2x128xf32>,
    return
  }
  func.func @transform_0(%arg0: i32) -> (i32, i32, i32) {
    %c0_i32 = arith.constant 0 : i32
    %c0_i32_0 = arith.constant 0 : i32
    %c0_i32_1 = arith.constant 0 : i32
    return %arg0, %c0_i32, %c0_i32_0 : i32, i32, i32
  }
  func.func @transform_1(%arg0: i32) -> (i32, i32, i32) {
    %c0_i32 = arith.constant 0 : i32
    %c0_i32_0 = arith.constant 0 : i32
    %c0_i32_1 = arith.constant 0 : i32
    %c0_i32_2 = arith.constant 0 : i32
    return %c0_i32, %c0_i32_0, %c0_i32_1 : i32, i32, i32
  }
  func.func @transform_2(%arg0: i32) -> (i32, i32, i32) {
    %c0_i32 = arith.constant 0 : i32
    %c0_i32_0 = arith.constant 0 : i32
    %c0_i32_1 = arith.constant 0 : i32
    %c0_i32_2 = arith.constant 0 : i32
    return %c0_i32, %c0_i32_0, %c0_i32_1 : i32, i32, i32
  }
  func.func @transform_3(%arg0: i32) -> (i32, i32, i32) {
    %c0_i32 = arith.constant 0 : i32
    %c0_i32_0 = arith.constant 0 : i32
    %c0_i32_1 = arith.constant 0 : i32
    %c0_i32_2 = arith.constant 0 : i32
    return %c0_i32, %c0_i32_0, %c0_i32_1 : i32, i32, i32
  }
  func.func @transform_4(%arg0: i32) -> (i32, i32) {
    %c0_i32 = arith.constant 0 : i32
    %c0_i32_0 = arith.constant 0 : i32
    %c0_i32_1 = arith.constant 0 : i32
    return %c0_i32, %c0_i32_0 : i32, i32
  }
  func.func @transform_5(%arg0: i32) -> (i32, i32) {
    %c0_i32 = arith.constant 0 : i32
    %c0_i32_0 = arith.constant 0 : i32
    %c0_i32_1 = arith.constant 0 : i32
    return %c0_i32, %c0_i32_0 : i32, i32
  }
  func.func @transform_6(%arg0: i32) -> (i32, i32) {
    %c0_i32 = arith.constant 0 : i32
    %c0_i32_0 = arith.constant 0 : i32
    %c0_i32_1 = arith.constant 0 : i32
    return %c0_i32, %c0_i32_0 : i32, i32
  }
  func.func @transform_7(%arg0: i32) -> (i32, i32) {
    %c0_i32 = arith.constant 0 : i32
    %c0_i32_0 = arith.constant 0 : i32
    %c0_i32_1 = arith.constant 0 : i32
    return %c0_i32, %c0_i32_0 : i32, i32
  }
  func.func @transform_8(%arg0: i32) -> (i32, i32) {
    %c0_i32 = arith.constant 0 : i32
    %c0_i32_0 = arith.constant 0 : i32
    %c0_i32_1 = arith.constant 0 : i32
    return %c0_i32, %c0_i32_0 : i32, i32
  }
  func.func @transform_9(%arg0: i32) -> (i32, i32) {
    %c0_i32 = arith.constant 0 : i32
    %c0_i32_0 = arith.constant 0 : i32
    return %arg0, %c0_i32 : i32, i32
  }
}

</mosaic_0001>

<bundles_post_ra>
// kernel: tpu_custom_call.1
= control target key start
LH: loop header
LB: loop body
LE: loop exit
PB: predicated region body
PF: predicated region fallthrough
CT: control target
= control target key end

     0   :  { %14 = vsyncpa [#allocation3], 0  ;;  %s3135_s0 = inlined_call_operand.hbm [shape: f32[2,8,32], index: 0, kind: input, shape index: {}]   ;;  %s3136_s1 = inlined_call_operand.hbm [shape: bf16[4,32,32], index: 1, kind: input, shape index: {}]   ;;  %s3137_s2 = inlined_call_operand.hbm [shape: bf16[4,32,32], index: 2, kind: input, shape index: {}]   ;;  %s3138_s3 = inlined_call_operand.hbm [shape: f32[4,1,32], index: 3, kind: input, shape index: {}]   ;;  %s3139_s4 = inlined_call_operand.hbm [shape: bf16[32,64], index: 4, kind: input, shape index: {}]   ;;  %s3140_s5 = inlined_call_operand.vmem [shape: bf16[32,64], index: 5, kind: input, shape index: {}]   ;;  %s3141_s6 = inlined_call_operand.vmem [shape: f32[1,64], index: 6, kind: input, shape index: {}]   ;;  %s3142_s7 = inlined_call_operand.hbm [shape: bf16[64,128], index: 7, kind: input, shape index: {}]   ;;  %s3143_s8 = inlined_call_operand.vmem [shape: f32[1,128], index: 8, kind: input, shape index: {}]   ;;  %s3144_s9 = inlined_call_operand.hbm [shape: f32[2,128], index: 9, kind: output, shape index: {}]  }
   0x1   :  { %15 = vsyncpa [#allocation6], 0 }
   0x2   :  { %16 = vsyncpa [#allocation9], 0 }
   0x3   :  { %17 = vsyncpa [#allocation12], 0 }
   0x4   :  { %18 = vsyncpa [#allocation4], 0  ;;  %s2597_s30 = smov [#allocation5]   ;;  %s2433_s13 = scalar_lea.hbm %s3136_s1, 1024 }
   0x5   :  { %s36_s10 = sshll.u32 %s2597_s30, 4  ;;  %p2434_p0 = scmp.ne.s32.totalorder %s3136_s1, %s2433_s13  ;;  %s37_s10 = int_to_ptr.vmem [resolvable:$true] %s36_s10 }
   0x6   :  { %p2437_p1 = scmp.lt.u32.totalorder %s2433_s13, %s3136_s1 }
   0x8   :  { %p2439_p2 = pnand %p2437_p1, %p2434_p0 }
   0xa   :  { %2442 = shalt.err (!%p2439_p2)
}
   0xb   :  { %s2443_s18 = scalar_lea.vmem %s37_s10, 1024  ;;  %p2448_p4 = scmp.lt.s32.totalorder %s37_s10, %s37_s10 }
   0xc   :  { %p2444_p3 = scmp.ne.s32.totalorder %s37_s10, %s2443_s18  ;;  %p2449_p5 = scmp.lt.s32.totalorder %s2443_s18, %s2443_s18 }
   0xe   :  { %p2450_p6 = por %p2449_p5, %p2448_p4 }
  0x10   :  { %p2451_p7 = pnand %p2450_p6, %p2444_p3 }
  0x12   :  { %2454 = shalt.err (!%p2451_p7)
}
  0x13   :  { %s2598_s19 = smov 64   ;;  %s2599_s20 = smov 4  }
  0x14   :  { %42 = dma.hbm_to_vmem [thread:$0]  %s3136_s1, 1024, %s37_s10, [#allocation6], %s2598_s19, %s2598_s19, %s2599_s20  }
  0x15   :  { %s2600_s23 = smov [#allocation8]   ;;  %s2455_s27 = scalar_lea.hbm %s3138_s3, 64 }
  0x16   :  { %s60_s24 = sshll.u32 %s2600_s23, 4  ;;  %p2456_p8 = scmp.ne.s32.totalorder %s3138_s3, %s2455_s27  ;;  %s61_s24 = int_to_ptr.vmem [resolvable:$true] %s60_s24 }
  0x17   :  { %p2459_p9 = scmp.lt.u32.totalorder %s2455_s27, %s3138_s3 }
  0x19   :  { %p2461_p10 = pnand %p2459_p9, %p2456_p8 }
  0x1b   :  { %2464 = shalt.err (!%p2461_p10)
}
  0x1c   :  { %s2465_s12 = scalar_lea.vmem %s61_s24, 64  ;;  %p2470_p12 = scmp.lt.s32.totalorder %s61_s24, %s61_s24 }
  0x1d   :  { %p2466_p11 = scmp.ne.s32.totalorder %s61_s24, %s2465_s12  ;;  %p2471_p13 = scmp.lt.s32.totalorder %s2465_s12, %s2465_s12 }
  0x1f   :  { %p2472_p0 = por %p2471_p13, %p2470_p12 }
  0x21   :  { %p2473_p1 = pnand %p2472_p0, %p2466_p11 }
  0x23   :  { %2476 = shalt.err (!%p2473_p1)
}
  0x24   :  { %s2601_s1 = smov 16   ;;  %s2602_s10 = smov 1  }
  0x25   :  { %66 = dma.hbm_to_vmem [thread:$0]  %s3138_s3, 64, %s61_s24, [#allocation9], %s2601_s1, %s2601_s1, %s2602_s10  }
  0x26   :  { %s2603_s15 = smov [#allocation2]   ;;  %s2477_s21 = scalar_lea.hbm %s3135_s0, 256 }
  0x27   :  { %s24_s16 = sshll.u32 %s2603_s15, 4  ;;  %p2478_p2 = scmp.ne.s32.totalorder %s3135_s0, %s2477_s21  ;;  %s25_s16 = int_to_ptr.vmem [resolvable:$true] %s24_s16 }
  0x28   :  { %p2481_p3 = scmp.lt.u32.totalorder %s2477_s21, %s3135_s0 }
  0x2a   :  { %p2483_p4 = pnand %p2481_p3, %p2478_p2 }
  0x2c   :  { %2486 = shalt.err (!%p2483_p4)
}
  0x2d   :  { %s2487_s27 = scalar_lea.vmem %s25_s16, 256  ;;  %p2492_p6 = scmp.lt.s32.totalorder %s25_s16, %s25_s16 }
  0x2e   :  { %p2488_p5 = scmp.ne.s32.totalorder %s25_s16, %s2487_s27  ;;  %p2493_p7 = scmp.lt.s32.totalorder %s2487_s27, %s2487_s27 }
  0x30   :  { %p2494_p8 = por %p2493_p7, %p2492_p6 }
  0x32   :  { %p2495_p9 = pnand %p2494_p8, %p2488_p5 }
  0x34   :  { %2498 = shalt.err (!%p2495_p9)
}
  0x35   :  { %s2604_s3 = smov 128   ;;  %s2605_s24 = smov 8  }
  0x36   :  { %30 = dma.hbm_to_vmem [thread:$0]  %s3135_s0, 256, %s25_s16, [#allocation3], %s2604_s3, %s2604_s3, %s2605_s24  }
  0x37   :  { %s2606_s30 = smov [#allocation7]   ;;  %s2607_s12 = smov [#allocation10]  }
  0x38   :  { %s48_s11 = sshll.u32 %s2606_s30, 4  ;;  %s72_s1 = sshll.u32 %s2607_s12, 4  ;;  %s49_s11 = int_to_ptr.vmem [resolvable:$true] %s48_s11  ;;  %s73_s1 = int_to_ptr.vmem [resolvable:$true] %s72_s1 }
  0x39   :  { %s2499_s14 = scalar_lea.hbm %s3137_s2, 1024 }
  0x3a   :  { %p2500_p10 = scmp.ne.s32.totalorder %s3137_s2, %s2499_s14  ;;  %p2503_p11 = scmp.lt.u32.totalorder %s2499_s14, %s3137_s2 }
  0x3c   :  { %p2505_p12 = pnand %p2503_p11, %p2500_p10 }
  0x3e   :  { %2508 = shalt.err (!%p2505_p12)
}
  0x3f   :  { %s2509_s0 = scalar_lea.vmem %s49_s11, 1024  ;;  %p2514_p0 = scmp.lt.s32.totalorder %s49_s11, %s49_s11 }
  0x40   :  { %p2510_p13 = scmp.ne.s32.totalorder %s49_s11, %s2509_s0  ;;  %p2515_p1 = scmp.lt.s32.totalorder %s2509_s0, %s2509_s0 }
  0x42   :  { %p2516_p2 = por %p2515_p1, %p2514_p0 }
  0x44   :  { %p2517_p3 = pnand %p2516_p2, %p2510_p13 }
  0x46   :  { %2520 = shalt.err (!%p2517_p3)
}
  0x47   :  { %54 = dma.hbm_to_vmem [thread:$0]  %s3137_s2, 1024, %s49_s11, [#allocation6], %s2598_s19, %s2598_s19, %s2599_s20  }
  0x48   :  { %s2521_s26 = scalar_lea.hbm %s3139_s4, 256 }
  0x49   :  { %p2522_p4 = scmp.ne.s32.totalorder %s3139_s4, %s2521_s26  ;;  %p2525_p5 = scmp.lt.u32.totalorder %s2521_s26, %s3139_s4 }
  0x4b   :  { %p2527_p6 = pnand %p2525_p5, %p2522_p4 }
  0x4d   :  { %2530 = shalt.err (!%p2527_p6)
}
  0x4e   :  { %s2531_s29 = scalar_lea.vmem %s73_s1, 256  ;;  %p2536_p8 = scmp.lt.s32.totalorder %s73_s1, %s73_s1 }
  0x4f   :  { %p2532_p7 = scmp.ne.s32.totalorder %s73_s1, %s2531_s29  ;;  %p2537_p9 = scmp.lt.s32.totalorder %s2531_s29, %s2531_s29 }
  0x51   :  { %p2538_p10 = por %p2537_p9, %p2536_p8 }
  0x53   :  { %p2539_p11 = pnand %p2538_p10, %p2532_p7 }
  0x55   :  { %2542 = shalt.err (!%p2539_p11)
}
  0x56   :  { %78 = dma.hbm_to_vmem [thread:$0]  %s3139_s4, 256, %s73_s1, [#allocation9], %s2598_s19, %s2598_s19, %s2599_s20  }
  0x57   :  { %s2608_s11 = smov [#allocation11]   ;;  %s2543_s14 = scalar_lea.hbm %s3142_s7, 512 }
  0x58   :  { %s88_s12 = sshll.u32 %s2608_s11, 4  ;;  %p2544_p12 = scmp.ne.s32.totalorder %s3142_s7, %s2543_s14  ;;  %s89_s12 = int_to_ptr.vmem [resolvable:$true] %s88_s12 }
  0x59   :  { %p2547_p13 = scmp.lt.u32.totalorder %s2543_s14, %s3142_s7 }
  0x5b   :  { %p2549_p0 = pnand %p2547_p13, %p2544_p12 }
  0x5d   :  { %2552 = shalt.err (!%p2549_p0)
}
  0x5e   :  { %s2553_s0 = scalar_lea.vmem %s89_s12, 512  ;;  %p2558_p2 = scmp.lt.s32.totalorder %s89_s12, %s89_s12 }
  0x5f   :  { %p2554_p1 = scmp.ne.s32.totalorder %s89_s12, %s2553_s0  ;;  %p2559_p3 = scmp.lt.s32.totalorder %s2553_s0, %s2553_s0 }
  0x61   :  { %p2560_p4 = por %p2559_p3, %p2558_p2 }
  0x63   :  { %p2561_p5 = pnand %p2560_p4, %p2554_p1 }
  0x65   :  { %2564 = shalt.err (!%p2561_p5)
}
  0x66   :  { %94 = dma.hbm_to_vmem [thread:$0]  %s3142_s7, 512, %s89_s12, [#allocation12], %s2598_s19, %s2598_s19, %s2599_s20  }
  0x67   :  { %2587 = dma.done.wait [#allocation3], 256  }
  0x68   :  { %2588 = vsyncadd [#allocation3], 4294967040 }
  0x69   :  { %2589 = dma.done.wait [#allocation6], 2048  }
  0x6a   :  { %2590 = vsyncadd [#allocation6], 4294965248 }
  0x6b   :  { %2591 = dma.done.wait [#allocation9], 320  }
  0x6c   :  { %2592 = vsyncadd [#allocation9], 4294966976 }
  0x6d   :  { %2593 = dma.done.wait [#allocation12], 512  }
  0x6e   :  { %2594 = vsyncadd [#allocation12], 4294966784  ;;  %v2609_v0 = vmov 0.0   ;;  %vm2610_vm0 = vmmov 0   ;;  %v2611_v1 = vmov 0   ;;  %v2756_v2 = vld [vmem:[#allocation7] sm:$0xff]  }
  0x6f   :  { %2098 = vmatprep.subr.bf16.mxu1 %v2609_v0  ;;  %2102 = vmatprep.mubr.msk.bf16.mxu1 %vm2610_vm0, %v2609_v0  ;;  %v2759_v3 = vld [vmem:[#allocation7 + $0x8] sm:$0xff]   ;;  %v2762_v4 = vld [vmem:[#allocation7 + $0x10] sm:$0xff]   ;;  %v2765_v5 = vld [vmem:[#allocation5] sm:$0xff]   ;;  %vm136_vm1 = vcmask 261120   ;;  %vm688_vm2 = vcmask 1041409   ;;  %vm691_vm3 = vcmask 58368  }
  0x70   :  { %2114 = vmatprep.subr.bf16.mxu0 %v2609_v0  ;;  %2118 = vmatprep.mubr.msk.bf16.mxu0 %vm2610_vm0, %v2609_v0  ;;  %v2770_v6 = vld [vmem:[#allocation7 + $0x18] sm:$0xff]   ;;  %v2774_v7 = vld [vmem:[#allocation5 + $0x8] sm:$0xff]   ;;  %v2780_v8 = vld [vmem:[#allocation7 + $0x20] sm:$0xff]   ;;  %vm1894_vm5 = vcmask 523264   ;;  %s2613_s26 = smov [#allocation13]  }
  0x71   :  { %2336 = vset.pattern.permute.xlu0 %v2611_v1  ;;  %2335 = vset.pattern.permute.xlu1 %v2611_v1  ;;  %v2784_v9 = vld [vmem:[#allocation5 + $0x10] sm:$0xff]   ;;  %v2789_v10 = vld [vmem:[#allocation7 + $0x28] sm:$0xff]   ;;  %v2791_v11 = vld [vmem:[#allocation5 + $0x18] sm:$0xff]   ;;  %s1945_s27 = sshll.u32 %s2613_s26, 4  ;;  %s1946_s27 = int_to_ptr.vmem [resolvable:$true] %s1945_s27 }
  0x72   :  { %2099 = vmatpush3.bf16.msra.mxu1 %v2756_v2  ;;  %2115 = vmatpush3.bf16.msra.mxu0 %v2762_v4  ;;  %v2797_v12 = vld [vmem:[#allocation7 + $0x30] sm:$0xff]   ;;  %v2806_v13 = vld [vmem:[#allocation5 + $0x20] sm:$0xff]   ;;  %v2811_v14 = vld [vmem:[#allocation7 + $0x38] sm:$0xff]   ;;  %p2570_p7 = scmp.lt.s32.totalorder %s1946_s27, %s1946_s27 }
  0x73   :  { %2100 = vmatprep.subr.bf16.mxu1 %v2609_v0  ;;  %2116 = vmatprep.subr.bf16.mxu0 %v2609_v0  ;;  %v2818_v15 = vld [vmem:[#allocation5 + $0x28] sm:$0xff]   ;;  %v2826_v16 = vld [vmem:[#allocation5 + $0x30] sm:$0xff]   ;;  %v2836_v17 = vld [vmem:[#allocation5 + $0x38] sm:$0xff]  }
  0x74   :  { %v2852_v26 = vld [vmem:[#allocation8] ss:$0 sm:$0xff]  ;;  %v2855_v38 = vld [vmem:[#allocation8 + $0x1] ss:$0 sm:$0xff]  ;;  %v2858_v50 = vld [vmem:[#allocation8 + $0x2] ss:$0 sm:$0xff] }
  0x75   :  { %v2861_v60 = vld [vmem:[#allocation8 + $0x3] ss:$0 sm:$0xff] }
  0x76   :  { %2101 = vmatpush3.bf16.msra.mxu1 %v2759_v3  ;;  %2117 = vmatpush3.bf16.msra.mxu0 %v2770_v6 }
  0x77   :  { %2106 = vmatprep.subr.bf16.mxu1 %v2609_v0  ;;  %2130 = vmatprep.subr.bf16.mxu0 %v2609_v0 }
  0x79   :  { %2103 = vmatmul.mubr.bf16.vlgmr.msra.gmra.mrb[0].mxu1 %v2611_v1  ;;  %2119 = vmatmul.mubr.bf16.vlgmr.msra.gmra.mrb[0].mxu0 %v2611_v1 }
  0x7a   :  { %2107 = vmatpush3.bf16.msra.mxu1 %v2765_v5  ;;  %2110 = vmatprep.mubr.msk.bf16.mxu1 %vm2610_vm0, %v2609_v0 }
  0x7b   :  { %2108 = vmatprep.subr.bf16.mxu1 %v2609_v0  ;;  %2131 = vmatpush3.bf16.msra.mxu0 %v2780_v8 }
  0x7c   :  { %2132 = vmatprep.subr.bf16.mxu0 %v2609_v0  ;;  %2134 = vmatprep.mubr.msk.bf16.mxu0 %vm2610_vm0, %v2609_v0 }
  0x7e   :  { %2109 = vmatpush3.bf16.msra.mxu1 %v2774_v7 }
  0x7f   :  { %2122 = vmatprep.subr.bf16.mxu1 %v2609_v0  ;;  %2133 = vmatpush3.bf16.msra.mxu0 %v2789_v10 }
  0x80   :  { %2146 = vmatprep.subr.bf16.mxu0 %v2609_v0 }
  0x81   :  { %2111 = vmatmul.mubr.bf16.vlgmr.msra.gmra.mrb[4].mxu1 %v2611_v1 }
  0x82   :  { %2123 = vmatpush3.bf16.msra.mxu1 %v2784_v9  ;;  %2126 = vmatprep.mubr.msk.bf16.mxu1 %vm2610_vm0, %v2609_v0 }
  0x83   :  { %2124 = vmatprep.subr.bf16.mxu1 %v2609_v0  ;;  %2135 = vmatmul.mubr.bf16.vlgmr.msra.gmra.mrb[4].mxu0 %v2611_v1 }
  0x84   :  { %2147 = vmatpush3.bf16.msra.mxu0 %v2797_v12  ;;  %2150 = vmatprep.mubr.msk.bf16.mxu0 %vm2610_vm0, %v2609_v0 }
  0x85   :  { %2148 = vmatprep.subr.bf16.mxu0 %v2609_v0 }
  0x86   :  { %2125 = vmatpush3.bf16.msra.mxu1 %v2791_v11 }
  0x87   :  { %2138 = vmatprep.subr.bf16.mxu1 %v2609_v0 }
  0x88   :  { %2149 = vmatpush3.bf16.msra.mxu0 %v2811_v14 }
  0x89   :  { %2127 = vmatmul.mubr.bf16.vlgmr.msra.gmra.mrb[8].mxu1 %v2611_v1  ;;  %2162 = vmatprep.subr.bf16.mxu0 %v2609_v0 }
  0x8a   :  { %2139 = vmatpush3.bf16.msra.mxu1 %v2806_v13  ;;  %2142 = vmatprep.mubr.msk.bf16.mxu1 %vm2610_vm0, %v2609_v0 }
  0x8b   :  { %2140 = vmatprep.subr.bf16.mxu1 %v2609_v0  ;;  %2151 = vmatmul.mubr.bf16.vlgmr.msra.gmra.mrb[8].mxu0 %v2611_v1 }
  0x8c   :  { %2163 = vmatpush3.bf16.msra.mxu0 %v2756_v2  ;;  %2166 = vmatprep.mubr.msk.bf16.mxu0 %vm2610_vm0, %v2609_v0 }
  0x8d   :  { %2164 = vmatprep.subr.bf16.mxu0 %v2609_v0 }
  0x8e   :  { %2141 = vmatpush3.bf16.msra.mxu1 %v2818_v15 }
  0x8f   :  { %2154 = vmatprep.subr.bf16.mxu1 %v2609_v0 }
  0x90   :  { %2165 = vmatpush3.bf16.msra.mxu0 %v2759_v3 }
  0x91   :  { %2143 = vmatmul.mubr.bf16.vlgmr.msra.gmra.mrb[12].mxu1 %v2611_v1  ;;  %2178 = vmatprep.subr.bf16.mxu0 %v2609_v0 }
  0x92   :  { %2155 = vmatpush3.bf16.msra.mxu1 %v2826_v16  ;;  %2158 = vmatprep.mubr.msk.bf16.mxu1 %vm2610_vm0, %v2609_v0 }
  0x93   :  { %2156 = vmatprep.subr.bf16.mxu1 %v2609_v0 }
  0x96   :  { %2157 = vmatpush3.bf16.msra.mxu1 %v2836_v17 }
  0x97   :  { %2170 = vmatprep.subr.bf16.mxu1 %v2609_v0 }
  0x99   :  { %2159 = vmatmul.mubr.bf16.vlgmr.msra.gmra.mrb[16].mxu1 %v2611_v1 }
  0x9a   :  { %2171 = vmatpush3.bf16.msra.mxu1 %v2765_v5  ;;  %2174 = vmatprep.mubr.msk.bf16.mxu1 %vm2610_vm0, %v2609_v0 }
  0x9b   :  { %2172 = vmatprep.subr.bf16.mxu1 %v2609_v0 }
  0x9e   :  { %2173 = vmatpush3.bf16.msra.mxu1 %v2774_v7 }
  0x9f   :  { %2186 = vmatprep.subr.bf16.mxu1 %v2609_v0 }
 0x14c   :  { %v174_v18 = vpop.f32.mrb[0].mxu1  ;;  %v296_v22 = vpop.f32.mrb[0].mxu0 }
 0x14d   :  { %v2104_v19 = vpop.f32.mrb[1].mxu1  ;;  %v2120_v23 = vpop.f32.mrb[1].mxu0 }
 0x14e   :  { %v177_v20 = vpop.f32.mrb[2].mxu1  ;;  %v299_v24 = vpop.f32.mrb[2].mxu0 }
 0x14f   :  { %v2105_v21 = vpop.f32.mrb[3].mxu1  ;;  %v2121_v27 = vpop.f32.mrb[3].mxu0 }
 0x154   :  { %v226_v25 = vpop.f32.mrb[4].mxu1 }
 0x155   :  { %v227_v28 = vadd.f32 %v226_v25, %v174_v18  ;;  %v2112_v29 = vpop.f32.mrb[5].mxu1 }
 0x156   :  { %v229_v30 = vpop.f32.mrb[6].mxu1  ;;  %v419_v34 = vpop.f32.mrb[4].mxu0 }
 0x157   :  { %v239_v31 = vadd.f32 %v2852_v26, %v227_v28  ;;  %v2113_v32 = vpop.f32.mrb[7].mxu1  ;;  %v2136_v35 = vpop.f32.mrb[5].mxu0 }
 0x158   :  { %v422_v36 = vpop.f32.mrb[6].mxu0 }
 0x159   :  { %v1978_v33 = vmul.f32 -1.442695, %v239_v31  ;;  %v2137_v39 = vpop.f32.mrb[7].mxu0  ;;  %v2612_v31 = vmov 1966171168  }
 0x15a   :  { %v637_v32 = vunpack.c.l.s4 %v2612_v31 }
 0x15b   :  { %2361 = vpow2.f32 %v1978_v33  ;;  %v639_v33 = vlaneseq }
 0x15c   :  { %v348_v37 = vpop.f32.mrb[8].mxu1 }
 0x15d   :  { %v349_v40 = vadd.f32 %v348_v37, %v296_v22  ;;  %v2128_v41 = vpop.f32.mrb[9].mxu1  ;;  %v2867_v35 = vshrl.u32 %v639_v33, 7 }
 0x15e   :  { %v351_v42 = vpop.f32.mrb[10].mxu1  ;;  %v542_v46 = vpop.f32.mrb[8].mxu0 }
 0x15f   :  { %v362_v43 = vadd.f32 %v2855_v38, %v349_v40  ;;  %v2129_v44 = vpop.f32.mrb[11].mxu1  ;;  %v2152_v47 = vpop.f32.mrb[9].mxu0 }
 0x160   :  { %v545_v48 = vpop.f32.mrb[10].mxu0 }
 0x161   :  { %v1977_v45 = vmul.f32 -1.442695, %v362_v43  ;;  %v2153_v51 = vpop.f32.mrb[11].mxu0  ;;  %v2874_v43 = vsub.s32 0, %v2867_v35 }
 0x163   :  { %2363 = vpow2.f32 %v1977_v45 }
 0x164   :  { %v471_v49 = vpop.f32.mrb[12].mxu1 }
 0x165   :  { %v2362_v52 = vpop.eup %2361  ;;  %v472_v53 = vadd.f32 %v471_v49, %v419_v34  ;;  %v2144_v54 = vpop.f32.mrb[13].mxu1  ;;  %v638_v34 = vunpack.c.0.s8 %v637_v32  ;;  %v2886_v49 = vld [vmem:[#allocation2 + $0x8] sm:$0xff] }
 0x166   :  { %v619_v55 = vadd.f32 1.0, %v2362_v52  ;;  %v474_v56 = vpop.f32.mrb[14].mxu1 }
 0x167   :  { %v485_v57 = vadd.f32 %v2858_v50, %v472_v53  ;;  %v2145_v58 = vpop.f32.mrb[15].mxu1  ;;  %v2870_v37 = vsub.s32 %v638_v34, %v2867_v35  ;;  %v679_v56 = vand.u32 127, %v639_v33  ;;  %v2932_v34 = vsub.s32 1, %v2867_v35 }
 0x168   :  { %2365 = vrcp.f32 %v619_v55 }
 0x169   :  { %2367 = vtanh.f32 %v485_v57  ;;  %v2917_v58 = vsub.s32 %v679_v56, %v2867_v35 }
 0x16c   :  { %v594_v59 = vpop.f32.mrb[16].mxu1 }
 0x16d   :  { %v2364_v61 = vpop.eup %2363  ;;  %v595_v62 = vadd.f32 %v594_v59, %v542_v46  ;;  %v2160_v63 = vpop.f32.mrb[17].mxu1  ;;  %v2881_v46 = vld [vmem:[#allocation2] sm:$0xff] }
 0x16e   :  { %v612_v1 = vadd.f32 1.0, %v2364_v61  ;;  %v597_v18 = vpop.f32.mrb[18].mxu1 }
 0x16f   :  { %v608_v19 = vadd.f32 %v2861_v60, %v595_v62  ;;  %v2161_v20 = vpop.f32.mrb[19].mxu1 }
 0x170   :  { %2369 = vrcp.f32 %v612_v1 }
 0x171   :  { %v1979_v21 = vmul.f32 -1.442695, %v608_v19 }
 0x172   :  { %v2366_v22 = vpop.eup %2365 }
 0x173   :  { %v2368_v23 = vpop.eup %2367  ;;  %2371 = vpow2.f32 %v1979_v21 }
 0x174   :  { %v623_v24 = vmul.f32 %v2368_v23, %v2366_v22 }
 0x17a   :  { %v2370_v25 = vpop.eup %2369 }
 0x17b   :  { %v615_v27 = vmul.f32 0.0, %v2370_v25 }
 0x17d   :  { %v2372_v28 = vpop.eup %2371  ;;  %v2864_v29 = vadd.f32 %v623_v24, %v615_v27 }
 0x17e   :  { %v628_v30 = vadd.f32 1.0, %v2372_v28 }
 0x17f   :  { %2373 = vtanh.f32 %v2864_v29 }
 0x180   :  { %2375 = vrcp.f32 %v628_v30 }
 0x189   :  { %v2374_v36 = vpop.eup %2373 }
 0x18a   :  { %v2376_v39 = vpop.eup %2375 }
 0x18b   :  { %v632_v40 = vmul.f32 %v2376_v39, %v2374_v36 }
 0x18d   :  { %v763_v41 = vpack.c.bf16 %v632_v40, %v632_v40  ;;  %v642_v42 = vrot.slane %v632_v40, %v2870_v37 }
 0x18f   :  { %2175 = vmatmul.mubr.msk.bf16.vlgmr.msra.gmra.mrb[20].mxu1 %vm136_vm1, %v763_v41  ;;  %v650_v44 = vrot.slane %v642_v42, %v2870_v37  ;;  %v643_v45 = vcombine.high %v642_v42, %v642_v42 }
 0x190   :  { %2187 = vmatpush3.bf16.msra.mxu1 %v2784_v9  ;;  %2190 = vmatprep.mubr.msk.bf16.mxu1 %vm2610_vm0, %v2609_v0 }
 0x191   :  { %2188 = vmatprep.subr.bf16.mxu1 %v2609_v0  ;;  %v661_v47 = vrot.slane %v650_v44, %v2874_v43  ;;  %v657_v48 = vrot.slane %v643_v45, %v2870_v37 }
 0x193   :  { %v668_v51 = vmul.f32 %v661_v47, %v2881_v46  ;;  %v665_v52 = vrot.slane %v657_v48, %v2874_v43 }
 0x194   :  { %2189 = vmatpush3.bf16.msra.mxu1 %v2791_v11 }
 0x195   :  { %v670_v53 = vsel %vm136_vm1, %v668_v51, 0.0  ;;  %2202 = vmatprep.subr.bf16.mxu1 %v2609_v0  ;;  %v669_v54 = vmul.f32 %v665_v52, %v2886_v49 }
 0x196   :  { %671 = vadd.xlane.f32.xlu0 %v670_v53 }
 0x197   :  { %2191 = vmatmul.mubr.msk.bf16.vlgmr.msra.gmra.mrb[24].mxu1 %vm136_vm1, %v763_v41  ;;  %v673_v55 = vsel %vm136_vm1, %v669_v54, 0.0 }
 0x198   :  { %2203 = vmatpush3.bf16.msra.mxu1 %v2806_v13  ;;  %2206 = vmatprep.mubr.msk.bf16.mxu1 %vm2610_vm0, %v2609_v0 }
 0x199   :  { %2204 = vmatprep.subr.bf16.mxu1 %v2609_v0 }
 0x19a   :  { %674 = vadd.xlane.f32.xlu0 %v673_v55 }
 0x19c   :  { %2205 = vmatpush3.bf16.msra.mxu1 %v2818_v15 }
 0x19d   :  { %2218 = vmatprep.subr.bf16.mxu1 %v2609_v0 }
 0x19f   :  { %2207 = vmatmul.mubr.msk.bf16.vlgmr.msra.gmra.mrb[28].mxu1 %vm136_vm1, %v763_v41 }
 0x1a0   :  { %2219 = vmatpush3.bf16.msra.mxu1 %v2826_v16  ;;  %2222 = vmatprep.mubr.msk.bf16.mxu1 %vm2610_vm0, %v2609_v0 }
 0x1a1   :  { %2220 = vmatprep.subr.bf16.mxu1 %v2609_v0 }
 0x1a4   :  { %2221 = vmatpush3.bf16.msra.mxu1 %v2836_v17 }
 0x1a5   :  { %2234 = vmatprep.subr.bf16.mxu1 %v2609_v0 }
 0x1a7   :  { %2223 = vmatmul.mubr.msk.bf16.vlgmr.msra.gmra.mrb[32].mxu1 %vm136_vm1, %v763_v41 }
 0x1a8   :  { %2235 = vmatpush3.bf16.msra.mxu1 %v2765_v5  ;;  %2238 = vmatprep.mubr.msk.bf16.mxu1 %vm2610_vm0, %v2609_v0 }
 0x1a9   :  { %2236 = vmatprep.subr.bf16.mxu1 %v2609_v0 }
 0x1ac   :  { %2237 = vmatpush3.bf16.msra.mxu1 %v2774_v7 }
 0x1ad   :  { %2250 = vmatprep.subr.bf16.mxu1 %v2609_v0 }
 0x223   :  { %v672_v57 = vpop.xlane.xlu0 %671 }
 0x224   :  { %v683_v61 = vrot.slane %v672_v57, %v2917_v58 }
 0x227   :  { %v675_v59 = vpop.xlane.xlu0 %674 }
 0x228   :  { %v687_v5 = vrot.slane %v675_v59, %v2917_v58 }
 0x22a   :  { %v689_v62 = vsel %vm688_vm2, %v687_v5, %v683_v61 }
 0x22b   :  { %v692_v63 = vsel %vm691_vm3, %v689_v62, -inf }
 0x22c   :  { %693 = vmax.xlane.f32.xlu1 %v692_v63 }
 0x262   :  { %v2923_v7 = vpop.f32.mrb[20].mxu1 }
 0x263   :  { %v2176_v1 = vpop.f32.mrb[21].mxu1 }
 0x264   :  { %v848_v18 = vpop.f32.mrb[22].mxu1 }
 0x265   :  { %v2177_v19 = vpop.f32.mrb[23].mxu1 }
 0x26a   :  { %v2925_v20 = vpop.f32.mrb[24].mxu1 }
 0x26b   :  { %v2192_v21 = vpop.f32.mrb[25].mxu1 }
 0x26c   :  { %v929_v22 = vpop.f32.mrb[26].mxu1 }
 0x26d   :  { %v2193_v23 = vpop.f32.mrb[27].mxu1 }
 0x272   :  { %v2927_v24 = vpop.f32.mrb[28].mxu1 }
 0x273   :  { %v2208_v25 = vpop.f32.mrb[29].mxu1 }
 0x274   :  { %v1010_v27 = vpop.f32.mrb[30].mxu1 }
 0x275   :  { %v2209_v28 = vpop.f32.mrb[31].mxu1 }
 0x27a   :  { %v2929_v30 = vpop.f32.mrb[32].mxu1 }
 0x27b   :  { %v2224_v31 = vpop.f32.mrb[33].mxu1 }
 0x27c   :  { %v1091_v32 = vpop.f32.mrb[34].mxu1 }
 0x27d   :  { %v2225_v33 = vpop.f32.mrb[35].mxu1 }
 0x2b9   :  { %v694_v36 = vpop.xlane.xlu1 %693 }
 0x2ba   :  { %v699_v39 = vrot.slane %v694_v36, %v2874_v43  ;;  %v703_v40 = vrot.slane %v694_v36, %v2932_v34  ;;  %v712_v56 = vsub.f32 -inf, %v694_v36 }
 0x2bc   :  { %v706_v41 = vsub.f32 %v672_v57, %v699_v39  ;;  %v707_v42 = vsub.f32 %v675_v59, %v703_v40  ;;  %v713_v61 = vmul.f32 1.442695, %v712_v56 }
 0x2be   :  { %v708_v44 = vmul.f32 1.442695, %v706_v41  ;;  %v710_v45 = vmul.f32 1.442695, %v707_v42 }
 0x2c0   :  { %2377 = vpow2.f32 %v708_v44 }
 0x2c1   :  { %2379 = vpow2.f32 %v710_v45 }
 0x2c2   :  { %2381 = vpow2.f32 %v713_v61 }
 0x2ca   :  { %v2378_v47 = vpop.eup %2377 }
 0x2cb   :  { %v2380_v48 = vpop.eup %2379  ;;  %719 = vperm.xlu1 %2335, %v2378_v47  }
 0x2cc   :  { %722 = vperm.xlu0 %2336, %v2380_v48   ;;  %v2382_v23 = vpop.eup %2381 }
 0x2cd   :  { %v715_v28 = vmul.f32 0.0, %v2382_v23 }
 0x34a   :  { %v720_v51 = vpop.permute.xlu1 %719 }
 0x34b   :  { %v723_v52 = vpop.permute.xlu0 %722  ;;  %v727_v35 = vrot.slane %v720_v51, %v2917_v58  ;;  %v740_v59 = vmul.f32 %v720_v51, %v2881_v46 }
 0x34c   :  { %v731_v53 = vrot.slane %v723_v52, %v2917_v58  ;;  %v741_v57 = vmul.f32 %v723_v52, %v2886_v49 }
 0x34d   :  { %v742_v62 = vsel %vm136_vm1, %v740_v59, 0.0 }
 0x34e   :  { %v732_v54 = vsel %vm688_vm2, %v731_v53, %v727_v35  ;;  %v749_v5 = vsel %vm136_vm1, %v741_v57, 0.0  ;;  %v743_v1 = vrot.slane %v742_v62, 4 }
 0x34f   :  { %v734_v55 = vsel %vm691_vm3, %v732_v54, 0.0  ;;  %v750_v63 = vrot.slane %v749_v5, 4 }
 0x350   :  { %735 = vadd.xlane.f32.xlu1 %v734_v55  ;;  %v744_v19 = vadd.f32 %v743_v1, %v742_v62 }
 0x351   :  { %v751_v18 = vadd.f32 %v750_v63, %v749_v5 }
 0x352   :  { %v745_v22 = vrot.slane %v744_v19, 2 }
 0x353   :  { %v752_v21 = vrot.slane %v751_v18, 2 }
 0x354   :  { %v746_v27 = vadd.f32 %v745_v22, %v744_v19 }
 0x355   :  { %v753_v25 = vadd.f32 %v752_v21, %v751_v18 }
 0x356   :  { %v747_v33 = vrot.slane %v746_v27, 1 }
 0x357   :  { %v754_v32 = vrot.slane %v753_v25, 1 }
 0x358   :  { %v748_v40 = vadd.f32 %v747_v33, %v746_v27 }
 0x359   :  { %v755_v39 = vadd.f32 %v754_v32, %v753_v25 }
 0x35b   :  { %v758_v41 = vsel %vm688_vm2, %v755_v39, %v748_v40 }
 0x35c   :  { %v760_v42 = vadd.f32 %v758_v41, %v715_v28 }
 0x3dd   :  { %v736_v31 = vpop.xlane.xlu1 %735 }
 0x3de   :  { %v737_v36 = vadd.f32 %v736_v31, %v715_v28 }
 0x3e0   :  { %2383 = vrcp.f32 %v737_v36 }
 0x3ea   :  { %v2384_v44 = vpop.eup %2383 }
 0x3eb   :  { %v762_v45 = vmul.f32 %v2384_v44, %v760_v42 }
 0x3ed   :  { %v764_v47 = vpack.c.bf16 %v762_v45, %v762_v45 }
 0x3ef   :  { %2167 = vmatmul.mubr.msk.bf16.vlgmr.msra.gmra.mrb[12].mxu0 %vm136_vm1, %v764_v47 }
 0x3f0   :  { %2179 = vmatpush3.bf16.msra.mxu0 %v2762_v4  ;;  %2182 = vmatprep.mubr.msk.bf16.mxu0 %vm2610_vm0, %v2609_v0 }
 0x3f1   :  { %2180 = vmatprep.subr.bf16.mxu0 %v2609_v0 }
 0x3f4   :  { %2181 = vmatpush3.bf16.msra.mxu0 %v2770_v6 }
 0x3f5   :  { %2194 = vmatprep.subr.bf16.mxu0 %v2609_v0 }
 0x3f7   :  { %2183 = vmatmul.mubr.msk.bf16.vlgmr.msra.gmra.mrb[16].mxu0 %vm136_vm1, %v764_v47 }
 0x3f8   :  { %2195 = vmatpush3.bf16.msra.mxu0 %v2780_v8  ;;  %2198 = vmatprep.mubr.msk.bf16.mxu0 %vm2610_vm0, %v2609_v0 }
 0x3f9   :  { %2196 = vmatprep.subr.bf16.mxu0 %v2609_v0 }
 0x3fc   :  { %2197 = vmatpush3.bf16.msra.mxu0 %v2789_v10 }
 0x3fd   :  { %2210 = vmatprep.subr.bf16.mxu0 %v2609_v0 }
 0x3ff   :  { %2199 = vmatmul.mubr.msk.bf16.vlgmr.msra.gmra.mrb[20].mxu0 %vm136_vm1, %v764_v47 }
 0x400   :  { %2211 = vmatpush3.bf16.msra.mxu0 %v2797_v12  ;;  %2214 = vmatprep.mubr.msk.bf16.mxu0 %vm2610_vm0, %v2609_v0 }
 0x401   :  { %2212 = vmatprep.subr.bf16.mxu0 %v2609_v0 }
 0x404   :  { %2213 = vmatpush3.bf16.msra.mxu0 %v2811_v14 }
 0x405   :  { %2226 = vmatprep.subr.bf16.mxu0 %v2609_v0 }
 0x407   :  { %2215 = vmatmul.mubr.msk.bf16.vlgmr.msra.gmra.mrb[24].mxu0 %vm136_vm1, %v764_v47 }
 0x408   :  { %2227 = vmatpush3.bf16.msra.mxu0 %v2756_v2  ;;  %2230 = vmatprep.mubr.msk.bf16.mxu0 %vm2610_vm0, %v2609_v0 }
 0x409   :  { %2228 = vmatprep.subr.bf16.mxu0 %v2609_v0 }
 0x40c   :  { %2229 = vmatpush3.bf16.msra.mxu0 %v2759_v3 }
 0x40d   :  { %2242 = vmatprep.subr.bf16.mxu0 %v2609_v0 }
 0x4c2   :  { %v802_v48 = vpop.f32.mrb[12].mxu0 }
 0x4c3   :  { %v846_v51 = vadd.f32 %v2923_v7, %v802_v48  ;;  %v2168_v52 = vpop.f32.mrb[13].mxu0 }
 0x4c4   :  { %v805_v35 = vpop.f32.mrb[14].mxu0 }
 0x4c5   :  { %v851_v53 = vadd.f32 %v2852_v26, %v846_v51  ;;  %v2169_v54 = vpop.f32.mrb[15].mxu0 }
 0x4c7   :  { %v1989_v55 = vmul.f32 -1.442695, %v851_v53 }
 0x4c9   :  { %2385 = vpow2.f32 %v1989_v55 }
 0x4ca   :  { %v886_v2 = vpop.f32.mrb[16].mxu0 }
 0x4cb   :  { %v927_v56 = vadd.f32 %v2925_v20, %v886_v2  ;;  %v2184_v57 = vpop.f32.mrb[17].mxu0 }
 0x4cc   :  { %v889_v59 = vpop.f32.mrb[18].mxu0 }
 0x4cd   :  { %v932_v61 = vadd.f32 %v2855_v38, %v927_v56  ;;  %v2185_v3 = vpop.f32.mrb[19].mxu0 }
 0x4cf   :  { %v1988_v5 = vmul.f32 -1.442695, %v932_v61 }
 0x4d1   :  { %2387 = vpow2.f32 %v1988_v5 }
 0x4d2   :  { %v967_v62 = vpop.f32.mrb[20].mxu0 }
 0x4d3   :  { %v2386_v63 = vpop.eup %2385  ;;  %v1008_v7 = vadd.f32 %v2927_v24, %v967_v62  ;;  %v2200_v1 = vpop.f32.mrb[21].mxu0 }
 0x4d4   :  { %v1105_v18 = vadd.f32 1.0, %v2386_v63  ;;  %v970_v19 = vpop.f32.mrb[22].mxu0 }
 0x4d5   :  { %v1013_v21 = vadd.f32 %v2858_v50, %v1008_v7  ;;  %v2201_v22 = vpop.f32.mrb[23].mxu0 }
 0x4d6   :  { %2389 = vrcp.f32 %v1105_v18 }
 0x4d7   :  { %2391 = vtanh.f32 %v1013_v21 }
 0x4da   :  { %v1048_v20 = vpop.f32.mrb[24].mxu0 }
 0x4db   :  { %v2388_v23 = vpop.eup %2387  ;;  %v1089_v25 = vadd.f32 %v2929_v30, %v1048_v20  ;;  %v2216_v27 = vpop.f32.mrb[25].mxu0 }
 0x4dc   :  { %v1098_v28 = vadd.f32 1.0, %v2388_v23  ;;  %v1051_v31 = vpop.f32.mrb[26].mxu0 }
 0x4dd   :  { %v1094_v32 = vadd.f32 %v2861_v60, %v1089_v25  ;;  %v2217_v33 = vpop.f32.mrb[27].mxu0 }
 0x4de   :  { %2393 = vrcp.f32 %v1098_v28 }
 0x4df   :  { %v1990_v24 = vmul.f32 -1.442695, %v1094_v32 }
 0x4e0   :  { %v2390_v36 = vpop.eup %2389 }
 0x4e1   :  { %v2392_v39 = vpop.eup %2391  ;;  %2395 = vpow2.f32 %v1990_v24 }
 0x4e2   :  { %v1109_v40 = vmul.f32 %v2392_v39, %v2390_v36 }
 0x4e8   :  { %v2394_v41 = vpop.eup %2393 }
 0x4e9   :  { %v1101_v42 = vmul.f32 %v2394_v41, %v2864_v29 }
 0x4eb   :  { %v2396_v44 = vpop.eup %2395  ;;  %v2982_v45 = vadd.f32 %v1109_v40, %v1101_v42 }
 0x4ec   :  { %v1114_v47 = vadd.f32 1.0, %v2396_v44 }
 0x4ed   :  { %2397 = vtanh.f32 %v2982_v45 }
 0x4ee   :  { %2399 = vrcp.f32 %v1114_v47 }
 0x4f7   :  { %v2398_v30 = vpop.eup %2397 }
 0x4f8   :  { %v2400_v48 = vpop.eup %2399 }
 0x4f9   :  { %v1118_v51 = vmul.f32 %v2400_v48, %v2398_v30 }
 0x4fb   :  { %v1243_v52 = vpack.c.bf16 %v1118_v51, %v1118_v51  ;;  %v1126_v35 = vrot.slane %v1118_v51, %v2870_v37 }
 0x4fd   :  { %2239 = vmatmul.mubr.msk.bf16.vlgmr.msra.gmra.mrb[36].mxu1 %vm136_vm1, %v1243_v52  ;;  %v1134_v53 = vrot.slane %v1126_v35, %v2870_v37  ;;  %v1127_v54 = vcombine.high %v1126_v35, %v1126_v35 }
 0x4fe   :  { %2251 = vmatpush3.bf16.msra.mxu1 %v2784_v9  ;;  %2254 = vmatprep.mubr.msk.bf16.mxu1 %vm2610_vm0, %v2609_v0 }
 0x4ff   :  { %2252 = vmatprep.subr.bf16.mxu1 %v2609_v0  ;;  %v1145_v29 = vrot.slane %v1134_v53, %v2874_v43  ;;  %v1141_v55 = vrot.slane %v1127_v54, %v2870_v37 }
 0x501   :  { %v1152_v2 = vmul.f32 %v1145_v29, %v2881_v46  ;;  %v1149_v56 = vrot.slane %v1141_v55, %v2874_v43 }
 0x502   :  { %2253 = vmatpush3.bf16.msra.mxu1 %v2791_v11 }
 0x503   :  { %v1154_v57 = vsel %vm136_vm1, %v1152_v2, 0.0  ;;  %2266 = vmatprep.subr.bf16.mxu1 %v2609_v0  ;;  %v1153_v9 = vmul.f32 %v1149_v56, %v2886_v49 }
 0x504   :  { %1155 = vadd.xlane.f32.xlu0 %v1154_v57 }
 0x505   :  { %2255 = vmatmul.mubr.msk.bf16.vlgmr.msra.gmra.mrb[40].mxu1 %vm136_vm1, %v1243_v52  ;;  %v1157_v59 = vsel %vm136_vm1, %v1153_v9, 0.0 }
 0x506   :  { %2267 = vmatpush3.bf16.msra.mxu1 %v2806_v13  ;;  %1158 = vadd.xlane.f32.xlu1 %v1157_v59 }
 0x507   :  { %2268 = vmatprep.subr.bf16.mxu1 %v2609_v0  ;;  %2270 = vmatprep.mubr.msk.bf16.mxu1 %vm2610_vm0, %v2609_v0 }
 0x50a   :  { %2269 = vmatpush3.bf16.msra.mxu1 %v2818_v15 }
 0x50b   :  { %2282 = vmatprep.subr.bf16.mxu1 %v2609_v0 }
 0x50d   :  { %2271 = vmatmul.mubr.msk.bf16.vlgmr.msra.gmra.mrb[44].mxu1 %vm136_vm1, %v1243_v52 }
 0x50e   :  { %2283 = vmatpush3.bf16.msra.mxu1 %v2826_v16  ;;  %2286 = vmatprep.mubr.msk.bf16.mxu1 %vm2610_vm0, %v2609_v0 }
 0x50f   :  { %2284 = vmatprep.subr.bf16.mxu1 %v2609_v0 }
 0x512   :  { %2285 = vmatpush3.bf16.msra.mxu1 %v2836_v17 }
 0x513   :  { %2298 = vmatprep.subr.bf16.mxu1 %v2609_v0 }
 0x515   :  { %2287 = vmatmul.mubr.msk.bf16.vlgmr.msra.gmra.mrb[48].mxu1 %vm136_vm1, %v1243_v52 }
 0x516   :  { %2302 = vmatprep.mubr.msk.bf16.mxu1 %vm2610_vm0, %v2609_v0 }
 0x591   :  { %v1156_v11 = vpop.xlane.xlu0 %1155 }
 0x592   :  { %v1165_v15 = vrot.slane %v1156_v11, %v2917_v58 }
 0x593   :  { %v1159_v13 = vpop.xlane.xlu1 %1158 }
 0x594   :  { %v1169_v16 = vrot.slane %v1159_v13, %v2917_v58 }
 0x596   :  { %v1170_v61 = vsel %vm688_vm2, %v1169_v16, %v1165_v15 }
 0x597   :  { %v1172_v3 = vsel %vm691_vm3, %v1170_v61, -inf }
 0x598   :  { %1173 = vmax.xlane.f32.xlu1 %v1172_v3 }
 0x5d0   :  { %v3022_v5 = vpop.f32.mrb[36].mxu1 }
 0x5d1   :  { %v2240_v17 = vpop.f32.mrb[37].mxu1 }
 0x5d2   :  { %v1328_v62 = vpop.f32.mrb[38].mxu1 }
 0x5d3   :  { %v2241_v63 = vpop.f32.mrb[39].mxu1 }
 0x5d8   :  { %v3024_v7 = vpop.f32.mrb[40].mxu1 }
 0x5d9   :  { %v2256_v1 = vpop.f32.mrb[41].mxu1 }
 0x5da   :  { %v1409_v18 = vpop.f32.mrb[42].mxu1 }
 0x5db   :  { %v2257_v19 = vpop.f32.mrb[43].mxu1 }
 0x5e0   :  { %v3026_v21 = vpop.f32.mrb[44].mxu1 }
 0x5e1   :  { %v2272_v22 = vpop.f32.mrb[45].mxu1 }
 0x5e2   :  { %v1490_v20 = vpop.f32.mrb[46].mxu1 }
 0x5e3   :  { %v2273_v23 = vpop.f32.mrb[47].mxu1 }
 0x5e8   :  { %v3028_v25 = vpop.f32.mrb[48].mxu1 }
 0x5e9   :  { %v2288_v27 = vpop.f32.mrb[49].mxu1 }
 0x5ea   :  { %v1571_v28 = vpop.f32.mrb[50].mxu1 }
 0x5eb   :  { %v2289_v31 = vpop.f32.mrb[51].mxu1 }
 0x625   :  { %v1174_v32 = vpop.xlane.xlu1 %1173 }
 0x626   :  { %v1179_v33 = vrot.slane %v1174_v32, %v2874_v43  ;;  %v1183_v24 = vrot.slane %v1174_v32, %v2932_v34  ;;  %v1192_v53 = vsub.f32 -inf, %v1174_v32 }
 0x628   :  { %v1186_v36 = vsub.f32 %v1156_v11, %v1179_v33  ;;  %v1187_v39 = vsub.f32 %v1159_v13, %v1183_v24  ;;  %v1193_v55 = vmul.f32 1.442695, %v1192_v53 }
 0x62a   :  { %v1188_v40 = vmul.f32 1.442695, %v1186_v36  ;;  %v1190_v41 = vmul.f32 1.442695, %v1187_v39 }
 0x62c   :  { %2401 = vpow2.f32 %v1188_v40 }
 0x62d   :  { %2403 = vpow2.f32 %v1190_v41 }
 0x62e   :  { %2405 = vpow2.f32 %v1193_v55 }
 0x636   :  { %v2402_v42 = vpop.eup %2401 }
 0x637   :  { %1199 = vperm.xlu1 %2335, %v2402_v42   ;;  %v2404_v44 = vpop.eup %2403 }
 0x638   :  { %v2406_v16 = vpop.eup %2405 }
 0x639   :  { %v1195_v17 = vmul.f32 0.0, %v2406_v16 }
 0x63b   :  { %1202 = vperm.xlu1 %2335, %v2404_v44  }
 0x6b6   :  { %v1200_v47 = vpop.permute.xlu1 %1199 }
 0x6b7   :  { %v1207_v48 = vrot.slane %v1200_v47, %v2917_v58  ;;  %v1220_v29 = vmul.f32 %v1200_v47, %v2881_v46 }
 0x6b9   :  { %v1222_v56 = vsel %vm136_vm1, %v1220_v29, 0.0 }
 0x6ba   :  { %v1203_v30 = vpop.permute.xlu1 %1202  ;;  %v1223_v9 = vrot.slane %v1222_v56, 4 }
 0x6bb   :  { %v1211_v51 = vrot.slane %v1203_v30, %v2917_v58  ;;  %v1221_v54 = vmul.f32 %v1203_v30, %v2886_v49 }
 0x6bc   :  { %v1224_v11 = vadd.f32 %v1223_v9, %v1222_v56 }
 0x6bd   :  { %v1212_v52 = vsel %vm688_vm2, %v1211_v51, %v1207_v48  ;;  %v1229_v2 = vsel %vm136_vm1, %v1221_v54, 0.0 }
 0x6be   :  { %v1214_v35 = vsel %vm691_vm3, %v1212_v52, 0.0  ;;  %v1230_v57 = vrot.slane %v1229_v2, 4  ;;  %v1225_v15 = vrot.slane %v1224_v11, 2 }
 0x6bf   :  { %1215 = vadd.xlane.f32.xlu0 %v1214_v35 }
 0x6c0   :  { %v1231_v59 = vadd.f32 %v1230_v57, %v1229_v2  ;;  %v1226_v3 = vadd.f32 %v1225_v15, %v1224_v11 }
 0x6c2   :  { %v1232_v13 = vrot.slane %v1231_v59, 2  ;;  %v1227_v18 = vrot.slane %v1226_v3, 1 }
 0x6c4   :  { %v1233_v61 = vadd.f32 %v1232_v13, %v1231_v59  ;;  %v1228_v22 = vadd.f32 %v1227_v18, %v1226_v3 }
 0x6c6   :  { %v1234_v63 = vrot.slane %v1233_v61, 1 }
 0x6c8   :  { %v1235_v19 = vadd.f32 %v1234_v63, %v1233_v61 }
 0x6ca   :  { %v1238_v20 = vsel %vm688_vm2, %v1235_v19, %v1228_v22 }
 0x6cb   :  { %v1240_v23 = vadd.f32 %v1238_v20, %v1195_v17 }
 0x74c   :  { %v1216_v62 = vpop.xlane.xlu0 %1215 }
 0x74d   :  { %v1217_v1 = vadd.f32 %v1216_v62, %v1195_v17 }
 0x74f   :  { %2407 = vrcp.f32 %v1217_v1 }
 0x759   :  { %v2408_v27 = vpop.eup %2407 }
 0x75a   :  { %v1242_v28 = vmul.f32 %v2408_v27, %v1240_v23 }
 0x75c   :  { %v1244_v31 = vpack.c.bf16 %v1242_v28, %v1242_v28 }
 0x75e   :  { %2231 = vmatmul.mubr.msk.bf16.vlgmr.msra.gmra.mrb[28].mxu0 %vm136_vm1, %v1244_v31 }
 0x75f   :  { %2243 = vmatpush3.bf16.msra.mxu0 %v2762_v4  ;;  %2246 = vmatprep.mubr.msk.bf16.mxu0 %vm2610_vm0, %v2609_v0  ;;  %v2353_v4 = vld [vmem:[#allocation10] sm:$0xff]  }
 0x760   :  { %2244 = vmatprep.subr.bf16.mxu0 %v2609_v0  ;;  %2299 = vmatpush3.bf16.msra.mxu1 %v2353_v4 }
 0x761   :  { %2300 = vmatprep.subr.bf16.mxu1 %v2609_v0 }
 0x763   :  { %2245 = vmatpush3.bf16.msra.mxu0 %v2770_v6  ;;  %v2354_v6 = vld [vmem:[#allocation10 + $0x8] sm:$0xff]  }
 0x764   :  { %2258 = vmatprep.subr.bf16.mxu0 %v2609_v0  ;;  %2301 = vmatpush3.bf16.msra.mxu1 %v2354_v6 }
 0x766   :  { %2247 = vmatmul.mubr.msk.bf16.vlgmr.msra.gmra.mrb[32].mxu0 %vm136_vm1, %v1244_v31 }
 0x767   :  { %2259 = vmatpush3.bf16.msra.mxu0 %v2780_v8  ;;  %2262 = vmatprep.mubr.msk.bf16.mxu0 %vm2610_vm0, %v2609_v0 }
 0x768   :  { %2260 = vmatprep.subr.bf16.mxu0 %v2609_v0 }
 0x76b   :  { %2261 = vmatpush3.bf16.msra.mxu0 %v2789_v10 }
 0x76c   :  { %2274 = vmatprep.subr.bf16.mxu0 %v2609_v0 }
 0x76e   :  { %2263 = vmatmul.mubr.msk.bf16.vlgmr.msra.gmra.mrb[36].mxu0 %vm136_vm1, %v1244_v31 }
 0x76f   :  { %2275 = vmatpush3.bf16.msra.mxu0 %v2797_v12  ;;  %2278 = vmatprep.mubr.msk.bf16.mxu0 %vm2610_vm0, %v2609_v0 }
 0x770   :  { %2276 = vmatprep.subr.bf16.mxu0 %v2609_v0 }
 0x773   :  { %2277 = vmatpush3.bf16.msra.mxu0 %v2811_v14 }
 0x774   :  { %2290 = vmatprep.subr.bf16.mxu0 %v2609_v0 }
 0x776   :  { %2279 = vmatmul.mubr.msk.bf16.vlgmr.msra.gmra.mrb[40].mxu0 %vm136_vm1, %v1244_v31 }
 0x777   :  { %2294 = vmatprep.mubr.msk.bf16.mxu0 %vm2610_vm0, %v2609_v0 }
 0x831   :  { %v1282_v8 = vpop.f32.mrb[28].mxu0 }
 0x832   :  { %v1326_v10 = vadd.f32 %v3022_v5, %v1282_v8  ;;  %v2232_v12 = vpop.f32.mrb[29].mxu0 }
 0x833   :  { %v1285_v32 = vpop.f32.mrb[30].mxu0 }
 0x834   :  { %v1331_v14 = vadd.f32 %v2852_v26, %v1326_v10  ;;  %v2233_v33 = vpop.f32.mrb[31].mxu0 }
 0x836   :  { %v2000_v24 = vmul.f32 -1.442695, %v1331_v14 }
 0x838   :  { %2409 = vpow2.f32 %v2000_v24 }
 0x839   :  { %v1366_v36 = vpop.f32.mrb[32].mxu0 }
 0x83a   :  { %v1407_v39 = vadd.f32 %v3024_v7, %v1366_v36  ;;  %v2248_v40 = vpop.f32.mrb[33].mxu0 }
 0x83b   :  { %v1369_v41 = vpop.f32.mrb[34].mxu0 }
 0x83c   :  { %v1412_v42 = vadd.f32 %v2855_v38, %v1407_v39  ;;  %v2249_v44 = vpop.f32.mrb[35].mxu0 }
 0x83e   :  { %v1999_v47 = vmul.f32 -1.442695, %v1412_v42 }
 0x840   :  { %2411 = vpow2.f32 %v1999_v47 }
 0x841   :  { %v1447_v30 = vpop.f32.mrb[36].mxu0 }
 0x842   :  { %v2410_v48 = vpop.eup %2409  ;;  %v1488_v5 = vadd.f32 %v3026_v21, %v1447_v30  ;;  %v2264_v51 = vpop.f32.mrb[37].mxu0 }
 0x843   :  { %v1585_v52 = vadd.f32 1.0, %v2410_v48  ;;  %v1450_v26 = vpop.f32.mrb[38].mxu0 }
 0x844   :  { %v1493_v35 = vadd.f32 %v2858_v50, %v1488_v5  ;;  %v2265_v53 = vpop.f32.mrb[39].mxu0  ;;  %v2356_v26 = vld [vmem:[%s3140_s5 + $0x8] sm:$0xff]  }
 0x845   :  { %2413 = vrcp.f32 %v1585_v52  ;;  %v2355_v52 = vld [vmem:[%s3140_s5] sm:$0xff]  }
 0x846   :  { %2415 = vtanh.f32 %v1493_v35  ;;  %2291 = vmatpush3.bf16.msra.mxu0 %v2355_v52 }
 0x847   :  { %2292 = vmatprep.subr.bf16.mxu0 %v2609_v0 }
 0x849   :  { %v1528_v7 = vpop.f32.mrb[40].mxu0 }
 0x84a   :  { %v2412_v54 = vpop.eup %2411  ;;  %v1569_v29 = vadd.f32 %v3028_v25, %v1528_v7  ;;  %v2280_v38 = vpop.f32.mrb[41].mxu0  ;;  %2293 = vmatpush3.bf16.msra.mxu0 %v2356_v26 }
 0x84b   :  { %v1578_v55 = vadd.f32 1.0, %v2412_v54  ;;  %v1531_v2 = vpop.f32.mrb[42].mxu0  ;;  %2306 = vmatprep.subr.bf16.mxu0 %v2609_v0 }
 0x84c   :  { %v1574_v56 = vadd.f32 %v2861_v60, %v1569_v29  ;;  %v2281_v57 = vpop.f32.mrb[43].mxu0 }
 0x84d   :  { %2417 = vrcp.f32 %v1578_v55 }
 0x84e   :  { %v2001_v21 = vmul.f32 -1.442695, %v1574_v56 }
 0x84f   :  { %v2414_v9 = vpop.eup %2413 }
 0x850   :  { %v2416_v59 = vpop.eup %2415  ;;  %2419 = vpow2.f32 %v2001_v21 }
 0x851   :  { %v1589_v11 = vmul.f32 %v2416_v59, %v2414_v9 }
 0x857   :  { %v2418_v50 = vpop.eup %2417 }
 0x858   :  { %v1581_v13 = vmul.f32 %v2418_v50, %v2982_v45 }
 0x85a   :  { %v2420_v15 = vpop.eup %2419  ;;  %v1590_v16 = vadd.f32 %v1589_v11, %v1581_v13 }
 0x85b   :  { %v1594_v61 = vadd.f32 1.0, %v2420_v15 }
 0x85c   :  { %2421 = vtanh.f32 %v1590_v16 }
 0x85d   :  { %2423 = vrcp.f32 %v1594_v61 }
 0x866   :  { %v2422_v25 = vpop.eup %2421 }
 0x867   :  { %v2424_v3 = vpop.eup %2423 }
 0x868   :  { %v1598_v17 = vmul.f32 %v2424_v3, %v2422_v25 }
 0x86a   :  { %v1723_v62 = vpack.c.bf16 %v1598_v17, %v1598_v17  ;;  %v1606_v60 = vrot.slane %v1598_v17, %v2870_v37 }
 0x86c   :  { %2303 = vmatmul.mubr.msk.bf16.vlgmr.msra.gmra.mrb[52].mxu1 %vm136_vm1, %v1723_v62  ;;  %v1614_v63 = vrot.slane %v1606_v60, %v2870_v37  ;;  %v1607_v1 = vcombine.high %v1606_v60, %v1606_v60  ;;  %v2357_v60 = vld [vmem:[#allocation11] sm:$0xff]  }
 0x86e   :  { %v1625_v18 = vrot.slane %v1614_v63, %v2874_v43  ;;  %v1621_v45 = vrot.slane %v1607_v1, %v2870_v37  ;;  %v2358_v1 = vld [vmem:[#allocation11 + $0x8] sm:$0xff]  }
 0x870   :  { %v1632_v19 = vmul.f32 %v1625_v18, %v2881_v46  ;;  %v1629_v22 = vrot.slane %v1621_v45, %v2874_v43  ;;  %v2359_v18 = vld [vmem:[#allocation11 + $0x10] sm:$0xff]   ;;  %v2360_v45 = vld [vmem:[#allocation11 + $0x18] sm:$0xff]  }
 0x872   :  { %v1634_v20 = vsel %vm136_vm1, %v1632_v19, 0.0  ;;  %v1633_v23 = vmul.f32 %v1629_v22, %v2886_v49  ;;  %v2008_v22 = vld [vmem:[%s3141_s6] ss:$0 sm:$0xff]  ;;  %s2565_s6 = scalar_lea.vmem %s1946_s27, 32 }
 0x873   :  { %1635 = vadd.xlane.f32.xlu1 %v1634_v20  ;;  %p2566_p6 = scmp.ne.s32.totalorder %s1946_s27, %s2565_s6  ;;  %p2571_p8 = scmp.lt.s32.totalorder %s2565_s6, %s2565_s6 }
 0x874   :  { %v1637_v27 = vsel %vm136_vm1, %v1633_v23, 0.0 }
 0x875   :  { %1638 = vadd.xlane.f32.xlu0 %v1637_v27  ;;  %p2572_p9 = por %p2571_p8, %p2570_p7 }
 0x877   :  { %p2573_p10 = pnand %p2572_p9, %p2566_p6 }
 0x900   :  { %v1636_v28 = vpop.xlane.xlu1 %1635 }
 0x901   :  { %v1645_v4 = vrot.slane %v1636_v28, %v2917_v58 }
 0x902   :  { %v1639_v31 = vpop.xlane.xlu0 %1638 }
 0x903   :  { %v1649_v6 = vrot.slane %v1639_v31, %v2917_v58 }
 0x905   :  { %v1650_v37 = vsel %vm688_vm2, %v1649_v6, %v1645_v4 }
 0x906   :  { %v1652_v8 = vsel %vm691_vm3, %v1650_v37, -inf }
 0x907   :  { %1653 = vmax.xlane.f32.xlu0 %v1652_v8 }
 0x93f   :  { %v3089_v10 = vpop.f32.mrb[52].mxu1 }
 0x940   :  { %v2304_v12 = vpop.f32.mrb[53].mxu1 }
 0x941   :  { %v1840_v32 = vpop.f32.mrb[54].mxu1 }
 0x942   :  { %v2305_v14 = vpop.f32.mrb[55].mxu1 }
 0x994   :  { %v1654_v33 = vpop.xlane.xlu0 %1653 }
 0x995   :  { %v1659_v24 = vrot.slane %v1654_v33, %v2874_v43  ;;  %v1663_v36 = vrot.slane %v1654_v33, %v2932_v34 }
 0x997   :  { %v1666_v39 = vsub.f32 %v1636_v28, %v1659_v24  ;;  %v1667_v40 = vsub.f32 %v1639_v31, %v1663_v36 }
 0x999   :  { %v1668_v41 = vmul.f32 1.442695, %v1666_v39  ;;  %v1670_v42 = vmul.f32 1.442695, %v1667_v40 }
 0x99b   :  { %2425 = vpow2.f32 %v1668_v41 }
 0x99c   :  { %2427 = vpow2.f32 %v1670_v42 }
 0x9a5   :  { %v2426_v44 = vpop.eup %2425 }
 0x9a6   :  { %1679 = vperm.xlu0 %2336, %v2426_v44   ;;  %v2428_v47 = vpop.eup %2427 }
 0x9aa   :  { %1682 = vperm.xlu0 %2336, %v2428_v47  }
 0xa25   :  { %v1680_v30 = vpop.permute.xlu0 %1679 }
 0xa26   :  { %v1687_v5 = vrot.slane %v1680_v30, %v2917_v58  ;;  %v1700_v53 = vmul.f32 %v1680_v30, %v2881_v46 }
 0xa28   :  { %v1702_v29 = vsel %vm136_vm1, %v1700_v53, 0.0 }
 0xa29   :  { %v1683_v48 = vpop.permute.xlu0 %1682  ;;  %v1703_v55 = vrot.slane %v1702_v29, 4 }
 0xa2a   :  { %v1691_v51 = vrot.slane %v1683_v48, %v2917_v58  ;;  %v1672_v58 = vsub.f32 -inf, %v1654_v33  ;;  %v1701_v35 = vmul.f32 %v1683_v48, %v2886_v49 }
 0xa2b   :  { %v1704_v56 = vadd.f32 %v1703_v55, %v1702_v29 }
 0xa2c   :  { %v1692_v43 = vsel %vm688_vm2, %v1691_v51, %v1687_v5  ;;  %v1673_v7 = vmul.f32 1.442695, %v1672_v58  ;;  %v1709_v54 = vsel %vm136_vm1, %v1701_v35, 0.0 }
 0xa2d   :  { %v1694_v34 = vsel %vm691_vm3, %v1692_v43, 0.0  ;;  %v1710_v38 = vrot.slane %v1709_v54, 4  ;;  %v1705_v21 = vrot.slane %v1704_v56, 2 }
 0xa2e   :  { %1695 = vadd.xlane.f32.xlu0 %v1694_v34  ;;  %2429 = vpow2.f32 %v1673_v7 }
 0xa2f   :  { %v1711_v2 = vadd.f32 %v1710_v38, %v1709_v54  ;;  %v1706_v11 = vadd.f32 %v1705_v21, %v1704_v56 }
 0xa31   :  { %v1712_v57 = vrot.slane %v1711_v2, 2  ;;  %v1707_v46 = vrot.slane %v1706_v11, 1 }
 0xa33   :  { %v1713_v59 = vadd.f32 %v1712_v57, %v1711_v2  ;;  %v1708_v61 = vadd.f32 %v1707_v46, %v1706_v11 }
 0xa35   :  { %v1714_v49 = vrot.slane %v1713_v59, 1 }
 0xa37   :  { %v1715_v16 = vadd.f32 %v1714_v49, %v1713_v59 }
 0xa38   :  { %v2430_v9 = vpop.eup %2429 }
 0xa39   :  { %v1675_v50 = vmul.f32 0.0, %v2430_v9  ;;  %v1718_v25 = vsel %vm688_vm2, %v1715_v16, %v1708_v61 }
 0xa3b   :  { %v1720_v3 = vadd.f32 %v1718_v25, %v1675_v50 }
 0xabb   :  { %v1696_v13 = vpop.xlane.xlu0 %1695 }
 0xabc   :  { %v1697_v15 = vadd.f32 %v1696_v13, %v1675_v50 }
 0xabe   :  { %2431 = vrcp.f32 %v1697_v15 }
 0xac8   :  { %v2432_v17 = vpop.eup %2431 }
 0xac9   :  { %v1722_v62 = vmul.f32 %v2432_v17, %v1720_v3 }
 0xacb   :  { %v1728_v63 = vpack.c.bf16 %v1722_v62, %v1722_v62 }
 0xacd   :  { %2295 = vmatmul.mubr.msk.bf16.vlgmr.msra.gmra.mrb[44].mxu0 %vm136_vm1, %v1728_v63 }
 0xace   :  { %2307 = vmatpush3.bf16.msra.mxu0 %v2357_v60  ;;  %2314 = vmatprep.mubr.msk.bf16.mxu0 %vm2610_vm0, %v2609_v0 }
 0xacf   :  { %2308 = vmatprep.subr.bf16.mxu0 %v2609_v0 }
 0xad2   :  { %2309 = vmatpush3.bf16.msra.mxu0 %v2358_v1 }
 0xad3   :  { %2310 = vmatprep.subr.bf16.mxu0 %v2609_v0 }
 0xad6   :  { %2311 = vmatpush3.bf16.msra.mxu0 %v2359_v18 }
 0xad7   :  { %2312 = vmatprep.subr.bf16.mxu0 %v2609_v0  ;;  %v2009_v0 = vld [vmem:[%s3143_s8] ss:$0 sm:$0xff] }
 0xada   :  { %2313 = vmatpush3.bf16.msra.mxu0 %v2360_v45 }
 0xba0   :  { %v1782_v19 = vpop.f32.mrb[44].mxu0 }
 0xba1   :  { %v1838_v20 = vadd.f32 %v3089_v10, %v1782_v19  ;;  %v2296_v23 = vpop.f32.mrb[45].mxu0 }
 0xba2   :  { %v1785_v27 = vpop.f32.mrb[46].mxu0 }
 0xba3   :  { %v1850_v28 = vadd.f32 %v2008_v22, %v1838_v20  ;;  %v2297_v31 = vpop.f32.mrb[47].mxu0 }
 0xba5   :  { %vm1851_vm4 = vcmp.gt.f32.partialorder %v1850_v28, 0.0  ;;  %v1852_v4 = vmul.f32 0.01, %v1850_v28 }
 0xba7   :  { %v1853_v6 = vsel %vm1851_vm4, %v1850_v28, %v1852_v4 }
 0xba8   :  { %v1854_v37 = vpack.c.bf16 %v1853_v6, %v1853_v6 }
 0xbaa   :  { %2315 = vmatmul.mubr.msk.bf16.vlgmr.msra.gmra.mrb[48].mxu0 %vm1894_vm5, %v1854_v37 }
 0xc7d   :  { %v1932_v8 = vpop.f32.mrb[48].mxu0 }
 0xc7e   :  { %v1933_v12 = vadd.f32 %v2009_v0, %v1932_v8  ;;  %v2316_v32 = vpop.f32.mrb[49].mxu0 }
 0xc7f   :  { %v1935_v10 = vpop.f32.mrb[50].mxu0 }
 0xc80   :  { %1938 = vst [vmem:[#allocation13] sm:$0x3] %v1933_v12  ;;  %v2317_v14 = vpop.f32.mrb[51].mxu0 }
 0xc81   :  { %2576 = shalt.err (!%p2573_p10)
}
 0xc82   :  { %s2577_s8 = scalar_lea.hbm %s3144_s9, 32 }
 0xc83   :  { %p2578_p11 = scmp.ne.s32.totalorder %s3144_s9, %s2577_s8  ;;  %p2581_p12 = scmp.lt.u32.totalorder %s2577_s8, %s3144_s9 }
 0xc85   :  { %p2583_p13 = pnand %p2581_p12, %p2578_p11 }
 0xc87   :  { %2586 = shalt.err (!%p2583_p13)
}
 0xc88   :  { %1948 = dma.vmem_to_hbm [thread:$0]  %s1946_s27, 32, %s3144_s9, [#allocation4]  }
 0xc89   :  { %2595 = dma.done.wait [#allocation4], 32  }
 0xc8a   :  { %2596 = vsyncadd [#allocation4], 4294967264 }
 0xc8b   :  { %1952 = vsyncpa [#allocation3], 1 }
 0xc8c   :  { %1953 = vsyncpa [#allocation6], 1 }
 0xc8d   :  { %1954 = vsyncpa [#allocation9], 1 }
 0xc8e   :  { %1955 = vsyncpa [#allocation12], 1 }
 0xc8f   :  { %1956 = vsyncpa [#allocation4], 1 }

// kernel: tpu_custom_call.1
= control target key start
LH: loop header
LB: loop body
LE: loop exit
PB: predicated region body
PF: predicated region fallthrough
CT: control target
= control target key end

     0   :  { %14 = vsyncpa [#allocation3], 0  ;;  %s3135_s0 = inlined_call_operand.hbm [shape: f32[2,8,32], index: 0, kind: input, shape index: {}]   ;;  %s3136_s1 = inlined_call_operand.hbm [shape: bf16[4,32,32], index: 1, kind: input, shape index: {}]   ;;  %s3137_s2 = inlined_call_operand.hbm [shape: bf16[4,32,32], index: 2, kind: input, shape index: {}]   ;;  %s3138_s3 = inlined_call_operand.hbm [shape: f32[4,1,32], index: 3, kind: input, shape index: {}]   ;;  %s3139_s4 = inlined_call_operand.hbm [shape: bf16[32,64], index: 4, kind: input, shape index: {}]   ;;  %s3140_s5 = inlined_call_operand.vmem [shape: bf16[32,64], index: 5, kind: input, shape index: {}]   ;;  %s3141_s6 = inlined_call_operand.vmem [shape: f32[1,64], index: 6, kind: input, shape index: {}]   ;;  %s3142_s7 = inlined_call_operand.hbm [shape: bf16[64,128], index: 7, kind: input, shape index: {}]   ;;  %s3143_s8 = inlined_call_operand.vmem [shape: f32[1,128], index: 8, kind: input, shape index: {}]   ;;  %s3144_s9 = inlined_call_operand.hbm [shape: f32[2,128], index: 9, kind: output, shape index: {}]  }
   0x1   :  { %15 = vsyncpa [#allocation6], 0 }
   0x2   :  { %16 = vsyncpa [#allocation9], 0 }
   0x3   :  { %17 = vsyncpa [#allocation12], 0 }
   0x4   :  { %18 = vsyncpa [#allocation4], 0  ;;  %s2597_s30 = smov [#allocation5]   ;;  %s2433_s13 = scalar_lea.hbm %s3136_s1, 1024 }
   0x5   :  { %s36_s10 = sshll.u32 %s2597_s30, 4  ;;  %p2434_p0 = scmp.ne.s32.totalorder %s3136_s1, %s2433_s13  ;;  %s37_s10 = int_to_ptr.vmem [resolvable:$true] %s36_s10 }
   0x6   :  { %p2437_p1 = scmp.lt.u32.totalorder %s2433_s13, %s3136_s1 }
   0x8   :  { %p2439_p2 = pnand %p2437_p1, %p2434_p0 }
   0xa   :  { %2442 = shalt.err (!%p2439_p2)
}
   0xb   :  { %s2443_s18 = scalar_lea.vmem %s37_s10, 1024  ;;  %p2448_p4 = scmp.lt.s32.totalorder %s37_s10, %s37_s10 }
   0xc   :  { %p2444_p3 = scmp.ne.s32.totalorder %s37_s10, %s2443_s18  ;;  %p2449_p5 = scmp.lt.s32.totalorder %s2443_s18, %s2443_s18 }
   0xe   :  { %p2450_p6 = por %p2449_p5, %p2448_p4 }
  0x10   :  { %p2451_p7 = pnand %p2450_p6, %p2444_p3 }
  0x12   :  { %2454 = shalt.err (!%p2451_p7)
}
  0x13   :  { %s2598_s19 = smov 64   ;;  %s2599_s20 = smov 4  }
  0x14   :  { %42 = dma.hbm_to_vmem [thread:$0]  %s3136_s1, 1024, %s37_s10, [#allocation6], %s2598_s19, %s2598_s19, %s2599_s20  }
  0x15   :  { %s2600_s23 = smov [#allocation8]   ;;  %s2455_s27 = scalar_lea.hbm %s3138_s3, 64 }
  0x16   :  { %s60_s24 = sshll.u32 %s2600_s23, 4  ;;  %p2456_p8 = scmp.ne.s32.totalorder %s3138_s3, %s2455_s27  ;;  %s61_s24 = int_to_ptr.vmem [resolvable:$true] %s60_s24 }
  0x17   :  { %p2459_p9 = scmp.lt.u32.totalorder %s2455_s27, %s3138_s3 }
  0x19   :  { %p2461_p10 = pnand %p2459_p9, %p2456_p8 }
  0x1b   :  { %2464 = shalt.err (!%p2461_p10)
}
  0x1c   :  { %s2465_s12 = scalar_lea.vmem %s61_s24, 64  ;;  %p2470_p12 = scmp.lt.s32.totalorder %s61_s24, %s61_s24 }
  0x1d   :  { %p2466_p11 = scmp.ne.s32.totalorder %s61_s24, %s2465_s12  ;;  %p2471_p13 = scmp.lt.s32.totalorder %s2465_s12, %s2465_s12 }
  0x1f   :  { %p2472_p0 = por %p2471_p13, %p2470_p12 }
  0x21   :  { %p2473_p1 = pnand %p2472_p0, %p2466_p11 }
  0x23   :  { %2476 = shalt.err (!%p2473_p1)
}
  0x24   :  { %s2601_s1 = smov 16   ;;  %s2602_s10 = smov 1  }
  0x25   :  { %66 = dma.hbm_to_vmem [thread:$0]  %s3138_s3, 64, %s61_s24, [#allocation9], %s2601_s1, %s2601_s1, %s2602_s10  }
  0x26   :  { %s2603_s15 = smov [#allocation2]   ;;  %s2477_s21 = scalar_lea.hbm %s3135_s0, 256 }
  0x27   :  { %s24_s16 = sshll.u32 %s2603_s15, 4  ;;  %p2478_p2 = scmp.ne.s32.totalorder %s3135_s0, %s2477_s21  ;;  %s25_s16 = int_to_ptr.vmem [resolvable:$true] %s24_s16 }
  0x28   :  { %p2481_p3 = scmp.lt.u32.totalorder %s2477_s21, %s3135_s0 }
  0x2a   :  { %p2483_p4 = pnand %p2481_p3, %p2478_p2 }
  0x2c   :  { %2486 = shalt.err (!%p2483_p4)
}
  0x2d   :  { %s2487_s27 = scalar_lea.vmem %s25_s16, 256  ;;  %p2492_p6 = scmp.lt.s32.totalorder %s25_s16, %s25_s16 }
  0x2e   :  { %p2488_p5 = scmp.ne.s32.totalorder %s25_s16, %s2487_s27  ;;  %p2493_p7 = scmp.lt.s32.totalorder %s2487_s27, %s2487_s27 }
  0x30   :  { %p2494_p8 = por %p2493_p7, %p2492_p6 }
  0x32   :  { %p2495_p9 = pnand %p2494_p8, %p2488_p5 }
  0x34   :  { %2498 = shalt.err (!%p2495_p9)
}
  0x35   :  { %s2604_s3 = smov 128   ;;  %s2605_s24 = smov 8  }
  0x36   :  { %30 = dma.hbm_to_vmem [thread:$0]  %s3135_s0, 256, %s25_s16, [#allocation3], %s2604_s3, %s2604_s3, %s2605_s24  }
  0x37   :  { %s2606_s30 = smov [#allocation7]   ;;  %s2607_s12 = smov [#allocation10]  }
  0x38   :  { %s48_s11 = sshll.u32 %s2606_s30, 4  ;;  %s72_s1 = sshll.u32 %s2607_s12, 4  ;;  %s49_s11 = int_to_ptr.vmem [resolvable:$true] %s48_s11  ;;  %s73_s1 = int_to_ptr.vmem [resolvable:$true] %s72_s1 }
  0x39   :  { %s2499_s14 = scalar_lea.hbm %s3137_s2, 1024 }
  0x3a   :  { %p2500_p10 = scmp.ne.s32.totalorder %s3137_s2, %s2499_s14  ;;  %p2503_p11 = scmp.lt.u32.totalorder %s2499_s14, %s3137_s2 }
  0x3c   :  { %p2505_p12 = pnand %p2503_p11, %p2500_p10 }
  0x3e   :  { %2508 = shalt.err (!%p2505_p12)
}
  0x3f   :  { %s2509_s0 = scalar_lea.vmem %s49_s11, 1024  ;;  %p2514_p0 = scmp.lt.s32.totalorder %s49_s11, %s49_s11 }
  0x40   :  { %p2510_p13 = scmp.ne.s32.totalorder %s49_s11, %s2509_s0  ;;  %p2515_p1 = scmp.lt.s32.totalorder %s2509_s0, %s2509_s0 }
  0x42   :  { %p2516_p2 = por %p2515_p1, %p2514_p0 }
  0x44   :  { %p2517_p3 = pnand %p2516_p2, %p2510_p13 }
  0x46   :  { %2520 = shalt.err (!%p2517_p3)
}
  0x47   :  { %54 = dma.hbm_to_vmem [thread:$0]  %s3137_s2, 1024, %s49_s11, [#allocation6], %s2598_s19, %s2598_s19, %s2599_s20  }
  0x48   :  { %s2521_s26 = scalar_lea.hbm %s3139_s4, 256 }
  0x49   :  { %p2522_p4 = scmp.ne.s32.totalorder %s3139_s4, %s2521_s26  ;;  %p2525_p5 = scmp.lt.u32.totalorder %s2521_s26, %s3139_s4 }
  0x4b   :  { %p2527_p6 = pnand %p2525_p5, %p2522_p4 }
  0x4d   :  { %2530 = shalt.err (!%p2527_p6)
}
  0x4e   :  { %s2531_s29 = scalar_lea.vmem %s73_s1, 256  ;;  %p2536_p8 = scmp.lt.s32.totalorder %s73_s1, %s73_s1 }
  0x4f   :  { %p2532_p7 = scmp.ne.s32.totalorder %s73_s1, %s2531_s29  ;;  %p2537_p9 = scmp.lt.s32.totalorder %s2531_s29, %s2531_s29 }
  0x51   :  { %p2538_p10 = por %p2537_p9, %p2536_p8 }
  0x53   :  { %p2539_p11 = pnand %p2538_p10, %p2532_p7 }
  0x55   :  { %2542 = shalt.err (!%p2539_p11)
}
  0x56   :  { %78 = dma.hbm_to_vmem [thread:$0]  %s3139_s4, 256, %s73_s1, [#allocation9], %s2598_s19, %s2598_s19, %s2599_s20  }
  0x57   :  { %s2608_s11 = smov [#allocation11]   ;;  %s2543_s14 = scalar_lea.hbm %s3142_s7, 512 }
  0x58   :  { %s88_s12 = sshll.u32 %s2608_s11, 4  ;;  %p2544_p12 = scmp.ne.s32.totalorder %s3142_s7, %s2543_s14  ;;  %s89_s12 = int_to_ptr.vmem [resolvable:$true] %s88_s12 }
  0x59   :  { %p2547_p13 = scmp.lt.u32.totalorder %s2543_s14, %s3142_s7 }
  0x5b   :  { %p2549_p0 = pnand %p2547_p13, %p2544_p12 }
  0x5d   :  { %2552 = shalt.err (!%p2549_p0)
}
  0x5e   :  { %s2553_s0 = scalar_lea.vmem %s89_s12, 512  ;;  %p2558_p2 = scmp.lt.s32.totalorder %s89_s12, %s89_s12 }
  0x5f   :  { %p2554_p1 = scmp.ne.s32.totalorder %s89_s12, %s2553_s0  ;;  %p2559_p3 = scmp.lt.s32.totalorder %s2553_s0, %s2553_s0 }
  0x61   :  { %p2560_p4 = por %p2559_p3, %p2558_p2 }
  0x63   :  { %p2561_p5 = pnand %p2560_p4, %p2554_p1 }
  0x65   :  { %2564 = shalt.err (!%p2561_p5)
}
  0x66   :  { %94 = dma.hbm_to_vmem [thread:$0]  %s3142_s7, 512, %s89_s12, [#allocation12], %s2598_s19, %s2598_s19, %s2599_s20  }
  0x67   :  { %2587 = dma.done.wait [#allocation3], 256  }
  0x68   :  { %2588 = vsyncadd [#allocation3], 4294967040 }
  0x69   :  { %2589 = dma.done.wait [#allocation6], 2048  }
  0x6a   :  { %2590 = vsyncadd [#allocation6], 4294965248 }
  0x6b   :  { %2591 = dma.done.wait [#allocation9], 320  }
  0x6c   :  { %2592 = vsyncadd [#allocation9], 4294966976 }
  0x6d   :  { %2593 = dma.done.wait [#allocation12], 512  }
  0x6e   :  { %2594 = vsyncadd [#allocation12], 4294966784  ;;  %v2609_v0 = vmov 0.0   ;;  %vm2610_vm0 = vmmov 0   ;;  %v2611_v1 = vmov 0   ;;  %v2756_v2 = vld [vmem:[#allocation7] sm:$0xff]  }
  0x6f   :  { %2098 = vmatprep.subr.bf16.mxu1 %v2609_v0  ;;  %2102 = vmatprep.mubr.msk.bf16.mxu1 %vm2610_vm0, %v2609_v0  ;;  %v2759_v3 = vld [vmem:[#allocation7 + $0x8] sm:$0xff]   ;;  %v2762_v4 = vld [vmem:[#allocation7 + $0x10] sm:$0xff]   ;;  %v2765_v5 = vld [vmem:[#allocation5] sm:$0xff]   ;;  %vm136_vm1 = vcmask 261120   ;;  %vm688_vm2 = vcmask 1041409   ;;  %vm691_vm3 = vcmask 58368  }
  0x70   :  { %2114 = vmatprep.subr.bf16.mxu0 %v2609_v0  ;;  %2118 = vmatprep.mubr.msk.bf16.mxu0 %vm2610_vm0, %v2609_v0  ;;  %v2770_v6 = vld [vmem:[#allocation7 + $0x18] sm:$0xff]   ;;  %v2774_v7 = vld [vmem:[#allocation5 + $0x8] sm:$0xff]   ;;  %v2780_v8 = vld [vmem:[#allocation7 + $0x20] sm:$0xff]   ;;  %vm1894_vm5 = vcmask 523264   ;;  %s2613_s26 = smov [#allocation13]  }
  0x71   :  { %2336 = vset.pattern.permute.xlu0 %v2611_v1  ;;  %2335 = vset.pattern.permute.xlu1 %v2611_v1  ;;  %v2784_v9 = vld [vmem:[#allocation5 + $0x10] sm:$0xff]   ;;  %v2789_v10 = vld [vmem:[#allocation7 + $0x28] sm:$0xff]   ;;  %v2791_v11 = vld [vmem:[#allocation5 + $0x18] sm:$0xff]   ;;  %s1945_s27 = sshll.u32 %s2613_s26, 4  ;;  %s1946_s27 = int_to_ptr.vmem [resolvable:$true] %s1945_s27 }
  0x72   :  { %2099 = vmatpush3.bf16.msra.mxu1 %v2756_v2  ;;  %2115 = vmatpush3.bf16.msra.mxu0 %v2762_v4  ;;  %v2797_v12 = vld [vmem:[#allocation7 + $0x30] sm:$0xff]   ;;  %v2806_v13 = vld [vmem:[#allocation5 + $0x20] sm:$0xff]   ;;  %v2811_v14 = vld [vmem:[#allocation7 + $0x38] sm:$0xff]   ;;  %p2570_p7 = scmp.lt.s32.totalorder %s1946_s27, %s1946_s27 }
  0x73   :  { %2100 = vmatprep.subr.bf16.mxu1 %v2609_v0  ;;  %2116 = vmatprep.subr.bf16.mxu0 %v2609_v0  ;;  %v2818_v15 = vld [vmem:[#allocation5 + $0x28] sm:$0xff]   ;;  %v2826_v16 = vld [vmem:[#allocation5 + $0x30] sm:$0xff]   ;;  %v2836_v17 = vld [vmem:[#allocation5 + $0x38] sm:$0xff]  }
  0x74   :  { %v2852_v26 = vld [vmem:[#allocation8] ss:$0 sm:$0xff]  ;;  %v2855_v38 = vld [vmem:[#allocation8 + $0x1] ss:$0 sm:$0xff]  ;;  %v2858_v50 = vld [vmem:[#allocation8 + $0x2] ss:$0 sm:$0xff] }
  0x75   :  { %v2861_v60 = vld [vmem:[#allocation8 + $0x3] ss:$0 sm:$0xff] }
  0x76   :  { %2101 = vmatpush3.bf16.msra.mxu1 %v2759_v3  ;;  %2117 = vmatpush3.bf16.msra.mxu0 %v2770_v6 }
  0x77   :  { %2106 = vmatprep.subr.bf16.mxu1 %v2609_v0  ;;  %2130 = vmatprep.subr.bf16.mxu0 %v2609_v0 }
  0x79   :  { %2103 = vmatmul.mubr.bf16.vlgmr.msra.gmra.mrb[0].mxu1 %v2611_v1  ;;  %2119 = vmatmul.mubr.bf16.vlgmr.msra.gmra.mrb[0].mxu0 %v2611_v1 }
  0x7a   :  { %2107 = vmatpush3.bf16.msra.mxu1 %v2765_v5  ;;  %2110 = vmatprep.mubr.msk.bf16.mxu1 %vm2610_vm0, %v2609_v0 }
  0x7b   :  { %2108 = vmatprep.subr.bf16.mxu1 %v2609_v0  ;;  %2131 = vmatpush3.bf16.msra.mxu0 %v2780_v8 }
  0x7c   :  { %2132 = vmatprep.subr.bf16.mxu0 %v2609_v0  ;;  %2134 = vmatprep.mubr.msk.bf16.mxu0 %vm2610_vm0, %v2609_v0 }
  0x7e   :  { %2109 = vmatpush3.bf16.msra.mxu1 %v2774_v7 }
  0x7f   :  { %2122 = vmatprep.subr.bf16.mxu1 %v2609_v0  ;;  %2133 = vmatpush3.bf16.msra.mxu0 %v2789_v10 }
  0x80   :  { %2146 = vmatprep.subr.bf16.mxu0 %v2609_v0 }
  0x81   :  { %2111 = vmatmul.mubr.bf16.vlgmr.msra.gmra.mrb[4].mxu1 %v2611_v1 }
  0x82   :  { %2123 = vmatpush3.bf16.msra.mxu1 %v2784_v9  ;;  %2126 = vmatprep.mubr.msk.bf16.mxu1 %vm2610_vm0, %v2609_v0 }
  0x83   :  { %2124 = vmatprep.subr.bf16.mxu1 %v2609_v0  ;;  %2135 = vmatmul.mubr.bf16.vlgmr.msra.gmra.mrb[4].mxu0 %v2611_v1 }
  0x84   :  { %2147 = vmatpush3.bf16.msra.mxu0 %v2797_v12  ;;  %2150 = vmatprep.mubr.msk.bf16.mxu0 %vm2610_vm0, %v2609_v0 }
  0x85   :  { %2148 = vmatprep.subr.bf16.mxu0 %v2609_v0 }
  0x86   :  { %2125 = vmatpush3.bf16.msra.mxu1 %v2791_v11 }
  0x87   :  { %2138 = vmatprep.subr.bf16.mxu1 %v2609_v0 }
  0x88   :  { %2149 = vmatpush3.bf16.msra.mxu0 %v2811_v14 }
  0x89   :  { %2127 = vmatmul.mubr.bf16.vlgmr.msra.gmra.mrb[8].mxu1 %v2611_v1  ;;  %2162 = vmatprep.subr.bf16.mxu0 %v2609_v0 }
  0x8a   :  { %2139 = vmatpush3.bf16.msra.mxu1 %v2806_v13  ;;  %2142 = vmatprep.mubr.msk.bf16.mxu1 %vm2610_vm0, %v2609_v0 }
  0x8b   :  { %2140 = vmatprep.subr.bf16.mxu1 %v2609_v0  ;;  %2151 = vmatmul.mubr.bf16.vlgmr.msra.gmra.mrb[8].mxu0 %v2611_v1 }
  0x8c   :  { %2163 = vmatpush3.bf16.msra.mxu0 %v2756_v2  ;;  %2166 = vmatprep.mubr.msk.bf16.mxu0 %vm2610_vm0, %v2609_v0 }
  0x8d   :  { %2164 = vmatprep.subr.bf16.mxu0 %v2609_v0 }
  0x8e   :  { %2141 = vmatpush3.bf16.msra.mxu1 %v2818_v15 }
  0x8f   :  { %2154 = vmatprep.subr.bf16.mxu1 %v2609_v0 }
  0x90   :  { %2165 = vmatpush3.bf16.msra.mxu0 %v2759_v3 }
  0x91   :  { %2143 = vmatmul.mubr.bf16.vlgmr.msra.gmra.mrb[12].mxu1 %v2611_v1  ;;  %2178 = vmatprep.subr.bf16.mxu0 %v2609_v0 }
  0x92   :  { %2155 = vmatpush3.bf16.msra.mxu1 %v2826_v16  ;;  %2158 = vmatprep.mubr.msk.bf16.mxu1 %vm2610_vm0, %v2609_v0 }
  0x93   :  { %2156 = vmatprep.subr.bf16.mxu1 %v2609_v0 }
  0x96   :  { %2157 = vmatpush3.bf16.msra.mxu1 %v2836_v17 }
  0x97   :  { %2170 = vmatprep.subr.bf16.mxu1 %v2609_v0 }
  0x99   :  { %2159 = vmatmul.mubr.bf16.vlgmr.msra.gmra.mrb[16].mxu1 %v2611_v1 }
  0x9a   :  { %2171 = vmatpush3.bf16.msra.mxu1 %v2765_v5  ;;  %2174 = vmatprep.mubr.msk.bf16.mxu1 %vm2610_vm0, %v2609_v0 }
  0x9b   :  { %2172 = vmatprep.subr.bf16.mxu1 %v2609_v0 }
  0x9e   :  { %2173 = vmatpush3.bf16.msra.mxu1 %v2774_v7 }
  0x9f   :  { %2186 = vmatprep.subr.bf16.mxu1 %v2609_v0 }
 0x14c   :  { %v174_v18 = vpop.f32.mrb[0].mxu1  ;;  %v296_v22 = vpop.f32.mrb[0].mxu0 }
 0x14d   :  { %v2104_v19 = vpop.f32.mrb[1].mxu1  ;;  %v2120_v23 = vpop.f32.mrb[1].mxu0 }
 0x14e   :  { %v177_v20 = vpop.f32.mrb[2].mxu1  ;;  %v299_v24 = vpop.f32.mrb[2].mxu0 }
 0x14f   :  { %v2105_v21 = vpop.f32.mrb[3].mxu1  ;;  %v2121_v27 = vpop.f32.mrb[3].mxu0 }
 0x154   :  { %v226_v25 = vpop.f32.mrb[4].mxu1 }
 0x155   :  { %v227_v28 = vadd.f32 %v226_v25, %v174_v18  ;;  %v2112_v29 = vpop.f32.mrb[5].mxu1 }
 0x156   :  { %v229_v30 = vpop.f32.mrb[6].mxu1  ;;  %v419_v34 = vpop.f32.mrb[4].mxu0 }
 0x157   :  { %v239_v31 = vadd.f32 %v2852_v26, %v227_v28  ;;  %v2113_v32 = vpop.f32.mrb[7].mxu1  ;;  %v2136_v35 = vpop.f32.mrb[5].mxu0 }
 0x158   :  { %v422_v36 = vpop.f32.mrb[6].mxu0 }
 0x159   :  { %v1978_v33 = vmul.f32 -1.442695, %v239_v31  ;;  %v2137_v39 = vpop.f32.mrb[7].mxu0  ;;  %v2612_v31 = vmov 1966171168  }
 0x15a   :  { %v637_v32 = vunpack.c.l.s4 %v2612_v31 }
 0x15b   :  { %2361 = vpow2.f32 %v1978_v33  ;;  %v639_v33 = vlaneseq }
 0x15c   :  { %v348_v37 = vpop.f32.mrb[8].mxu1 }
 0x15d   :  { %v349_v40 = vadd.f32 %v348_v37, %v296_v22  ;;  %v2128_v41 = vpop.f32.mrb[9].mxu1  ;;  %v2867_v35 = vshrl.u32 %v639_v33, 7 }
 0x15e   :  { %v351_v42 = vpop.f32.mrb[10].mxu1  ;;  %v542_v46 = vpop.f32.mrb[8].mxu0 }
 0x15f   :  { %v362_v43 = vadd.f32 %v2855_v38, %v349_v40  ;;  %v2129_v44 = vpop.f32.mrb[11].mxu1  ;;  %v2152_v47 = vpop.f32.mrb[9].mxu0 }
 0x160   :  { %v545_v48 = vpop.f32.mrb[10].mxu0 }
 0x161   :  { %v1977_v45 = vmul.f32 -1.442695, %v362_v43  ;;  %v2153_v51 = vpop.f32.mrb[11].mxu0  ;;  %v2874_v43 = vsub.s32 0, %v2867_v35 }
 0x163   :  { %2363 = vpow2.f32 %v1977_v45 }
 0x164   :  { %v471_v49 = vpop.f32.mrb[12].mxu1 }
 0x165   :  { %v2362_v52 = vpop.eup %2361  ;;  %v472_v53 = vadd.f32 %v471_v49, %v419_v34  ;;  %v2144_v54 = vpop.f32.mrb[13].mxu1  ;;  %v638_v34 = vunpack.c.0.s8 %v637_v32  ;;  %v2886_v49 = vld [vmem:[#allocation2 + $0x8] sm:$0xff] }
 0x166   :  { %v619_v55 = vadd.f32 1.0, %v2362_v52  ;;  %v474_v56 = vpop.f32.mrb[14].mxu1 }
 0x167   :  { %v485_v57 = vadd.f32 %v2858_v50, %v472_v53  ;;  %v2145_v58 = vpop.f32.mrb[15].mxu1  ;;  %v2870_v37 = vsub.s32 %v638_v34, %v2867_v35  ;;  %v679_v56 = vand.u32 127, %v639_v33  ;;  %v2932_v34 = vsub.s32 1, %v2867_v35 }
 0x168   :  { %2365 = vrcp.f32 %v619_v55 }
 0x169   :  { %2367 = vtanh.f32 %v485_v57  ;;  %v2917_v58 = vsub.s32 %v679_v56, %v2867_v35 }
 0x16c   :  { %v594_v59 = vpop.f32.mrb[16].mxu1 }
 0x16d   :  { %v2364_v61 = vpop.eup %2363  ;;  %v595_v62 = vadd.f32 %v594_v59, %v542_v46  ;;  %v2160_v63 = vpop.f32.mrb[17].mxu1  ;;  %v2881_v46 = vld [vmem:[#allocation2] sm:$0xff] }
 0x16e   :  { %v612_v1 = vadd.f32 1.0, %v2364_v61  ;;  %v597_v18 = vpop.f32.mrb[18].mxu1 }
 0x16f   :  { %v608_v19 = vadd.f32 %v2861_v60, %v595_v62  ;;  %v2161_v20 = vpop.f32.mrb[19].mxu1 }
 0x170   :  { %2369 = vrcp.f32 %v612_v1 }
 0x171   :  { %v1979_v21 = vmul.f32 -1.442695, %v608_v19 }
 0x172   :  { %v2366_v22 = vpop.eup %2365 }
 0x173   :  { %v2368_v23 = vpop.eup %2367  ;;  %2371 = vpow2.f32 %v1979_v21 }
 0x174   :  { %v623_v24 = vmul.f32 %v2368_v23, %v2366_v22 }
 0x17a   :  { %v2370_v25 = vpop.eup %2369 }
 0x17b   :  { %v615_v27 = vmul.f32 0.0, %v2370_v25 }
 0x17d   :  { %v2372_v28 = vpop.eup %2371  ;;  %v2864_v29 = vadd.f32 %v623_v24, %v615_v27 }
 0x17e   :  { %v628_v30 = vadd.f32 1.0, %v2372_v28 }
 0x17f   :  { %2373 = vtanh.f32 %v2864_v29 }
 0x180   :  { %2375 = vrcp.f32 %v628_v30 }
 0x189   :  { %v2374_v36 = vpop.eup %2373 }
 0x18a   :  { %v2376_v39 = vpop.eup %2375 }
 0x18b   :  { %v632_v40 = vmul.f32 %v2376_v39, %v2374_v36 }
 0x18d   :  { %v763_v41 = vpack.c.bf16 %v632_v40, %v632_v40  ;;  %v642_v42 = vrot.slane %v632_v40, %v2870_v37 }
 0x18f   :  { %2175 = vmatmul.mubr.msk.bf16.vlgmr.msra.gmra.mrb[20].mxu1 %vm136_vm1, %v763_v41  ;;  %v650_v44 = vrot.slane %v642_v42, %v2870_v37  ;;  %v643_v45 = vcombine.high %v642_v42, %v642_v42 }
 0x190   :  { %2187 = vmatpush3.bf16.msra.mxu1 %v2784_v9  ;;  %2190 = vmatprep.mubr.msk.bf16.mxu1 %vm2610_vm0, %v2609_v0 }
 0x191   :  { %2188 = vmatprep.subr.bf16.mxu1 %v2609_v0  ;;  %v661_v47 = vrot.slane %v650_v44, %v2874_v43  ;;  %v657_v48 = vrot.slane %v643_v45, %v2870_v37 }
 0x193   :  { %v668_v51 = vmul.f32 %v661_v47, %v2881_v46  ;;  %v665_v52 = vrot.slane %v657_v48, %v2874_v43 }
 0x194   :  { %2189 = vmatpush3.bf16.msra.mxu1 %v2791_v11 }
 0x195   :  { %v670_v53 = vsel %vm136_vm1, %v668_v51, 0.0  ;;  %2202 = vmatprep.subr.bf16.mxu1 %v2609_v0  ;;  %v669_v54 = vmul.f32 %v665_v52, %v2886_v49 }
 0x196   :  { %671 = vadd.xlane.f32.xlu0 %v670_v53 }
 0x197   :  { %2191 = vmatmul.mubr.msk.bf16.vlgmr.msra.gmra.mrb[24].mxu1 %vm136_vm1, %v763_v41  ;;  %v673_v55 = vsel %vm136_vm1, %v669_v54, 0.0 }
 0x198   :  { %2203 = vmatpush3.bf16.msra.mxu1 %v2806_v13  ;;  %2206 = vmatprep.mubr.msk.bf16.mxu1 %vm2610_vm0, %v2609_v0 }
 0x199   :  { %2204 = vmatprep.subr.bf16.mxu1 %v2609_v0 }
 0x19a   :  { %674 = vadd.xlane.f32.xlu0 %v673_v55 }
 0x19c   :  { %2205 = vmatpush3.bf16.msra.mxu1 %v2818_v15 }
 0x19d   :  { %2218 = vmatprep.subr.bf16.mxu1 %v2609_v0 }
 0x19f   :  { %2207 = vmatmul.mubr.msk.bf16.vlgmr.msra.gmra.mrb[28].mxu1 %vm136_vm1, %v763_v41 }
 0x1a0   :  { %2219 = vmatpush3.bf16.msra.mxu1 %v2826_v16  ;;  %2222 = vmatprep.mubr.msk.bf16.mxu1 %vm2610_vm0, %v2609_v0 }
 0x1a1   :  { %2220 = vmatprep.subr.bf16.mxu1 %v2609_v0 }
 0x1a4   :  { %2221 = vmatpush3.bf16.msra.mxu1 %v2836_v17 }
 0x1a5   :  { %2234 = vmatprep.subr.bf16.mxu1 %v2609_v0 }
 0x1a7   :  { %2223 = vmatmul.mubr.msk.bf16.vlgmr.msra.gmra.mrb[32].mxu1 %vm136_vm1, %v763_v41 }
 0x1a8   :  { %2235 = vmatpush3.bf16.msra.mxu1 %v2765_v5  ;;  %2238 = vmatprep.mubr.msk.bf16.mxu1 %vm2610_vm0, %v2609_v0 }
 0x1a9   :  { %2236 = vmatprep.subr.bf16.mxu1 %v2609_v0 }
 0x1ac   :  { %2237 = vmatpush3.bf16.msra.mxu1 %v2774_v7 }
 0x1ad   :  { %2250 = vmatprep.subr.bf16.mxu1 %v2609_v0 }
 0x223   :  { %v672_v57 = vpop.xlane.xlu0 %671 }
 0x224   :  { %v683_v61 = vrot.slane %v672_v57, %v2917_v58 }
 0x227   :  { %v675_v59 = vpop.xlane.xlu0 %674 }
 0x228   :  { %v687_v5 = vrot.slane %v675_v59, %v2917_v58 }
 0x22a   :  { %v689_v62 = vsel %vm688_vm2, %v687_v5, %v683_v61 }
 0x22b   :  { %v692_v63 = vsel %vm691_vm3, %v689_v62, -inf }
 0x22c   :  { %693 = vmax.xlane.f32.xlu1 %v692_v63 }
 0x262   :  { %v2923_v7 = vpop.f32.mrb[20].mxu1 }
 0x263   :  { %v2176_v1 = vpop.f32.mrb[21].mxu1 }
 0x264   :  { %v848_v18 = vpop.f32.mrb[22].mxu1 }
 0x265   :  { %v2177_v19 = vpop.f32.mrb[23].mxu1 }
 0x26a   :  { %v2925_v20 = vpop.f32.mrb[24].mxu1 }
 0x26b   :  { %v2192_v21 = vpop.f32.mrb[25].mxu1 }
 0x26c   :  { %v929_v22 = vpop.f32.mrb[26].mxu1 }
 0x26d   :  { %v2193_v23 = vpop.f32.mrb[27].mxu1 }
 0x272   :  { %v2927_v24 = vpop.f32.mrb[28].mxu1 }
 0x273   :  { %v2208_v25 = vpop.f32.mrb[29].mxu1 }
 0x274   :  { %v1010_v27 = vpop.f32.mrb[30].mxu1 }
 0x275   :  { %v2209_v28 = vpop.f32.mrb[31].mxu1 }
 0x27a   :  { %v2929_v30 = vpop.f32.mrb[32].mxu1 }
 0x27b   :  { %v2224_v31 = vpop.f32.mrb[33].mxu1 }
 0x27c   :  { %v1091_v32 = vpop.f32.mrb[34].mxu1 }
 0x27d   :  { %v2225_v33 = vpop.f32.mrb[35].mxu1 }
 0x2b9   :  { %v694_v36 = vpop.xlane.xlu1 %693 }
 0x2ba   :  { %v699_v39 = vrot.slane %v694_v36, %v2874_v43  ;;  %v703_v40 = vrot.slane %v694_v36, %v2932_v34  ;;  %v712_v56 = vsub.f32 -inf, %v694_v36 }
 0x2bc   :  { %v706_v41 = vsub.f32 %v672_v57, %v699_v39  ;;  %v707_v42 = vsub.f32 %v675_v59, %v703_v40  ;;  %v713_v61 = vmul.f32 1.442695, %v712_v56 }
 0x2be   :  { %v708_v44 = vmul.f32 1.442695, %v706_v41  ;;  %v710_v45 = vmul.f32 1.442695, %v707_v42 }
 0x2c0   :  { %2377 = vpow2.f32 %v708_v44 }
 0x2c1   :  { %2379 = vpow2.f32 %v710_v45 }
 0x2c2   :  { %2381 = vpow2.f32 %v713_v61 }
 0x2ca   :  { %v2378_v47 = vpop.eup %2377 }
 0x2cb   :  { %v2380_v48 = vpop.eup %2379  ;;  %719 = vperm.xlu1 %2335, %v2378_v47  }
 0x2cc   :  { %722 = vperm.xlu0 %2336, %v2380_v48   ;;  %v2382_v23 = vpop.eup %2381 }
 0x2cd   :  { %v715_v28 = vmul.f32 0.0, %v2382_v23 }
 0x34a   :  { %v720_v51 = vpop.permute.xlu1 %719 }
 0x34b   :  { %v723_v52 = vpop.permute.xlu0 %722  ;;  %v727_v35 = vrot.slane %v720_v51, %v2917_v58  ;;  %v740_v59 = vmul.f32 %v720_v51, %v2881_v46 }
 0x34c   :  { %v731_v53 = vrot.slane %v723_v52, %v2917_v58  ;;  %v741_v57 = vmul.f32 %v723_v52, %v2886_v49 }
 0x34d   :  { %v742_v62 = vsel %vm136_vm1, %v740_v59, 0.0 }
 0x34e   :  { %v732_v54 = vsel %vm688_vm2, %v731_v53, %v727_v35  ;;  %v749_v5 = vsel %vm136_vm1, %v741_v57, 0.0  ;;  %v743_v1 = vrot.slane %v742_v62, 4 }
 0x34f   :  { %v734_v55 = vsel %vm691_vm3, %v732_v54, 0.0  ;;  %v750_v63 = vrot.slane %v749_v5, 4 }
 0x350   :  { %735 = vadd.xlane.f32.xlu1 %v734_v55  ;;  %v744_v19 = vadd.f32 %v743_v1, %v742_v62 }
 0x351   :  { %v751_v18 = vadd.f32 %v750_v63, %v749_v5 }
 0x352   :  { %v745_v22 = vrot.slane %v744_v19, 2 }
 0x353   :  { %v752_v21 = vrot.slane %v751_v18, 2 }
 0x354   :  { %v746_v27 = vadd.f32 %v745_v22, %v744_v19 }
 0x355   :  { %v753_v25 = vadd.f32 %v752_v21, %v751_v18 }
 0x356   :  { %v747_v33 = vrot.slane %v746_v27, 1 }
 0x357   :  { %v754_v32 = vrot.slane %v753_v25, 1 }
 0x358   :  { %v748_v40 = vadd.f32 %v747_v33, %v746_v27 }
 0x359   :  { %v755_v39 = vadd.f32 %v754_v32, %v753_v25 }
 0x35b   :  { %v758_v41 = vsel %vm688_vm2, %v755_v39, %v748_v40 }
 0x35c   :  { %v760_v42 = vadd.f32 %v758_v41, %v715_v28 }
 0x3dd   :  { %v736_v31 = vpop.xlane.xlu1 %735 }
 0x3de   :  { %v737_v36 = vadd.f32 %v736_v31, %v715_v28 }
 0x3e0   :  { %2383 = vrcp.f32 %v737_v36 }
 0x3ea   :  { %v2384_v44 = vpop.eup %2383 }
 0x3eb   :  { %v762_v45 = vmul.f32 %v2384_v44, %v760_v42 }
 0x3ed   :  { %v764_v47 = vpack.c.bf16 %v762_v45, %v762_v45 }
 0x3ef   :  { %2167 = vmatmul.mubr.msk.bf16.vlgmr.msra.gmra.mrb[12].mxu0 %vm136_vm1, %v764_v47 }
 0x3f0   :  { %2179 = vmatpush3.bf16.msra.mxu0 %v2762_v4  ;;  %2182 = vmatprep.mubr.msk.bf16.mxu0 %vm2610_vm0, %v2609_v0 }
 0x3f1   :  { %2180 = vmatprep.subr.bf16.mxu0 %v2609_v0 }
 0x3f4   :  { %2181 = vmatpush3.bf16.msra.mxu0 %v2770_v6 }
 0x3f5   :  { %2194 = vmatprep.subr.bf16.mxu0 %v2609_v0 }
 0x3f7   :  { %2183 = vmatmul.mubr.msk.bf16.vlgmr.msra.gmra.mrb[16].mxu0 %vm136_vm1, %v764_v47 }
 0x3f8   :  { %2195 = vmatpush3.bf16.msra.mxu0 %v2780_v8  ;;  %2198 = vmatprep.mubr.msk.bf16.mxu0 %vm2610_vm0, %v2609_v0 }
 0x3f9   :  { %2196 = vmatprep.subr.bf16.mxu0 %v2609_v0 }
 0x3fc   :  { %2197 = vmatpush3.bf16.msra.mxu0 %v2789_v10 }
 0x3fd   :  { %2210 = vmatprep.subr.bf16.mxu0 %v2609_v0 }
 0x3ff   :  { %2199 = vmatmul.mubr.msk.bf16.vlgmr.msra.gmra.mrb[20].mxu0 %vm136_vm1, %v764_v47 }
 0x400   :  { %2211 = vmatpush3.bf16.msra.mxu0 %v2797_v12  ;;  %2214 = vmatprep.mubr.msk.bf16.mxu0 %vm2610_vm0, %v2609_v0 }
 0x401   :  { %2212 = vmatprep.subr.bf16.mxu0 %v2609_v0 }
 0x404   :  { %2213 = vmatpush3.bf16.msra.mxu0 %v2811_v14 }
 0x405   :  { %2226 = vmatprep.subr.bf16.mxu0 %v2609_v0 }
 0x407   :  { %2215 = vmatmul.mubr.msk.bf16.vlgmr.msra.gmra.mrb[24].mxu0 %vm136_vm1, %v764_v47 }
 0x408   :  { %2227 = vmatpush3.bf16.msra.mxu0 %v2756_v2  ;;  %2230 = vmatprep.mubr.msk.bf16.mxu0 %vm2610_vm0, %v2609_v0 }
 0x409   :  { %2228 = vmatprep.subr.bf16.mxu0 %v2609_v0 }
 0x40c   :  { %2229 = vmatpush3.bf16.msra.mxu0 %v2759_v3 }
 0x40d   :  { %2242 = vmatprep.subr.bf16.mxu0 %v2609_v0 }
 0x4c2   :  { %v802_v48 = vpop.f32.mrb[12].mxu0 }
 0x4c3   :  { %v846_v51 = vadd.f32 %v2923_v7, %v802_v48  ;;  %v2168_v52 = vpop.f32.mrb[13].mxu0 }
 0x4c4   :  { %v805_v35 = vpop.f32.mrb[14].mxu0 }
 0x4c5   :  { %v851_v53 = vadd.f32 %v2852_v26, %v846_v51  ;;  %v2169_v54 = vpop.f32.mrb[15].mxu0 }
 0x4c7   :  { %v1989_v55 = vmul.f32 -1.442695, %v851_v53 }
 0x4c9   :  { %2385 = vpow2.f32 %v1989_v55 }
 0x4ca   :  { %v886_v2 = vpop.f32.mrb[16].mxu0 }
 0x4cb   :  { %v927_v56 = vadd.f32 %v2925_v20, %v886_v2  ;;  %v2184_v57 = vpop.f32.mrb[17].mxu0 }
 0x4cc   :  { %v889_v59 = vpop.f32.mrb[18].mxu0 }
 0x4cd   :  { %v932_v61 = vadd.f32 %v2855_v38, %v927_v56  ;;  %v2185_v3 = vpop.f32.mrb[19].mxu0 }
 0x4cf   :  { %v1988_v5 = vmul.f32 -1.442695, %v932_v61 }
 0x4d1   :  { %2387 = vpow2.f32 %v1988_v5 }
 0x4d2   :  { %v967_v62 = vpop.f32.mrb[20].mxu0 }
 0x4d3   :  { %v2386_v63 = vpop.eup %2385  ;;  %v1008_v7 = vadd.f32 %v2927_v24, %v967_v62  ;;  %v2200_v1 = vpop.f32.mrb[21].mxu0 }
 0x4d4   :  { %v1105_v18 = vadd.f32 1.0, %v2386_v63  ;;  %v970_v19 = vpop.f32.mrb[22].mxu0 }
 0x4d5   :  { %v1013_v21 = vadd.f32 %v2858_v50, %v1008_v7  ;;  %v2201_v22 = vpop.f32.mrb[23].mxu0 }
 0x4d6   :  { %2389 = vrcp.f32 %v1105_v18 }
 0x4d7   :  { %2391 = vtanh.f32 %v1013_v21 }
 0x4da   :  { %v1048_v20 = vpop.f32.mrb[24].mxu0 }
 0x4db   :  { %v2388_v23 = vpop.eup %2387  ;;  %v1089_v25 = vadd.f32 %v2929_v30, %v1048_v20  ;;  %v2216_v27 = vpop.f32.mrb[25].mxu0 }
 0x4dc   :  { %v1098_v28 = vadd.f32 1.0, %v2388_v23  ;;  %v1051_v31 = vpop.f32.mrb[26].mxu0 }
 0x4dd   :  { %v1094_v32 = vadd.f32 %v2861_v60, %v1089_v25  ;;  %v2217_v33 = vpop.f32.mrb[27].mxu0 }
 0x4de   :  { %2393 = vrcp.f32 %v1098_v28 }
 0x4df   :  { %v1990_v24 = vmul.f32 -1.442695, %v1094_v32 }
 0x4e0   :  { %v2390_v36 = vpop.eup %2389 }
 0x4e1   :  { %v2392_v39 = vpop.eup %2391  ;;  %2395 = vpow2.f32 %v1990_v24 }
 0x4e2   :  { %v1109_v40 = vmul.f32 %v2392_v39, %v2390_v36 }
 0x4e8   :  { %v2394_v41 = vpop.eup %2393 }
 0x4e9   :  { %v1101_v42 = vmul.f32 %v2394_v41, %v2864_v29 }
 0x4eb   :  { %v2396_v44 = vpop.eup %2395  ;;  %v2982_v45 = vadd.f32 %v1109_v40, %v1101_v42 }
 0x4ec   :  { %v1114_v47 = vadd.f32 1.0, %v2396_v44 }
 0x4ed   :  { %2397 = vtanh.f32 %v2982_v45 }
 0x4ee   :  { %2399 = vrcp.f32 %v1114_v47 }
 0x4f7   :  { %v2398_v30 = vpop.eup %2397 }
 0x4f8   :  { %v2400_v48 = vpop.eup %2399 }
 0x4f9   :  { %v1118_v51 = vmul.f32 %v2400_v48, %v2398_v30 }
 0x4fb   :  { %v1243_v52 = vpack.c.bf16 %v1118_v51, %v1118_v51  ;;  %v1126_v35 = vrot.slane %v1118_v51, %v2870_v37 }
 0x4fd   :  { %2239 = vmatmul.mubr.msk.bf16.vlgmr.msra.gmra.mrb[36].mxu1 %vm136_vm1, %v1243_v52  ;;  %v1134_v53 = vrot.slane %v1126_v35, %v2870_v37  ;;  %v1127_v54 = vcombine.high %v1126_v35, %v1126_v35 }
 0x4fe   :  { %2251 = vmatpush3.bf16.msra.mxu1 %v2784_v9  ;;  %2254 = vmatprep.mubr.msk.bf16.mxu1 %vm2610_vm0, %v2609_v0 }
 0x4ff   :  { %2252 = vmatprep.subr.bf16.mxu1 %v2609_v0  ;;  %v1145_v29 = vrot.slane %v1134_v53, %v2874_v43  ;;  %v1141_v55 = vrot.slane %v1127_v54, %v2870_v37 }
 0x501   :  { %v1152_v2 = vmul.f32 %v1145_v29, %v2881_v46  ;;  %v1149_v56 = vrot.slane %v1141_v55, %v2874_v43 }
 0x502   :  { %2253 = vmatpush3.bf16.msra.mxu1 %v2791_v11 }
 0x503   :  { %v1154_v57 = vsel %vm136_vm1, %v1152_v2, 0.0  ;;  %2266 = vmatprep.subr.bf16.mxu1 %v2609_v0  ;;  %v1153_v9 = vmul.f32 %v1149_v56, %v2886_v49 }
 0x504   :  { %1155 = vadd.xlane.f32.xlu0 %v1154_v57 }
 0x505   :  { %2255 = vmatmul.mubr.msk.bf16.vlgmr.msra.gmra.mrb[40].mxu1 %vm136_vm1, %v1243_v52  ;;  %v1157_v59 = vsel %vm136_vm1, %v1153_v9, 0.0 }
 0x506   :  { %2267 = vmatpush3.bf16.msra.mxu1 %v2806_v13  ;;  %1158 = vadd.xlane.f32.xlu1 %v1157_v59 }
 0x507   :  { %2268 = vmatprep.subr.bf16.mxu1 %v2609_v0  ;;  %2270 = vmatprep.mubr.msk.bf16.mxu1 %vm2610_vm0, %v2609_v0 }
 0x50a   :  { %2269 = vmatpush3.bf16.msra.mxu1 %v2818_v15 }
 0x50b   :  { %2282 = vmatprep.subr.bf16.mxu1 %v2609_v0 }
 0x50d   :  { %2271 = vmatmul.mubr.msk.bf16.vlgmr.msra.gmra.mrb[44].mxu1 %vm136_vm1, %v1243_v52 }
 0x50e   :  { %2283 = vmatpush3.bf16.msra.mxu1 %v2826_v16  ;;  %2286 = vmatprep.mubr.msk.bf16.mxu1 %vm2610_vm0, %v2609_v0 }
 0x50f   :  { %2284 = vmatprep.subr.bf16.mxu1 %v2609_v0 }
 0x512   :  { %2285 = vmatpush3.bf16.msra.mxu1 %v2836_v17 }
 0x513   :  { %2298 = vmatprep.subr.bf16.mxu1 %v2609_v0 }
 0x515   :  { %2287 = vmatmul.mubr.msk.bf16.vlgmr.msra.gmra.mrb[48].mxu1 %vm136_vm1, %v1243_v52 }
 0x516   :  { %2302 = vmatprep.mubr.msk.bf16.mxu1 %vm2610_vm0, %v2609_v0 }
 0x591   :  { %v1156_v11 = vpop.xlane.xlu0 %1155 }
 0x592   :  { %v1165_v15 = vrot.slane %v1156_v11, %v2917_v58 }
 0x593   :  { %v1159_v13 = vpop.xlane.xlu1 %1158 }
 0x594   :  { %v1169_v16 = vrot.slane %v1159_v13, %v2917_v58 }
 0x596   :  { %v1170_v61 = vsel %vm688_vm2, %v1169_v16, %v1165_v15 }
 0x597   :  { %v1172_v3 = vsel %vm691_vm3, %v1170_v61, -inf }
 0x598   :  { %1173 = vmax.xlane.f32.xlu1 %v1172_v3 }
 0x5d0   :  { %v3022_v5 = vpop.f32.mrb[36].mxu1 }
 0x5d1   :  { %v2240_v17 = vpop.f32.mrb[37].mxu1 }
 0x5d2   :  { %v1328_v62 = vpop.f32.mrb[38].mxu1 }
 0x5d3   :  { %v2241_v63 = vpop.f32.mrb[39].mxu1 }
 0x5d8   :  { %v3024_v7 = vpop.f32.mrb[40].mxu1 }
 0x5d9   :  { %v2256_v1 = vpop.f32.mrb[41].mxu1 }
 0x5da   :  { %v1409_v18 = vpop.f32.mrb[42].mxu1 }
 0x5db   :  { %v2257_v19 = vpop.f32.mrb[43].mxu1 }
 0x5e0   :  { %v3026_v21 = vpop.f32.mrb[44].mxu1 }
 0x5e1   :  { %v2272_v22 = vpop.f32.mrb[45].mxu1 }
 0x5e2   :  { %v1490_v20 = vpop.f32.mrb[46].mxu1 }
 0x5e3   :  { %v2273_v23 = vpop.f32.mrb[47].mxu1 }
 0x5e8   :  { %v3028_v25 = vpop.f32.mrb[48].mxu1 }
 0x5e9   :  { %v2288_v27 = vpop.f32.mrb[49].mxu1 }
 0x5ea   :  { %v1571_v28 = vpop.f32.mrb[50].mxu1 }
 0x5eb   :  { %v2289_v31 = vpop.f32.mrb[51].mxu1 }
 0x625   :  { %v1174_v32 = vpop.xlane.xlu1 %1173 }
 0x626   :  { %v1179_v33 = vrot.slane %v1174_v32, %v2874_v43  ;;  %v1183_v24 = vrot.slane %v1174_v32, %v2932_v34  ;;  %v1192_v53 = vsub.f32 -inf, %v1174_v32 }
 0x628   :  { %v1186_v36 = vsub.f32 %v1156_v11, %v1179_v33  ;;  %v1187_v39 = vsub.f32 %v1159_v13, %v1183_v24  ;;  %v1193_v55 = vmul.f32 1.442695, %v1192_v53 }
 0x62a   :  { %v1188_v40 = vmul.f32 1.442695, %v1186_v36  ;;  %v1190_v41 = vmul.f32 1.442695, %v1187_v39 }
 0x62c   :  { %2401 = vpow2.f32 %v1188_v40 }
 0x62d   :  { %2403 = vpow2.f32 %v1190_v41 }
 0x62e   :  { %2405 = vpow2.f32 %v1193_v55 }
 0x636   :  { %v2402_v42 = vpop.eup %2401 }
 0x637   :  { %1199 = vperm.xlu1 %2335, %v2402_v42   ;;  %v2404_v44 = vpop.eup %2403 }
 0x638   :  { %v2406_v16 = vpop.eup %2405 }
 0x639   :  { %v1195_v17 = vmul.f32 0.0, %v2406_v16 }
 0x63b   :  { %1202 = vperm.xlu1 %2335, %v2404_v44  }
 0x6b6   :  { %v1200_v47 = vpop.permute.xlu1 %1199 }
 0x6b7   :  { %v1207_v48 = vrot.slane %v1200_v47, %v2917_v58  ;;  %v1220_v29 = vmul.f32 %v1200_v47, %v2881_v46 }
 0x6b9   :  { %v1222_v56 = vsel %vm136_vm1, %v1220_v29, 0.0 }
 0x6ba   :  { %v1203_v30 = vpop.permute.xlu1 %1202  ;;  %v1223_v9 = vrot.slane %v1222_v56, 4 }
 0x6bb   :  { %v1211_v51 = vrot.slane %v1203_v30, %v2917_v58  ;;  %v1221_v54 = vmul.f32 %v1203_v30, %v2886_v49 }
 0x6bc   :  { %v1224_v11 = vadd.f32 %v1223_v9, %v1222_v56 }
 0x6bd   :  { %v1212_v52 = vsel %vm688_vm2, %v1211_v51, %v1207_v48  ;;  %v1229_v2 = vsel %vm136_vm1, %v1221_v54, 0.0 }
 0x6be   :  { %v1214_v35 = vsel %vm691_vm3, %v1212_v52, 0.0  ;;  %v1230_v57 = vrot.slane %v1229_v2, 4  ;;  %v1225_v15 = vrot.slane %v1224_v11, 2 }
 0x6bf   :  { %1215 = vadd.xlane.f32.xlu0 %v1214_v35 }
 0x6c0   :  { %v1231_v59 = vadd.f32 %v1230_v57, %v1229_v2  ;;  %v1226_v3 = vadd.f32 %v1225_v15, %v1224_v11 }
 0x6c2   :  { %v1232_v13 = vrot.slane %v1231_v59, 2  ;;  %v1227_v18 = vrot.slane %v1226_v3, 1 }
 0x6c4   :  { %v1233_v61 = vadd.f32 %v1232_v13, %v1231_v59  ;;  %v1228_v22 = vadd.f32 %v1227_v18, %v1226_v3 }
 0x6c6   :  { %v1234_v63 = vrot.slane %v1233_v61, 1 }
 0x6c8   :  { %v1235_v19 = vadd.f32 %v1234_v63, %v1233_v61 }
 0x6ca   :  { %v1238_v20 = vsel %vm688_vm2, %v1235_v19, %v1228_v22 }
 0x6cb   :  { %v1240_v23 = vadd.f32 %v1238_v20, %v1195_v17 }
 0x74c   :  { %v1216_v62 = vpop.xlane.xlu0 %1215 }
 0x74d   :  { %v1217_v1 = vadd.f32 %v1216_v62, %v1195_v17 }
 0x74f   :  { %2407 = vrcp.f32 %v1217_v1 }
 0x759   :  { %v2408_v27 = vpop.eup %2407 }
 0x75a   :  { %v1242_v28 = vmul.f32 %v2408_v27, %v1240_v23 }
 0x75c   :  { %v1244_v31 = vpack.c.bf16 %v1242_v28, %v1242_v28 }
 0x75e   :  { %2231 = vmatmul.mubr.msk.bf16.vlgmr.msra.gmra.mrb[28].mxu0 %vm136_vm1, %v1244_v31 }
 0x75f   :  { %2243 = vmatpush3.bf16.msra.mxu0 %v2762_v4  ;;  %2246 = vmatprep.mubr.msk.bf16.mxu0 %vm2610_vm0, %v2609_v0  ;;  %v2353_v4 = vld [vmem:[#allocation10] sm:$0xff]  }
 0x760   :  { %2244 = vmatprep.subr.bf16.mxu0 %v2609_v0  ;;  %2299 = vmatpush3.bf16.msra.mxu1 %v2353_v4 }
 0x761   :  { %2300 = vmatprep.subr.bf16.mxu1 %v2609_v0 }
 0x763   :  { %2245 = vmatpush3.bf16.msra.mxu0 %v2770_v6  ;;  %v2354_v6 = vld [vmem:[#allocation10 + $0x8] sm:$0xff]  }
 0x764   :  { %2258 = vmatprep.subr.bf16.mxu0 %v2609_v0  ;;  %2301 = vmatpush3.bf16.msra.mxu1 %v2354_v6 }
 0x766   :  { %2247 = vmatmul.mubr.msk.bf16.vlgmr.msra.gmra.mrb[32].mxu0 %vm136_vm1, %v1244_v31 }
 0x767   :  { %2259 = vmatpush3.bf16.msra.mxu0 %v2780_v8  ;;  %2262 = vmatprep.mubr.msk.bf16.mxu0 %vm2610_vm0, %v2609_v0 }
 0x768   :  { %2260 = vmatprep.subr.bf16.mxu0 %v2609_v0 }
 0x76b   :  { %2261 = vmatpush3.bf16.msra.mxu0 %v2789_v10 }
 0x76c   :  { %2274 = vmatprep.subr.bf16.mxu0 %v2609_v0 }
 0x76e   :  { %2263 = vmatmul.mubr.msk.bf16.vlgmr.msra.gmra.mrb[36].mxu0 %vm136_vm1, %v1244_v31 }
 0x76f   :  { %2275 = vmatpush3.bf16.msra.mxu0 %v2797_v12  ;;  %2278 = vmatprep.mubr.msk.bf16.mxu0 %vm2610_vm0, %v2609_v0 }
 0x770   :  { %2276 = vmatprep.subr.bf16.mxu0 %v2609_v0 }
 0x773   :  { %2277 = vmatpush3.bf16.msra.mxu0 %v2811_v14 }
 0x774   :  { %2290 = vmatprep.subr.bf16.mxu0 %v2609_v0 }
 0x776   :  { %2279 = vmatmul.mubr.msk.bf16.vlgmr.msra.gmra.mrb[40].mxu0 %vm136_vm1, %v1244_v31 }
 0x777   :  { %2294 = vmatprep.mubr.msk.bf16.mxu0 %vm2610_vm0, %v2609_v0 }
 0x831   :  { %v1282_v8 = vpop.f32.mrb[28].mxu0 }
 0x832   :  { %v1326_v10 = vadd.f32 %v3022_v5, %v1282_v8  ;;  %v2232_v12 = vpop.f32.mrb[29].mxu0 }
 0x833   :  { %v1285_v32 = vpop.f32.mrb[30].mxu0 }
 0x834   :  { %v1331_v14 = vadd.f32 %v2852_v26, %v1326_v10  ;;  %v2233_v33 = vpop.f32.mrb[31].mxu0 }
 0x836   :  { %v2000_v24 = vmul.f32 -1.442695, %v1331_v14 }
 0x838   :  { %2409 = vpow2.f32 %v2000_v24 }
 0x839   :  { %v1366_v36 = vpop.f32.mrb[32].mxu0 }
 0x83a   :  { %v1407_v39 = vadd.f32 %v3024_v7, %v1366_v36  ;;  %v2248_v40 = vpop.f32.mrb[33].mxu0 }
 0x83b   :  { %v1369_v41 = vpop.f32.mrb[34].mxu0 }
 0x83c   :  { %v1412_v42 = vadd.f32 %v2855_v38, %v1407_v39  ;;  %v2249_v44 = vpop.f32.mrb[35].mxu0 }
 0x83e   :  { %v1999_v47 = vmul.f32 -1.442695, %v1412_v42 }
 0x840   :  { %2411 = vpow2.f32 %v1999_v47 }
 0x841   :  { %v1447_v30 = vpop.f32.mrb[36].mxu0 }
 0x842   :  { %v2410_v48 = vpop.eup %2409  ;;  %v1488_v5 = vadd.f32 %v3026_v21, %v1447_v30  ;;  %v2264_v51 = vpop.f32.mrb[37].mxu0 }
 0x843   :  { %v1585_v52 = vadd.f32 1.0, %v2410_v48  ;;  %v1450_v26 = vpop.f32.mrb[38].mxu0 }
 0x844   :  { %v1493_v35 = vadd.f32 %v2858_v50, %v1488_v5  ;;  %v2265_v53 = vpop.f32.mrb[39].mxu0  ;;  %v2356_v26 = vld [vmem:[%s3140_s5 + $0x8] sm:$0xff]  }
 0x845   :  { %2413 = vrcp.f32 %v1585_v52  ;;  %v2355_v52 = vld [vmem:[%s3140_s5] sm:$0xff]  }
 0x846   :  { %2415 = vtanh.f32 %v1493_v35  ;;  %2291 = vmatpush3.bf16.msra.mxu0 %v2355_v52 }
 0x847   :  { %2292 = vmatprep.subr.bf16.mxu0 %v2609_v0 }
 0x849   :  { %v1528_v7 = vpop.f32.mrb[40].mxu0 }
 0x84a   :  { %v2412_v54 = vpop.eup %2411  ;;  %v1569_v29 = vadd.f32 %v3028_v25, %v1528_v7  ;;  %v2280_v38 = vpop.f32.mrb[41].mxu0  ;;  %2293 = vmatpush3.bf16.msra.mxu0 %v2356_v26 }
 0x84b   :  { %v1578_v55 = vadd.f32 1.0, %v2412_v54  ;;  %v1531_v2 = vpop.f32.mrb[42].mxu0  ;;  %2306 = vmatprep.subr.bf16.mxu0 %v2609_v0 }
 0x84c   :  { %v1574_v56 = vadd.f32 %v2861_v60, %v1569_v29  ;;  %v2281_v57 = vpop.f32.mrb[43].mxu0 }
 0x84d   :  { %2417 = vrcp.f32 %v1578_v55 }
 0x84e   :  { %v2001_v21 = vmul.f32 -1.442695, %v1574_v56 }
 0x84f   :  { %v2414_v9 = vpop.eup %2413 }
 0x850   :  { %v2416_v59 = vpop.eup %2415  ;;  %2419 = vpow2.f32 %v2001_v21 }
 0x851   :  { %v1589_v11 = vmul.f32 %v2416_v59, %v2414_v9 }
 0x857   :  { %v2418_v50 = vpop.eup %2417 }
 0x858   :  { %v1581_v13 = vmul.f32 %v2418_v50, %v2982_v45 }
 0x85a   :  { %v2420_v15 = vpop.eup %2419  ;;  %v1590_v16 = vadd.f32 %v1589_v11, %v1581_v13 }
 0x85b   :  { %v1594_v61 = vadd.f32 1.0, %v2420_v15 }
 0x85c   :  { %2421 = vtanh.f32 %v1590_v16 }
 0x85d   :  { %2423 = vrcp.f32 %v1594_v61 }
 0x866   :  { %v2422_v25 = vpop.eup %2421 }
 0x867   :  { %v2424_v3 = vpop.eup %2423 }
 0x868   :  { %v1598_v17 = vmul.f32 %v2424_v3, %v2422_v25 }
 0x86a   :  { %v1723_v62 = vpack.c.bf16 %v1598_v17, %v1598_v17  ;;  %v1606_v60 = vrot.slane %v1598_v17, %v2870_v37 }
 0x86c   :  { %2303 = vmatmul.mubr.msk.bf16.vlgmr.msra.gmra.mrb[52].mxu1 %vm136_vm1, %v1723_v62  ;;  %v1614_v63 = vrot.slane %v1606_v60, %v2870_v37  ;;  %v1607_v1 = vcombine.high %v1606_v60, %v1606_v60  ;;  %v2357_v60 = vld [vmem:[#allocation11] sm:$0xff]  }
 0x86e   :  { %v1625_v18 = vrot.slane %v1614_v63, %v2874_v43  ;;  %v1621_v45 = vrot.slane %v1607_v1, %v2870_v37  ;;  %v2358_v1 = vld [vmem:[#allocation11 + $0x8] sm:$0xff]  }
 0x870   :  { %v1632_v19 = vmul.f32 %v1625_v18, %v2881_v46  ;;  %v1629_v22 = vrot.slane %v1621_v45, %v2874_v43  ;;  %v2359_v18 = vld [vmem:[#allocation11 + $0x10] sm:$0xff]   ;;  %v2360_v45 = vld [vmem:[#allocation11 + $0x18] sm:$0xff]  }
 0x872   :  { %v1634_v20 = vsel %vm136_vm1, %v1632_v19, 0.0  ;;  %v1633_v23 = vmul.f32 %v1629_v22, %v2886_v49  ;;  %v2008_v22 = vld [vmem:[%s3141_s6] ss:$0 sm:$0xff]  ;;  %s2565_s6 = scalar_lea.vmem %s1946_s27, 32 }
 0x873   :  { %1635 = vadd.xlane.f32.xlu1 %v1634_v20  ;;  %p2566_p6 = scmp.ne.s32.totalorder %s1946_s27, %s2565_s6  ;;  %p2571_p8 = scmp.lt.s32.totalorder %s2565_s6, %s2565_s6 }
 0x874   :  { %v1637_v27 = vsel %vm136_vm1, %v1633_v23, 0.0 }
 0x875   :  { %1638 = vadd.xlane.f32.xlu0 %v1637_v27  ;;  %p2572_p9 = por %p2571_p8, %p2570_p7 }
 0x877   :  { %p2573_p10 = pnand %p2572_p9, %p2566_p6 }
 0x900   :  { %v1636_v28 = vpop.xlane.xlu1 %1635 }
 0x901   :  { %v1645_v4 = vrot.slane %v1636_v28, %v2917_v58 }
 0x902   :  { %v1639_v31 = vpop.xlane.xlu0 %1638 }
 0x903   :  { %v1649_v6 = vrot.slane %v1639_v31, %v2917_v58 }
 0x905   :  { %v1650_v37 = vsel %vm688_vm2, %v1649_v6, %v1645_v4 }
 0x906   :  { %v1652_v8 = vsel %vm691_vm3, %v1650_v37, -inf }
 0x907   :  { %1653 = vmax.xlane.f32.xlu0 %v1652_v8 }
 0x93f   :  { %v3089_v10 = vpop.f32.mrb[52].mxu1 }
 0x940   :  { %v2304_v12 = vpop.f32.mrb[53].mxu1 }
 0x941   :  { %v1840_v32 = vpop.f32.mrb[54].mxu1 }
 0x942   :  { %v2305_v14 = vpop.f32.mrb[55].mxu1 }
 0x994   :  { %v1654_v33 = vpop.xlane.xlu0 %1653 }
 0x995   :  { %v1659_v24 = vrot.slane %v1654_v33, %v2874_v43  ;;  %v1663_v36 = vrot.slane %v1654_v33, %v2932_v34 }
 0x997   :  { %v1666_v39 = vsub.f32 %v1636_v28, %v1659_v24  ;;  %v1667_v40 = vsub.f32 %v1639_v31, %v1663_v36 }
 0x999   :  { %v1668_v41 = vmul.f32 1.442695, %v1666_v39  ;;  %v1670_v42 = vmul.f32 1.442695, %v1667_v40 }
 0x99b   :  { %2425 = vpow2.f32 %v1668_v41 }
 0x99c   :  { %2427 = vpow2.f32 %v1670_v42 }
 0x9a5   :  { %v2426_v44 = vpop.eup %2425 }
 0x9a6   :  { %1679 = vperm.xlu0 %2336, %v2426_v44   ;;  %v2428_v47 = vpop.eup %2427 }
 0x9aa   :  { %1682 = vperm.xlu0 %2336, %v2428_v47  }
 0xa25   :  { %v1680_v30 = vpop.permute.xlu0 %1679 }
 0xa26   :  { %v1687_v5 = vrot.slane %v1680_v30, %v2917_v58  ;;  %v1700_v53 = vmul.f32 %v1680_v30, %v2881_v46 }
 0xa28   :  { %v1702_v29 = vsel %vm136_vm1, %v1700_v53, 0.0 }
 0xa29   :  { %v1683_v48 = vpop.permute.xlu0 %1682  ;;  %v1703_v55 = vrot.slane %v1702_v29, 4 }
 0xa2a   :  { %v1691_v51 = vrot.slane %v1683_v48, %v2917_v58  ;;  %v1672_v58 = vsub.f32 -inf, %v1654_v33  ;;  %v1701_v35 = vmul.f32 %v1683_v48, %v2886_v49 }
 0xa2b   :  { %v1704_v56 = vadd.f32 %v1703_v55, %v1702_v29 }
 0xa2c   :  { %v1692_v43 = vsel %vm688_vm2, %v1691_v51, %v1687_v5  ;;  %v1673_v7 = vmul.f32 1.442695, %v1672_v58  ;;  %v1709_v54 = vsel %vm136_vm1, %v1701_v35, 0.0 }
 0xa2d   :  { %v1694_v34 = vsel %vm691_vm3, %v1692_v43, 0.0  ;;  %v1710_v38 = vrot.slane %v1709_v54, 4  ;;  %v1705_v21 = vrot.slane %v1704_v56, 2 }
 0xa2e   :  { %1695 = vadd.xlane.f32.xlu0 %v1694_v34  ;;  %2429 = vpow2.f32 %v1673_v7 }
 0xa2f   :  { %v1711_v2 = vadd.f32 %v1710_v38, %v1709_v54  ;;  %v1706_v11 = vadd.f32 %v1705_v21, %v1704_v56 }
 0xa31   :  { %v1712_v57 = vrot.slane %v1711_v2, 2  ;;  %v1707_v46 = vrot.slane %v1706_v11, 1 }
 0xa33   :  { %v1713_v59 = vadd.f32 %v1712_v57, %v1711_v2  ;;  %v1708_v61 = vadd.f32 %v1707_v46, %v1706_v11 }
 0xa35   :  { %v1714_v49 = vrot.slane %v1713_v59, 1 }
 0xa37   :  { %v1715_v16 = vadd.f32 %v1714_v49, %v1713_v59 }
 0xa38   :  { %v2430_v9 = vpop.eup %2429 }
 0xa39   :  { %v1675_v50 = vmul.f32 0.0, %v2430_v9  ;;  %v1718_v25 = vsel %vm688_vm2, %v1715_v16, %v1708_v61 }
 0xa3b   :  { %v1720_v3 = vadd.f32 %v1718_v25, %v1675_v50 }
 0xabb   :  { %v1696_v13 = vpop.xlane.xlu0 %1695 }
 0xabc   :  { %v1697_v15 = vadd.f32 %v1696_v13, %v1675_v50 }
 0xabe   :  { %2431 = vrcp.f32 %v1697_v15 }
 0xac8   :  { %v2432_v17 = vpop.eup %2431 }
 0xac9   :  { %v1722_v62 = vmul.f32 %v2432_v17, %v1720_v3 }
 0xacb   :  { %v1728_v63 = vpack.c.bf16 %v1722_v62, %v1722_v62 }
 0xacd   :  { %2295 = vmatmul.mubr.msk.bf16.vlgmr.msra.gmra.mrb[44].mxu0 %vm136_vm1, %v1728_v63 }
 0xace   :  { %2307 = vmatpush3.bf16.msra.mxu0 %v2357_v60  ;;  %2314 = vmatprep.mubr.msk.bf16.mxu0 %vm2610_vm0, %v2609_v0 }
 0xacf   :  { %2308 = vmatprep.subr.bf16.mxu0 %v2609_v0 }
 0xad2   :  { %2309 = vmatpush3.bf16.msra.mxu0 %v2358_v1 }
 0xad3   :  { %2310 = vmatprep.subr.bf16.mxu0 %v2609_v0 }
 0xad6   :  { %2311 = vmatpush3.bf16.msra.mxu0 %v2359_v18 }
 0xad7   :  { %2312 = vmatprep.subr.bf16.mxu0 %v2609_v0  ;;  %v2009_v0 = vld [vmem:[%s3143_s8] ss:$0 sm:$0xff] }
 0xada   :  { %2313 = vmatpush3.bf16.msra.mxu0 %v2360_v45 }
 0xba0   :  { %v1782_v19 = vpop.f32.mrb[44].mxu0 }
 0xba1   :  { %v1838_v20 = vadd.f32 %v3089_v10, %v1782_v19  ;;  %v2296_v23 = vpop.f32.mrb[45].mxu0 }
 0xba2   :  { %v1785_v27 = vpop.f32.mrb[46].mxu0 }
 0xba3   :  { %v1850_v28 = vadd.f32 %v2008_v22, %v1838_v20  ;;  %v2297_v31 = vpop.f32.mrb[47].mxu0 }
 0xba5   :  { %vm1851_vm4 = vcmp.gt.f32.partialorder %v1850_v28, 0.0  ;;  %v1852_v4 = vmul.f32 0.01, %v1850_v28 }
 0xba7   :  { %v1853_v6 = vsel %vm1851_vm4, %v1850_v28, %v1852_v4 }
 0xba8   :  { %v1854_v37 = vpack.c.bf16 %v1853_v6, %v1853_v6 }
 0xbaa   :  { %2315 = vmatmul.mubr.msk.bf16.vlgmr.msra.gmra.mrb[48].mxu0 %vm1894_vm5, %v1854_v37 }
 0xc7d   :  { %v1932_v8 = vpop.f32.mrb[48].mxu0 }
 0xc7e   :  { %v1933_v12 = vadd.f32 %v2009_v0, %v1932_v8  ;;  %v2316_v32 = vpop.f32.mrb[49].mxu0 }
 0xc7f   :  { %v1935_v10 = vpop.f32.mrb[50].mxu0 }
 0xc80   :  { %1938 = vst [vmem:[#allocation13] sm:$0x3] %v1933_v12  ;;  %v2317_v14 = vpop.f32.mrb[51].mxu0 }
 0xc81   :  { %2576 = shalt.err (!%p2573_p10)
}
 0xc82   :  { %s2577_s8 = scalar_lea.hbm %s3144_s9, 32 }
 0xc83   :  { %p2578_p11 = scmp.ne.s32.totalorder %s3144_s9, %s2577_s8  ;;  %p2581_p12 = scmp.lt.u32.totalorder %s2577_s8, %s3144_s9 }
 0xc85   :  { %p2583_p13 = pnand %p2581_p12, %p2578_p11 }
 0xc87   :  { %2586 = shalt.err (!%p2583_p13)
}
 0xc88   :  { %1948 = dma.vmem_to_hbm [thread:$0]  %s1946_s27, 32, %s3144_s9, [#allocation4]  }
 0xc89   :  { %2595 = dma.done.wait [#allocation4], 32  }
 0xc8a   :  { %2596 = vsyncadd [#allocation4], 4294967264 }
 0xc8b   :  { %1952 = vsyncpa [#allocation3], 1 }
 0xc8c   :  { %1953 = vsyncpa [#allocation6], 1 }
 0xc8d   :  { %1954 = vsyncpa [#allocation9], 1 }
 0xc8e   :  { %1955 = vsyncpa [#allocation12], 1 }
 0xc8f   :  { %1956 = vsyncpa [#allocation4], 1 }

</bundles_post_ra>
